<compile_context>
chip_gen: v5e
topology: v5e:2x2
jax: 0.10.0
libtpu: 0.0.40
codegen_flags: <defaults>
</compile_context>

<pallas_src>
import math

import jax
import jax.numpy as jnp
from jax import lax
from jax.experimental import pallas as pl
from jax.experimental.pallas import tpu as pltpu


def _round_up(x, m):
    return (x + m - 1) // m * m


def _default_fuse_mxu():
    # v6e/v7x: 2x256-wide MXU -> merge fwd+bwd recurrence dots into one 8H(=256)-col pass.
    # v5-class (and older): 128-wide MXUs -> keep two 128-col dots that overlap across units.
    try:
        kind = jax.devices()[0].device_kind.lower()
        return ("v6" in kind) or ("v7" in kind)
    except Exception:
        return True


def _vmem_bytes_estimate(T, Bp, Din, H, C, num_layers):
    lane = 128
    n = T * Bp * Din                       # x2d
    n += T * Bp * 8 * H                    # gx scratch
    n += 2 * T * Bp * H                    # fwd/bwd activation scratch
    n += Bp * max(C, lane)                 # output (lane-padded)
    for l in range(num_layers):
        din = Din if l == 0 else 2 * H
        n += (din + H) * 8 * H + 8 * H     # wih, whh_cat, bias
    n += 2 * H * max(C, lane) + max(C, lane)
    return 4 * n                           # f32


# ----------------------------------------------------------------------------
# Fused BiRNN kernel factory (all layers + both directions + fc, one call)
# ----------------------------------------------------------------------------
def _make_birnn_kernel(num_layers, T, Bp, H, fuse_mxu):
    H4 = 4 * H

    def kernel(*refs):
        # ---- unpack refs: x, per-layer (wih, whh_cat, bias), fc, out, scratch ----
        x_ref = refs[0]
        pos = 1
        layer_refs = []
        for _ in range(num_layers):
            layer_refs.append(refs[pos:pos + 3])
            pos += 3
        fcw_f_ref, fcw_b_ref, fcb_ref = refs[pos], refs[pos + 1], refs[pos + 2]
        out_ref = refs[pos + 3]
        gx_ref, actf_ref, actb_ref = refs[pos + 4], refs[pos + 5], refs[pos + 6]

        # Hoisted lane mask selecting the g-gate columns [2H, 3H) of the fused (2Bp, 4H)
        # fwd+bwd gate tile (broadcasted_iota built once, outside all loops; JAX won't CSE it).
        lane = lax.broadcasted_iota(jnp.int32, (2 * Bp, H4), 1)
        g_gate_mask = (lane >= 2 * H) & (lane < 3 * H)

        def cell(gcat, ccat):
            # 3 EUP pushes over full-width tiles (sigmoid, tanh, tanh(c')) instead of 5
            # quarter-vreg pushes per direction: compute both nonlinearities once over the
            # whole gate tile and lane-select tanh for the g gate.
            sig = jax.nn.sigmoid(gcat)
            tnh = jnp.tanh(gcat)
            act = jnp.where(g_gate_mask, tnh, sig)
            # NOTE: 32-lane sub-slices below; if bundle dumps show lane-rotate realignment,
            # keep the f*c + i*g math lane-masked at full 128-lane width instead.
            i = act[:, 0 * H:1 * H]
            f = act[:, 1 * H:2 * H]
            g = act[:, 2 * H:3 * H]
            o = act[:, 3 * H:4 * H]
            c_new = f * ccat + i * g
            h_new = o * jnp.tanh(c_new)
            return h_new, c_new

        h_f_last = None
        h_b_t_last = None
        for l, (wih_ref, whh_ref, b_ref) in enumerate(layer_refs):
            is_last = (l == num_layers - 1)

            # ---- hoisted, time-parallel input projection: one big (T*Bp, Din) @ (Din, 8H) ----
            if l == 0:
                gx = jnp.dot(x_ref[...], wih_ref[...], preferred_element_type=jnp.float32)
            else:
                # previous layer activations kept as separate fwd/bwd halves -> two dots,
                # no (T,B,2H) concat ever materialized.
                gx = (jnp.dot(actf_ref[...], wih_ref[:H, :], preferred_element_type=jnp.float32)
                      + jnp.dot(actb_ref[...], wih_ref[H:, :], preferred_element_type=jnp.float32))
            gx_ref[...] = gx + b_ref[...]  # (T*Bp, 8H): [:, :4H]=fwd gates, [:, 4H:]=bwd gates

            whh = whh_ref[...]             # (H, 8H) = [whh_f | whh_b]
            if not fuse_mxu:
                whh_f = whh[:, :H4]
                whh_b = whh[:, H4:]

            # ---- serial recurrence: only h @ W_hh on the critical path; fwd+bwd per step ----
            def step(s, carry):
                hcat, ccat, h_bT1 = carry                 # hcat/ccat: (2Bp, H) = [fwd; bwd]
                rf = pl.multiple_of(s * Bp, Bp)           # fwd processes time s
                rb = pl.multiple_of((T - 1 - s) * Bp, Bp)  # bwd processes time T-1-s
                gx_f = gx_ref[pl.ds(rf, Bp), :]
                gx_b = gx_ref[pl.ds(rb, Bp), :]
                if fuse_mxu:
                    # one 8H-wide MXU pass per step; both output slices are (8,128)-aligned.
                    g_all = jnp.dot(hcat, whh, preferred_element_type=jnp.float32)
                    g_f = g_all[:Bp, :H4]
                    g_b = g_all[Bp:, H4:]
                else:
                    # v5-class: two 128-col dots overlap across independent 128x128 MXUs.
                    g_f = jnp.dot(hcat[:Bp, :], whh_f, preferred_element_type=jnp.float32)
                    g_b = jnp.dot(hcat[Bp:, :], whh_b, preferred_element_type=jnp.float32)
                gcat = jnp.concatenate([g_f + gx_f[:, :H4], g_b + gx_b[:, H4:]], axis=0)
                hcat, ccat = cell(gcat, ccat)
                if is_last:
                    # Only consumers of the last layer: h_fwd(T-1) (final carry) and
                    # h_bwd(t=T-1) (the s==0 step) -> skip all 2*T activation stores and
                    # capture h_bwd(t=T-1) in the carry instead of re-reading actb_ref.
                    w0 = jnp.where(s == 0, 1.0, 0.0)
                    h_bT1 = h_bT1 + w0 * hcat[Bp:, :]
                else:
                    actf_ref[pl.ds(rf, Bp), :] = hcat[:Bp, :]
                    actb_ref[pl.ds(rb, Bp), :] = hcat[Bp:, :]
                return hcat, ccat, h_bT1

            z2 = jnp.zeros((2 * Bp, H), jnp.float32)
            z1 = jnp.zeros((Bp, H), jnp.float32)
            hcat, _, h_bT1 = lax.fori_loop(0, T, step, (z2, z2, z1), unroll=True)
            if is_last:
                h_f_last = hcat[:Bp, :]
                h_b_t_last = h_bT1

        # ---- fc on out[:, -1, :] = concat(h_fwd[T-1], h_bwd at t=T-1), folded in-kernel ----
        logits = (jnp.dot(h_f_last, fcw_f_ref[...], preferred_element_type=jnp.float32)
                  + jnp.dot(h_b_t_last, fcw_b_ref[...], preferred_element_type=jnp.float32)
                  + fcb_ref[...])
        out_ref[...] = logits.astype(out_ref.dtype)

    return kernel


# ----------------------------------------------------------------------------
# BiRNN forward (wrapper): layout plumbing outside, one pallas_call inside.
# ----------------------------------------------------------------------------
def birnn_forward(x, params):
    """x: (B, T, input_size), batch_first like the PyTorch module. Returns (B, n_categories)."""
    B, T, Din = x.shape
    H = params["lstm"][0]["whh_f"].shape[0]
    C = params["fc_w"].shape[1]
    num_layers = len(params["lstm"])
    Bp = max(8, _round_up(B, 8))  # sublane-aligned batch

    # time-major, batch padded to Bp, flattened to (T*Bp, Din): rows [s*Bp, (s+1)*Bp) = time s
    x_tm = jnp.transpose(x, (1, 0, 2)).astype(jnp.float32)
    x_tm = jnp.pad(x_tm, ((0, 0), (0, Bp - B), (0, 0)))
    x2d = x_tm.reshape(T * Bp, Din)

    inputs = [x2d]
    for layer in params["lstm"]:
        whh_cat = jnp.concatenate([layer["whh_f"], layer["whh_b"]], axis=1)  # (H, 8H)
        inputs += [layer["wih"], whh_cat, layer["bias"]]
    inputs += [params["fc_w"][:H], params["fc_w"][H:], params["fc_b"].reshape(1, C)]

    fuse_mxu = _default_fuse_mxu()
    kernel = _make_birnn_kernel(num_layers, T, Bp, H, fuse_mxu)

    vmem_limit = int(min(96 * 2 ** 20,
                         max(8 * 2 ** 20, 2 * _vmem_bytes_estimate(T, Bp, Din, H, C, num_layers))))

    out = pl.pallas_call(
        kernel,
        out_shape=jax.ShapeDtypeStruct((Bp, C), jnp.float32),
        in_specs=[pl.BlockSpec(memory_space=pltpu.MemorySpace.VMEM)] * len(inputs),
        out_specs=pl.BlockSpec(memory_space=pltpu.MemorySpace.VMEM),
        scratch_shapes=[
            pltpu.VMEM((T * Bp, 8 * H), jnp.float32),  # hoisted input-gate projections (reused per layer)
            pltpu.VMEM((T * Bp, H), jnp.float32),      # fwd hidden states of current layer
            pltpu.VMEM((T * Bp, H), jnp.float32),      # bwd hidden states of current layer
        ],
        compiler_params=pltpu.CompilerParams(vmem_limit_bytes=vmem_limit),
    )(*inputs)
    return out[:B]


# ----------------------------------------------------------------------------
# Deterministic parameter init (PyTorch-style uniform(-1/sqrt(H), 1/sqrt(H)))
# Per layer: wih = [W_ih_fwd | W_ih_bwd] (Din, 8H), whh_f/whh_b (H, 4H),
#            bias = [b_fwd | b_bwd] with b = b_ih + b_hh, shape (1, 8H).
# ----------------------------------------------------------------------------
def init_params(key, input_size, hidden_size, n_categories, num_layers):
    H = hidden_size
    k = 1.0 / math.sqrt(H)
    layers = []
    for layer in range(num_layers):
        din = input_size if layer == 0 else 2 * H
        key, kf1, kf2, kf3, kf4, kb1, kb2, kb3, kb4 = jax.random.split(key, 9)
        wih_f = jax.random.uniform(kf1, (din, 4 * H), jnp.float32, -k, k)
        whh_f = jax.random.uniform(kf2, (H, 4 * H), jnp.float32, -k, k)
        b_f = (jax.random.uniform(kf3, (4 * H,), jnp.float32, -k, k)
               + jax.random.uniform(kf4, (4 * H,), jnp.float32, -k, k))
        wih_b = jax.random.uniform(kb1, (din, 4 * H), jnp.float32, -k, k)
        whh_b = jax.random.uniform(kb2, (H, 4 * H), jnp.float32, -k, k)
        b_b = (jax.random.uniform(kb3, (4 * H,), jnp.float32, -k, k)
               + jax.random.uniform(kb4, (4 * H,), jnp.float32, -k, k))
        layers.append({
            "wih": jnp.concatenate([wih_f, wih_b], axis=1),
            "whh_f": whh_f,
            "whh_b": whh_b,
            "bias": jnp.concatenate([b_f, b_b]).reshape(1, 8 * H),
        })
    kfc = 1.0 / math.sqrt(2 * H)
    key, k1, k2 = jax.random.split(key, 3)
    fc_w = jax.random.uniform(k1, (2 * H, n_categories), jnp.float32, -kfc, kfc)
    fc_b = jax.random.uniform(k2, (n_categories,), jnp.float32, -kfc, kfc)
    return {"lstm": layers, "fc_w": fc_w, "fc_b": fc_b}


# ----------------------------------------------------------------------------
# Pure-JAX reference (correctness check only)
# ----------------------------------------------------------------------------
def _ref_lstm_dir(x_tm, w_ih, w_hh, bias, reverse):
    T, B, _ = x_tm.shape
    H = w_hh.shape[0]
    h = jnp.zeros((B, H), jnp.float32)
    c = jnp.zeros((B, H), jnp.float32)
    order = range(T - 1, -1, -1) if reverse else range(T)
    outs = [None] * T
    for t in order:
        g = x_tm[t] @ w_ih + h @ w_hh + bias
        i = jax.nn.sigmoid(g[:, 0 * H:1 * H])
        f = jax.nn.sigmoid(g[:, 1 * H:2 * H])
        gg = jnp.tanh(g[:, 2 * H:3 * H])
        o = jax.nn.sigmoid(g[:, 3 * H:4 * H])
        c = f * c + i * gg
        h = o * jnp.tanh(c)
        outs[t] = h
    return jnp.stack(outs, axis=0)


def birnn_ref(x, params):
    H = params["lstm"][0]["whh_f"].shape[0]
    layer_in = jnp.transpose(x, (1, 0, 2))
    for layer in params["lstm"]:
        wih_f, wih_b = layer["wih"][:, :4 * H], layer["wih"][:, 4 * H:]
        b_f, b_b = layer["bias"][0, :4 * H], layer["bias"][0, 4 * H:]
        hf = _ref_lstm_dir(layer_in, wih_f, layer["whh_f"], b_f, reverse=False)
        hb = _ref_lstm_dir(layer_in, wih_b, layer["whh_b"], b_b, reverse=True)
        layer_in = jnp.concatenate([hf, hb], axis=-1)
    return layer_in[-1] @ params["fc_w"] + params["fc_b"]


if __name__ == "__main__":
    B, T, INPUT_SIZE, HIDDEN, NUM_LAYERS = 2, 8, 16, 32, 2
    categories = ["a", "b", "c", "d"]
    N_CAT = len(categories)

    key = jax.random.PRNGKey(0)
    key, kx, kp = jax.random.split(key, 3)
    x = jax.random.normal(kx, (B, T, INPUT_SIZE), jnp.float32)
    params = init_params(kp, INPUT_SIZE, HIDDEN, N_CAT, NUM_LAYERS)

    forward = jax.jit(birnn_forward)
    out = jax.block_until_ready(forward(x, params))
    assert out.shape == (B, N_CAT), out.shape

    ref = jax.block_until_ready(birnn_ref(x, params))
    assert jnp.allclose(out, ref, atol=1e-4, rtol=1e-4), (out, ref)

    print("KERNEL_OK")
</pallas_src>

<mosaic_0001>
module attributes {stable_mosaic.version = 11 : i64} {
  func.func @kernel(%arg0: memref<64x16xf32, #tpu.memory_space<vmem>>, %arg1: memref<16x256xf32, #tpu.memory_space<vmem>>, %arg2: memref<32x256xf32, #tpu.memory_space<vmem>>, %arg3: memref<1x256xf32, #tpu.memory_space<vmem>>, %arg4: memref<64x256xf32, #tpu.memory_space<vmem>>, %arg5: memref<32x256xf32, #tpu.memory_space<vmem>>, %arg6: memref<1x256xf32, #tpu.memory_space<vmem>>, %arg7: memref<32x4xf32, #tpu.memory_space<vmem>>, %arg8: memref<32x4xf32, #tpu.memory_space<vmem>>, %arg9: memref<1x4xf32, #tpu.memory_space<vmem>>, %arg10: memref<8x4xf32, #tpu.memory_space<vmem>>, %arg11: memref<64x256xf32, #tpu.memory_space<vmem>>, %arg12: memref<64x32xf32, #tpu.memory_space<vmem>>, %arg13: memref<64x32xf32, #tpu.memory_space<vmem>>) attributes {dimension_semantics = [], scalar_prefetch = 0 : i64, scratch_operands = 3 : i64, tpu.core_type = #tpu.core_type<tc>} {
    %0 = tpu.iota {dimensions = array<i32: 1>} : vector<16x128xi32>
    %c64_i32 = arith.constant 64 : i32
    %1 = vector.broadcast %c64_i32 : i32 to vector<16x128xi32>
    %2 = arith.cmpi sge, %0, %1 : vector<16x128xi32>
    %c96_i32 = arith.constant 96 : i32
    %3 = vector.broadcast %c96_i32 : i32 to vector<16x128xi32>
    %4 = arith.cmpi slt, %0, %3 : vector<16x128xi32>
    %5 = arith.andi %2, %4 : vector<16x128xi1>
    %c0 = arith.constant 0 : index
    %c0_0 = arith.constant 0 : index
    %6 = vector.load %arg0[%c0, %c0_0] : memref<64x16xf32, #tpu.memory_space<vmem>>, vector<64x16xf32>
    %c0_1 = arith.constant 0 : index
    %c0_2 = arith.constant 0 : index
    %7 = vector.load %arg1[%c0_1, %c0_2] : memref<16x256xf32, #tpu.memory_space<vmem>>, vector<16x256xf32>
    %cst = arith.constant dense<0.000000e+00> : vector<64x256xf32>
    %8 = tpu.matmul %6, %7, %cst {dimension_numbers = #tpu.dot_dimension_numbers<[1], [0], [0], [1], [0, 0, 1, 1], [], []>} : vector<64x16xf32>, vector<16x256xf32>, vector<64x256xf32> -> vector<64x256xf32>
    %c0_3 = arith.constant 0 : index
    %c0_4 = arith.constant 0 : index
    %9 = vector.load %arg3[%c0_3, %c0_4] : memref<1x256xf32, #tpu.memory_space<vmem>>, vector<1x256xf32>
    %10 = vector.broadcast %9 : vector<1x256xf32> to vector<64x256xf32>
    %11 = arith.addf %8, %10 : vector<64x256xf32>
    %c0_5 = arith.constant 0 : index
    %c0_6 = arith.constant 0 : index
    %12 = vector.load %arg11[%c0_5, %c0_6] : memref<64x256xf32, #tpu.memory_space<vmem>>, vector<64x256xf32>
    tpu.vector_store %arg11[%c0_5, %c0_6], %11 {strides = array<i32>} : memref<64x256xf32, #tpu.memory_space<vmem>>, vector<64x256xf32>,
    %c0_7 = arith.constant 0 : index
    %c0_8 = arith.constant 0 : index
    %13 = vector.load %arg2[%c0_7, %c0_8] : memref<32x256xf32, #tpu.memory_space<vmem>>, vector<32x256xf32>
    %14 = vector.extract_strided_slice %13 {offsets = [0, 0], sizes = [32, 128], strides = [1, 1]} : vector<32x256xf32> to vector<32x128xf32>
    %15 = vector.extract_strided_slice %13 {offsets = [0, 128], sizes = [32, 128], strides = [1, 1]} : vector<32x256xf32> to vector<32x128xf32>
    %cst_9 = arith.constant 0.000000e+00 : f32
    %16 = vector.broadcast %cst_9 : f32 to vector<16x32xf32>
    %c0_i32 = arith.constant 0 : i32
    %c8_i32 = arith.constant 8 : i32
    %17 = arith.muli %c0_i32, %c8_i32 : i32
    %18 = tpu.assume_multiple %17, 8 : i32
    %c7_i32 = arith.constant 7 : i32
    %19 = arith.subi %c7_i32, %c0_i32 : i32
    %c8_i32_10 = arith.constant 8 : i32
    %20 = arith.muli %19, %c8_i32_10 : i32
    %21 = tpu.assume_multiple %20, 8 : i32
    %22 = arith.index_cast %18 : i32 to index
    %c0_11 = arith.constant 0 : index
    %23 = vector.load %arg11[%22, %c0_11] : memref<64x256xf32, #tpu.memory_space<vmem>>, vector<8x256xf32>
    %24 = arith.index_cast %21 : i32 to index
    %c0_12 = arith.constant 0 : index
    %25 = vector.load %arg11[%24, %c0_12] : memref<64x256xf32, #tpu.memory_space<vmem>>, vector<8x256xf32>
    %26 = vector.extract_strided_slice %16 {offsets = [0, 0], sizes = [8, 32], strides = [1, 1]} : vector<16x32xf32> to vector<8x32xf32>
    %cst_13 = arith.constant dense<0.000000e+00> : vector<8x128xf32>
    %27 = tpu.matmul %26, %14, %cst_13 {dimension_numbers = #tpu.dot_dimension_numbers<[1], [0], [0], [1], [0, 0, 1, 1], [], []>} : vector<8x32xf32>, vector<32x128xf32>, vector<8x128xf32> -> vector<8x128xf32>
    %28 = vector.extract_strided_slice %16 {offsets = [8, 0], sizes = [8, 32], strides = [1, 1]} : vector<16x32xf32> to vector<8x32xf32>
    %cst_14 = arith.constant dense<0.000000e+00> : vector<8x128xf32>
    %29 = tpu.matmul %28, %15, %cst_14 {dimension_numbers = #tpu.dot_dimension_numbers<[1], [0], [0], [1], [0, 0, 1, 1], [], []>} : vector<8x32xf32>, vector<32x128xf32>, vector<8x128xf32> -> vector<8x128xf32>
    %30 = vector.extract_strided_slice %23 {offsets = [0, 0], sizes = [8, 128], strides = [1, 1]} : vector<8x256xf32> to vector<8x128xf32>
    %31 = arith.addf %27, %30 : vector<8x128xf32>
    %32 = vector.extract_strided_slice %25 {offsets = [0, 128], sizes = [8, 128], strides = [1, 1]} : vector<8x256xf32> to vector<8x128xf32>
    %33 = arith.addf %29, %32 : vector<8x128xf32>
    %34 = tpu.concatenate %31, %33 in 0 : vector<8x128xf32>, vector<8x128xf32> -> vector<16x128xf32>
    %35 = arith.negf %34 : vector<16x128xf32>
    %36 = math.exp %35 : vector<16x128xf32>
    %cst_15 = arith.constant 1.000000e+00 : f32
    %37 = vector.broadcast %cst_15 : f32 to vector<16x128xf32>
    %38 = arith.addf %37, %36 : vector<16x128xf32>
    %39 = arith.divf %37, %38 : vector<16x128xf32>
    %40 = math.tanh %34 : vector<16x128xf32>
    %41 = arith.select %5, %40, %39 : vector<16x128xi1>, vector<16x128xf32>
    %42 = vector.extract_strided_slice %41 {offsets = [0, 0], sizes = [16, 32], strides = [1, 1]} : vector<16x128xf32> to vector<16x32xf32>
    %43 = vector.extract_strided_slice %41 {offsets = [0, 32], sizes = [16, 32], strides = [1, 1]} : vector<16x128xf32> to vector<16x32xf32>
    %44 = vector.extract_strided_slice %41 {offsets = [0, 64], sizes = [16, 32], strides = [1, 1]} : vector<16x128xf32> to vector<16x32xf32>
    %45 = vector.extract_strided_slice %41 {offsets = [0, 96], sizes = [16, 32], strides = [1, 1]} : vector<16x128xf32> to vector<16x32xf32>
    %46 = arith.mulf %43, %16 : vector<16x32xf32>
    %47 = arith.mulf %42, %44 : vector<16x32xf32>
    %48 = arith.addf %46, %47 : vector<16x32xf32>
    %49 = math.tanh %48 : vector<16x32xf32>
    %50 = arith.mulf %45, %49 : vector<16x32xf32>
    %51 = vector.extract_strided_slice %50 {offsets = [0, 0], sizes = [8, 32], strides = [1, 1]} : vector<16x32xf32> to vector<8x32xf32>
    %52 = arith.index_cast %18 : i32 to index
    %c0_16 = arith.constant 0 : index
    %53 = vector.load %arg12[%52, %c0_16] : memref<64x32xf32, #tpu.memory_space<vmem>>, vector<8x32xf32>
    tpu.vector_store %arg12[%52, %c0_16], %51 {strides = array<i32>} : memref<64x32xf32, #tpu.memory_space<vmem>>, vector<8x32xf32>,
    %54 = vector.extract_strided_slice %50 {offsets = [8, 0], sizes = [8, 32], strides = [1, 1]} : vector<16x32xf32> to vector<8x32xf32>
    %55 = arith.index_cast %21 : i32 to index
    %c0_17 = arith.constant 0 : index
    %56 = vector.load %arg13[%55, %c0_17] : memref<64x32xf32, #tpu.memory_space<vmem>>, vector<8x32xf32>
    tpu.vector_store %arg13[%55, %c0_17], %54 {strides = array<i32>} : memref<64x32xf32, #tpu.memory_space<vmem>>, vector<8x32xf32>,
    %c1_i32 = arith.constant 1 : i32
    %c8_i32_18 = arith.constant 8 : i32
    %57 = arith.muli %c1_i32, %c8_i32_18 : i32
    %58 = tpu.assume_multiple %57, 8 : i32
    %c7_i32_19 = arith.constant 7 : i32
    %59 = arith.subi %c7_i32_19, %c1_i32 : i32
    %c8_i32_20 = arith.constant 8 : i32
    %60 = arith.muli %59, %c8_i32_20 : i32
    %61 = tpu.assume_multiple %60, 8 : i32
    %62 = arith.index_cast %58 : i32 to index
    %c0_21 = arith.constant 0 : index
    %63 = vector.load %arg11[%62, %c0_21] : memref<64x256xf32, #tpu.memory_space<vmem>>, vector<8x256xf32>
    %64 = arith.index_cast %61 : i32 to index
    %c0_22 = arith.constant 0 : index
    %65 = vector.load %arg11[%64, %c0_22] : memref<64x256xf32, #tpu.memory_space<vmem>>, vector<8x256xf32>
    %66 = vector.extract_strided_slice %50 {offsets = [0, 0], sizes = [8, 32], strides = [1, 1]} : vector<16x32xf32> to vector<8x32xf32>
    %cst_23 = arith.constant dense<0.000000e+00> : vector<8x128xf32>
    %67 = tpu.matmul %66, %14, %cst_23 {dimension_numbers = #tpu.dot_dimension_numbers<[1], [0], [0], [1], [0, 0, 1, 1], [], []>} : vector<8x32xf32>, vector<32x128xf32>, vector<8x128xf32> -> vector<8x128xf32>
    %68 = vector.extract_strided_slice %50 {offsets = [8, 0], sizes = [8, 32], strides = [1, 1]} : vector<16x32xf32> to vector<8x32xf32>
    %cst_24 = arith.constant dense<0.000000e+00> : vector<8x128xf32>
    %69 = tpu.matmul %68, %15, %cst_24 {dimension_numbers = #tpu.dot_dimension_numbers<[1], [0], [0], [1], [0, 0, 1, 1], [], []>} : vector<8x32xf32>, vector<32x128xf32>, vector<8x128xf32> -> vector<8x128xf32>
    %70 = vector.extract_strided_slice %63 {offsets = [0, 0], sizes = [8, 128], strides = [1, 1]} : vector<8x256xf32> to vector<8x128xf32>
    %71 = arith.addf %67, %70 : vector<8x128xf32>
    %72 = vector.extract_strided_slice %65 {offsets = [0, 128], sizes = [8, 128], strides = [1, 1]} : vector<8x256xf32> to vector<8x128xf32>
    %73 = arith.addf %69, %72 : vector<8x128xf32>
    %74 = tpu.concatenate %71, %73 in 0 : vector<8x128xf32>, vector<8x128xf32> -> vector<16x128xf32>
    %75 = arith.negf %74 : vector<16x128xf32>
    %76 = math.exp %75 : vector<16x128xf32>
    %cst_25 = arith.constant 1.000000e+00 : f32
    %77 = vector.broadcast %cst_25 : f32 to vector<16x128xf32>
    %78 = arith.addf %77, %76 : vector<16x128xf32>
    %79 = arith.divf %77, %78 : vector<16x128xf32>
    %80 = math.tanh %74 : vector<16x128xf32>
    %81 = arith.select %5, %80, %79 : vector<16x128xi1>, vector<16x128xf32>
    %82 = vector.extract_strided_slice %81 {offsets = [0, 0], sizes = [16, 32], strides = [1, 1]} : vector<16x128xf32> to vector<16x32xf32>
    %83 = vector.extract_strided_slice %81 {offsets = [0, 32], sizes = [16, 32], strides = [1, 1]} : vector<16x128xf32> to vector<16x32xf32>
    %84 = vector.extract_strided_slice %81 {offsets = [0, 64], sizes = [16, 32], strides = [1, 1]} : vector<16x128xf32> to vector<16x32xf32>
    %85 = vector.extract_strided_slice %81 {offsets = [0, 96], sizes = [16, 32], strides = [1, 1]} : vector<16x128xf32> to vector<16x32xf32>
    %86 = arith.mulf %83, %48 : vector<16x32xf32>
    %87 = arith.mulf %82, %84 : vector<16x32xf32>
    %88 = arith.addf %86, %87 : vector<16x32xf32>
    %89 = math.tanh %88 : vector<16x32xf32>
    %90 = arith.mulf %85, %89 : vector<16x32xf32>
    %91 = vector.extract_strided_slice %90 {offsets = [0, 0], sizes = [8, 32], strides = [1, 1]} : vector<16x32xf32> to vector<8x32xf32>
    %92 = arith.index_cast %58 : i32 to index
    %c0_26 = arith.constant 0 : index
    %93 = vector.load %arg12[%92, %c0_26] : memref<64x32xf32, #tpu.memory_space<vmem>>, vector<8x32xf32>
    tpu.vector_store %arg12[%92, %c0_26], %91 {strides = array<i32>} : memref<64x32xf32, #tpu.memory_space<vmem>>, vector<8x32xf32>,
    %94 = vector.extract_strided_slice %90 {offsets = [8, 0], sizes = [8, 32], strides = [1, 1]} : vector<16x32xf32> to vector<8x32xf32>
    %95 = arith.index_cast %61 : i32 to index
    %c0_27 = arith.constant 0 : index
    %96 = vector.load %arg13[%95, %c0_27] : memref<64x32xf32, #tpu.memory_space<vmem>>, vector<8x32xf32>
    tpu.vector_store %arg13[%95, %c0_27], %94 {strides = array<i32>} : memref<64x32xf32, #tpu.memory_space<vmem>>, vector<8x32xf32>,
    %c2_i32 = arith.constant 2 : i32
    %c8_i32_28 = arith.constant 8 : i32
    %97 = arith.muli %c2_i32, %c8_i32_28 : i32
    %98 = tpu.assume_multiple %97, 8 : i32
    %c7_i32_29 = arith.constant 7 : i32
    %99 = arith.subi %c7_i32_29, %c2_i32 : i32
    %c8_i32_30 = arith.constant 8 : i32
    %100 = arith.muli %99, %c8_i32_30 : i32
    %101 = tpu.assume_multiple %100, 8 : i32
    %102 = arith.index_cast %98 : i32 to index
    %c0_31 = arith.constant 0 : index
    %103 = vector.load %arg11[%102, %c0_31] : memref<64x256xf32, #tpu.memory_space<vmem>>, vector<8x256xf32>
    %104 = arith.index_cast %101 : i32 to index
    %c0_32 = arith.constant 0 : index
    %105 = vector.load %arg11[%104, %c0_32] : memref<64x256xf32, #tpu.memory_space<vmem>>, vector<8x256xf32>
    %106 = vector.extract_strided_slice %90 {offsets = [0, 0], sizes = [8, 32], strides = [1, 1]} : vector<16x32xf32> to vector<8x32xf32>
    %cst_33 = arith.constant dense<0.000000e+00> : vector<8x128xf32>
    %107 = tpu.matmul %106, %14, %cst_33 {dimension_numbers = #tpu.dot_dimension_numbers<[1], [0], [0], [1], [0, 0, 1, 1], [], []>} : vector<8x32xf32>, vector<32x128xf32>, vector<8x128xf32> -> vector<8x128xf32>
    %108 = vector.extract_strided_slice %90 {offsets = [8, 0], sizes = [8, 32], strides = [1, 1]} : vector<16x32xf32> to vector<8x32xf32>
    %cst_34 = arith.constant dense<0.000000e+00> : vector<8x128xf32>
    %109 = tpu.matmul %108, %15, %cst_34 {dimension_numbers = #tpu.dot_dimension_numbers<[1], [0], [0], [1], [0, 0, 1, 1], [], []>} : vector<8x32xf32>, vector<32x128xf32>, vector<8x128xf32> -> vector<8x128xf32>
    %110 = vector.extract_strided_slice %103 {offsets = [0, 0], sizes = [8, 128], strides = [1, 1]} : vector<8x256xf32> to vector<8x128xf32>
    %111 = arith.addf %107, %110 : vector<8x128xf32>
    %112 = vector.extract_strided_slice %105 {offsets = [0, 128], sizes = [8, 128], strides = [1, 1]} : vector<8x256xf32> to vector<8x128xf32>
    %113 = arith.addf %109, %112 : vector<8x128xf32>
    %114 = tpu.concatenate %111, %113 in 0 : vector<8x128xf32>, vector<8x128xf32> -> vector<16x128xf32>
    %115 = arith.negf %114 : vector<16x128xf32>
    %116 = math.exp %115 : vector<16x128xf32>
    %cst_35 = arith.constant 1.000000e+00 : f32
    %117 = vector.broadcast %cst_35 : f32 to vector<16x128xf32>
    %118 = arith.addf %117, %116 : vector<16x128xf32>
    %119 = arith.divf %117, %118 : vector<16x128xf32>
    %120 = math.tanh %114 : vector<16x128xf32>
    %121 = arith.select %5, %120, %119 : vector<16x128xi1>, vector<16x128xf32>
    %122 = vector.extract_strided_slice %121 {offsets = [0, 0], sizes = [16, 32], strides = [1, 1]} : vector<16x128xf32> to vector<16x32xf32>
    %123 = vector.extract_strided_slice %121 {offsets = [0, 32], sizes = [16, 32], strides = [1, 1]} : vector<16x128xf32> to vector<16x32xf32>
    %124 = vector.extract_strided_slice %121 {offsets = [0, 64], sizes = [16, 32], strides = [1, 1]} : vector<16x128xf32> to vector<16x32xf32>
    %125 = vector.extract_strided_slice %121 {offsets = [0, 96], sizes = [16, 32], strides = [1, 1]} : vector<16x128xf32> to vector<16x32xf32>
    %126 = arith.mulf %123, %88 : vector<16x32xf32>
    %127 = arith.mulf %122, %124 : vector<16x32xf32>
    %128 = arith.addf %126, %127 : vector<16x32xf32>
    %129 = math.tanh %128 : vector<16x32xf32>
    %130 = arith.mulf %125, %129 : vector<16x32xf32>
    %131 = vector.extract_strided_slice %130 {offsets = [0, 0], sizes = [8, 32], strides = [1, 1]} : vector<16x32xf32> to vector<8x32xf32>
    %132 = arith.index_cast %98 : i32 to index
    %c0_36 = arith.constant 0 : index
    %133 = vector.load %arg12[%132, %c0_36] : memref<64x32xf32, #tpu.memory_space<vmem>>, vector<8x32xf32>
    tpu.vector_store %arg12[%132, %c0_36], %131 {strides = array<i32>} : memref<64x32xf32, #tpu.memory_space<vmem>>, vector<8x32xf32>,
    %134 = vector.extract_strided_slice %130 {offsets = [8, 0], sizes = [8, 32], strides = [1, 1]} : vector<16x32xf32> to vector<8x32xf32>
    %135 = arith.index_cast %101 : i32 to index
    %c0_37 = arith.constant 0 : index
    %136 = vector.load %arg13[%135, %c0_37] : memref<64x32xf32, #tpu.memory_space<vmem>>, vector<8x32xf32>
    tpu.vector_store %arg13[%135, %c0_37], %134 {strides = array<i32>} : memref<64x32xf32, #tpu.memory_space<vmem>>, vector<8x32xf32>,
    %c3_i32 = arith.constant 3 : i32
    %c8_i32_38 = arith.constant 8 : i32
    %137 = arith.muli %c3_i32, %c8_i32_38 : i32
    %138 = tpu.assume_multiple %137, 8 : i32
    %c7_i32_39 = arith.constant 7 : i32
    %139 = arith.subi %c7_i32_39, %c3_i32 : i32
    %c8_i32_40 = arith.constant 8 : i32
    %140 = arith.muli %139, %c8_i32_40 : i32
    %141 = tpu.assume_multiple %140, 8 : i32
    %142 = arith.index_cast %138 : i32 to index
    %c0_41 = arith.constant 0 : index
    %143 = vector.load %arg11[%142, %c0_41] : memref<64x256xf32, #tpu.memory_space<vmem>>, vector<8x256xf32>
    %144 = arith.index_cast %141 : i32 to index
    %c0_42 = arith.constant 0 : index
    %145 = vector.load %arg11[%144, %c0_42] : memref<64x256xf32, #tpu.memory_space<vmem>>, vector<8x256xf32>
    %146 = vector.extract_strided_slice %130 {offsets = [0, 0], sizes = [8, 32], strides = [1, 1]} : vector<16x32xf32> to vector<8x32xf32>
    %cst_43 = arith.constant dense<0.000000e+00> : vector<8x128xf32>
    %147 = tpu.matmul %146, %14, %cst_43 {dimension_numbers = #tpu.dot_dimension_numbers<[1], [0], [0], [1], [0, 0, 1, 1], [], []>} : vector<8x32xf32>, vector<32x128xf32>, vector<8x128xf32> -> vector<8x128xf32>
    %148 = vector.extract_strided_slice %130 {offsets = [8, 0], sizes = [8, 32], strides = [1, 1]} : vector<16x32xf32> to vector<8x32xf32>
    %cst_44 = arith.constant dense<0.000000e+00> : vector<8x128xf32>
    %149 = tpu.matmul %148, %15, %cst_44 {dimension_numbers = #tpu.dot_dimension_numbers<[1], [0], [0], [1], [0, 0, 1, 1], [], []>} : vector<8x32xf32>, vector<32x128xf32>, vector<8x128xf32> -> vector<8x128xf32>
    %150 = vector.extract_strided_slice %143 {offsets = [0, 0], sizes = [8, 128], strides = [1, 1]} : vector<8x256xf32> to vector<8x128xf32>
    %151 = arith.addf %147, %150 : vector<8x128xf32>
    %152 = vector.extract_strided_slice %145 {offsets = [0, 128], sizes = [8, 128], strides = [1, 1]} : vector<8x256xf32> to vector<8x128xf32>
    %153 = arith.addf %149, %152 : vector<8x128xf32>
    %154 = tpu.concatenate %151, %153 in 0 : vector<8x128xf32>, vector<8x128xf32> -> vector<16x128xf32>
    %155 = arith.negf %154 : vector<16x128xf32>
    %156 = math.exp %155 : vector<16x128xf32>
    %cst_45 = arith.constant 1.000000e+00 : f32
    %157 = vector.broadcast %cst_45 : f32 to vector<16x128xf32>
    %158 = arith.addf %157, %156 : vector<16x128xf32>
    %159 = arith.divf %157, %158 : vector<16x128xf32>
    %160 = math.tanh %154 : vector<16x128xf32>
    %161 = arith.select %5, %160, %159 : vector<16x128xi1>, vector<16x128xf32>
    %162 = vector.extract_strided_slice %161 {offsets = [0, 0], sizes = [16, 32], strides = [1, 1]} : vector<16x128xf32> to vector<16x32xf32>
    %163 = vector.extract_strided_slice %161 {offsets = [0, 32], sizes = [16, 32], strides = [1, 1]} : vector<16x128xf32> to vector<16x32xf32>
    %164 = vector.extract_strided_slice %161 {offsets = [0, 64], sizes = [16, 32], strides = [1, 1]} : vector<16x128xf32> to vector<16x32xf32>
    %165 = vector.extract_strided_slice %161 {offsets = [0, 96], sizes = [16, 32], strides = [1, 1]} : vector<16x128xf32> to vector<16x32xf32>
    %166 = arith.mulf %163, %128 : vector<16x32xf32>
    %167 = arith.mulf %162, %164 : vector<16x32xf32>
    %168 = arith.addf %166, %167 : vector<16x32xf32>
    %169 = math.tanh %168 : vector<16x32xf32>
    %170 = arith.mulf %165, %169 : vector<16x32xf32>
    %171 = vector.extract_strided_slice %170 {offsets = [0, 0], sizes = [8, 32], strides = [1, 1]} : vector<16x32xf32> to vector<8x32xf32>
    %172 = arith.index_cast %138 : i32 to index
    %c0_46 = arith.constant 0 : index
    %173 = vector.load %arg12[%172, %c0_46] : memref<64x32xf32, #tpu.memory_space<vmem>>, vector<8x32xf32>
    tpu.vector_store %arg12[%172, %c0_46], %171 {strides = array<i32>} : memref<64x32xf32, #tpu.memory_space<vmem>>, vector<8x32xf32>,
    %174 = vector.extract_strided_slice %170 {offsets = [8, 0], sizes = [8, 32], strides = [1, 1]} : vector<16x32xf32> to vector<8x32xf32>
    %175 = arith.index_cast %141 : i32 to index
    %c0_47 = arith.constant 0 : index
    %176 = vector.load %arg13[%175, %c0_47] : memref<64x32xf32, #tpu.memory_space<vmem>>, vector<8x32xf32>
    tpu.vector_store %arg13[%175, %c0_47], %174 {strides = array<i32>} : memref<64x32xf32, #tpu.memory_space<vmem>>, vector<8x32xf32>,
    %c4_i32 = arith.constant 4 : i32
    %c8_i32_48 = arith.constant 8 : i32
    %177 = arith.muli %c4_i32, %c8_i32_48 : i32
    %178 = tpu.assume_multiple %177, 8 : i32
    %c7_i32_49 = arith.constant 7 : i32
    %179 = arith.subi %c7_i32_49, %c4_i32 : i32
    %c8_i32_50 = arith.constant 8 : i32
    %180 = arith.muli %179, %c8_i32_50 : i32
    %181 = tpu.assume_multiple %180, 8 : i32
    %182 = arith.index_cast %178 : i32 to index
    %c0_51 = arith.constant 0 : index
    %183 = vector.load %arg11[%182, %c0_51] : memref<64x256xf32, #tpu.memory_space<vmem>>, vector<8x256xf32>
    %184 = arith.index_cast %181 : i32 to index
    %c0_52 = arith.constant 0 : index
    %185 = vector.load %arg11[%184, %c0_52] : memref<64x256xf32, #tpu.memory_space<vmem>>, vector<8x256xf32>
    %186 = vector.extract_strided_slice %170 {offsets = [0, 0], sizes = [8, 32], strides = [1, 1]} : vector<16x32xf32> to vector<8x32xf32>
    %cst_53 = arith.constant dense<0.000000e+00> : vector<8x128xf32>
    %187 = tpu.matmul %186, %14, %cst_53 {dimension_numbers = #tpu.dot_dimension_numbers<[1], [0], [0], [1], [0, 0, 1, 1], [], []>} : vector<8x32xf32>, vector<32x128xf32>, vector<8x128xf32> -> vector<8x128xf32>
    %188 = vector.extract_strided_slice %170 {offsets = [8, 0], sizes = [8, 32], strides = [1, 1]} : vector<16x32xf32> to vector<8x32xf32>
    %cst_54 = arith.constant dense<0.000000e+00> : vector<8x128xf32>
    %189 = tpu.matmul %188, %15, %cst_54 {dimension_numbers = #tpu.dot_dimension_numbers<[1], [0], [0], [1], [0, 0, 1, 1], [], []>} : vector<8x32xf32>, vector<32x128xf32>, vector<8x128xf32> -> vector<8x128xf32>
    %190 = vector.extract_strided_slice %183 {offsets = [0, 0], sizes = [8, 128], strides = [1, 1]} : vector<8x256xf32> to vector<8x128xf32>
    %191 = arith.addf %187, %190 : vector<8x128xf32>
    %192 = vector.extract_strided_slice %185 {offsets = [0, 128], sizes = [8, 128], strides = [1, 1]} : vector<8x256xf32> to vector<8x128xf32>
    %193 = arith.addf %189, %192 : vector<8x128xf32>
    %194 = tpu.concatenate %191, %193 in 0 : vector<8x128xf32>, vector<8x128xf32> -> vector<16x128xf32>
    %195 = arith.negf %194 : vector<16x128xf32>
    %196 = math.exp %195 : vector<16x128xf32>
    %cst_55 = arith.constant 1.000000e+00 : f32
    %197 = vector.broadcast %cst_55 : f32 to vector<16x128xf32>
    %198 = arith.addf %197, %196 : vector<16x128xf32>
    %199 = arith.divf %197, %198 : vector<16x128xf32>
    %200 = math.tanh %194 : vector<16x128xf32>
    %201 = arith.select %5, %200, %199 : vector<16x128xi1>, vector<16x128xf32>
    %202 = vector.extract_strided_slice %201 {offsets = [0, 0], sizes = [16, 32], strides = [1, 1]} : vector<16x128xf32> to vector<16x32xf32>
    %203 = vector.extract_strided_slice %201 {offsets = [0, 32], sizes = [16, 32], strides = [1, 1]} : vector<16x128xf32> to vector<16x32xf32>
    %204 = vector.extract_strided_slice %201 {offsets = [0, 64], sizes = [16, 32], strides = [1, 1]} : vector<16x128xf32> to vector<16x32xf32>
    %205 = vector.extract_strided_slice %201 {offsets = [0, 96], sizes = [16, 32], strides = [1, 1]} : vector<16x128xf32> to vector<16x32xf32>
    %206 = arith.mulf %203, %168 : vector<16x32xf32>
    %207 = arith.mulf %202, %204 : vector<16x32xf32>
    %208 = arith.addf %206, %207 : vector<16x32xf32>
    %209 = math.tanh %208 : vector<16x32xf32>
    %210 = arith.mulf %205, %209 : vector<16x32xf32>
    %211 = vector.extract_strided_slice %210 {offsets = [0, 0], sizes = [8, 32], strides = [1, 1]} : vector<16x32xf32> to vector<8x32xf32>
    %212 = arith.index_cast %178 : i32 to index
    %c0_56 = arith.constant 0 : index
    %213 = vector.load %arg12[%212, %c0_56] : memref<64x32xf32, #tpu.memory_space<vmem>>, vector<8x32xf32>
    tpu.vector_store %arg12[%212, %c0_56], %211 {strides = array<i32>} : memref<64x32xf32, #tpu.memory_space<vmem>>, vector<8x32xf32>,
    %214 = vector.extract_strided_slice %210 {offsets = [8, 0], sizes = [8, 32], strides = [1, 1]} : vector<16x32xf32> to vector<8x32xf32>
    %215 = arith.index_cast %181 : i32 to index
    %c0_57 = arith.constant 0 : index
    %216 = vector.load %arg13[%215, %c0_57] : memref<64x32xf32, #tpu.memory_space<vmem>>, vector<8x32xf32>
    tpu.vector_store %arg13[%215, %c0_57], %214 {strides = array<i32>} : memref<64x32xf32, #tpu.memory_space<vmem>>, vector<8x32xf32>,
    %c5_i32 = arith.constant 5 : i32
    %c8_i32_58 = arith.constant 8 : i32
    %217 = arith.muli %c5_i32, %c8_i32_58 : i32
    %218 = tpu.assume_multiple %217, 8 : i32
    %c7_i32_59 = arith.constant 7 : i32
    %219 = arith.subi %c7_i32_59, %c5_i32 : i32
    %c8_i32_60 = arith.constant 8 : i32
    %220 = arith.muli %219, %c8_i32_60 : i32
    %221 = tpu.assume_multiple %220, 8 : i32
    %222 = arith.index_cast %218 : i32 to index
    %c0_61 = arith.constant 0 : index
    %223 = vector.load %arg11[%222, %c0_61] : memref<64x256xf32, #tpu.memory_space<vmem>>, vector<8x256xf32>
    %224 = arith.index_cast %221 : i32 to index
    %c0_62 = arith.constant 0 : index
    %225 = vector.load %arg11[%224, %c0_62] : memref<64x256xf32, #tpu.memory_space<vmem>>, vector<8x256xf32>
    %226 = vector.extract_strided_slice %210 {offsets = [0, 0], sizes = [8, 32], strides = [1, 1]} : vector<16x32xf32> to vector<8x32xf32>
    %cst_63 = arith.constant dense<0.000000e+00> : vector<8x128xf32>
    %227 = tpu.matmul %226, %14, %cst_63 {dimension_numbers = #tpu.dot_dimension_numbers<[1], [0], [0], [1], [0, 0, 1, 1], [], []>} : vector<8x32xf32>, vector<32x128xf32>, vector<8x128xf32> -> vector<8x128xf32>
    %228 = vector.extract_strided_slice %210 {offsets = [8, 0], sizes = [8, 32], strides = [1, 1]} : vector<16x32xf32> to vector<8x32xf32>
    %cst_64 = arith.constant dense<0.000000e+00> : vector<8x128xf32>
    %229 = tpu.matmul %228, %15, %cst_64 {dimension_numbers = #tpu.dot_dimension_numbers<[1], [0], [0], [1], [0, 0, 1, 1], [], []>} : vector<8x32xf32>, vector<32x128xf32>, vector<8x128xf32> -> vector<8x128xf32>
    %230 = vector.extract_strided_slice %223 {offsets = [0, 0], sizes = [8, 128], strides = [1, 1]} : vector<8x256xf32> to vector<8x128xf32>
    %231 = arith.addf %227, %230 : vector<8x128xf32>
    %232 = vector.extract_strided_slice %225 {offsets = [0, 128], sizes = [8, 128], strides = [1, 1]} : vector<8x256xf32> to vector<8x128xf32>
    %233 = arith.addf %229, %232 : vector<8x128xf32>
    %234 = tpu.concatenate %231, %233 in 0 : vector<8x128xf32>, vector<8x128xf32> -> vector<16x128xf32>
    %235 = arith.negf %234 : vector<16x128xf32>
    %236 = math.exp %235 : vector<16x128xf32>
    %cst_65 = arith.constant 1.000000e+00 : f32
    %237 = vector.broadcast %cst_65 : f32 to vector<16x128xf32>
    %238 = arith.addf %237, %236 : vector<16x128xf32>
    %239 = arith.divf %237, %238 : vector<16x128xf32>
    %240 = math.tanh %234 : vector<16x128xf32>
    %241 = arith.select %5, %240, %239 : vector<16x128xi1>, vector<16x128xf32>
    %242 = vector.extract_strided_slice %241 {offsets = [0, 0], sizes = [16, 32], strides = [1, 1]} : vector<16x128xf32> to vector<16x32xf32>
    %243 = vector.extract_strided_slice %241 {offsets = [0, 32], sizes = [16, 32], strides = [1, 1]} : vector<16x128xf32> to vector<16x32xf32>
    %244 = vector.extract_strided_slice %241 {offsets = [0, 64], sizes = [16, 32], strides = [1, 1]} : vector<16x128xf32> to vector<16x32xf32>
    %245 = vector.extract_strided_slice %241 {offsets = [0, 96], sizes = [16, 32], strides = [1, 1]} : vector<16x128xf32> to vector<16x32xf32>
    %246 = arith.mulf %243, %208 : vector<16x32xf32>
    %247 = arith.mulf %242, %244 : vector<16x32xf32>
    %248 = arith.addf %246, %247 : vector<16x32xf32>
    %249 = math.tanh %248 : vector<16x32xf32>
    %250 = arith.mulf %245, %249 : vector<16x32xf32>
    %251 = vector.extract_strided_slice %250 {offsets = [0, 0], sizes = [8, 32], strides = [1, 1]} : vector<16x32xf32> to vector<8x32xf32>
    %252 = arith.index_cast %218 : i32 to index
    %c0_66 = arith.constant 0 : index
    %253 = vector.load %arg12[%252, %c0_66] : memref<64x32xf32, #tpu.memory_space<vmem>>, vector<8x32xf32>
    tpu.vector_store %arg12[%252, %c0_66], %251 {strides = array<i32>} : memref<64x32xf32, #tpu.memory_space<vmem>>, vector<8x32xf32>,
    %254 = vector.extract_strided_slice %250 {offsets = [8, 0], sizes = [8, 32], strides = [1, 1]} : vector<16x32xf32> to vector<8x32xf32>
    %255 = arith.index_cast %221 : i32 to index
    %c0_67 = arith.constant 0 : index
    %256 = vector.load %arg13[%255, %c0_67] : memref<64x32xf32, #tpu.memory_space<vmem>>, vector<8x32xf32>
    tpu.vector_store %arg13[%255, %c0_67], %254 {strides = array<i32>} : memref<64x32xf32, #tpu.memory_space<vmem>>, vector<8x32xf32>,
    %c6_i32 = arith.constant 6 : i32
    %c8_i32_68 = arith.constant 8 : i32
    %257 = arith.muli %c6_i32, %c8_i32_68 : i32
    %258 = tpu.assume_multiple %257, 8 : i32
    %c7_i32_69 = arith.constant 7 : i32
    %259 = arith.subi %c7_i32_69, %c6_i32 : i32
    %c8_i32_70 = arith.constant 8 : i32
    %260 = arith.muli %259, %c8_i32_70 : i32
    %261 = tpu.assume_multiple %260, 8 : i32
    %262 = arith.index_cast %258 : i32 to index
    %c0_71 = arith.constant 0 : index
    %263 = vector.load %arg11[%262, %c0_71] : memref<64x256xf32, #tpu.memory_space<vmem>>, vector<8x256xf32>
    %264 = arith.index_cast %261 : i32 to index
    %c0_72 = arith.constant 0 : index
    %265 = vector.load %arg11[%264, %c0_72] : memref<64x256xf32, #tpu.memory_space<vmem>>, vector<8x256xf32>
    %266 = vector.extract_strided_slice %250 {offsets = [0, 0], sizes = [8, 32], strides = [1, 1]} : vector<16x32xf32> to vector<8x32xf32>
    %cst_73 = arith.constant dense<0.000000e+00> : vector<8x128xf32>
    %267 = tpu.matmul %266, %14, %cst_73 {dimension_numbers = #tpu.dot_dimension_numbers<[1], [0], [0], [1], [0, 0, 1, 1], [], []>} : vector<8x32xf32>, vector<32x128xf32>, vector<8x128xf32> -> vector<8x128xf32>
    %268 = vector.extract_strided_slice %250 {offsets = [8, 0], sizes = [8, 32], strides = [1, 1]} : vector<16x32xf32> to vector<8x32xf32>
    %cst_74 = arith.constant dense<0.000000e+00> : vector<8x128xf32>
    %269 = tpu.matmul %268, %15, %cst_74 {dimension_numbers = #tpu.dot_dimension_numbers<[1], [0], [0], [1], [0, 0, 1, 1], [], []>} : vector<8x32xf32>, vector<32x128xf32>, vector<8x128xf32> -> vector<8x128xf32>
    %270 = vector.extract_strided_slice %263 {offsets = [0, 0], sizes = [8, 128], strides = [1, 1]} : vector<8x256xf32> to vector<8x128xf32>
    %271 = arith.addf %267, %270 : vector<8x128xf32>
    %272 = vector.extract_strided_slice %265 {offsets = [0, 128], sizes = [8, 128], strides = [1, 1]} : vector<8x256xf32> to vector<8x128xf32>
    %273 = arith.addf %269, %272 : vector<8x128xf32>
    %274 = tpu.concatenate %271, %273 in 0 : vector<8x128xf32>, vector<8x128xf32> -> vector<16x128xf32>
    %275 = arith.negf %274 : vector<16x128xf32>
    %276 = math.exp %275 : vector<16x128xf32>
    %cst_75 = arith.constant 1.000000e+00 : f32
    %277 = vector.broadcast %cst_75 : f32 to vector<16x128xf32>
    %278 = arith.addf %277, %276 : vector<16x128xf32>
    %279 = arith.divf %277, %278 : vector<16x128xf32>
    %280 = math.tanh %274 : vector<16x128xf32>
    %281 = arith.select %5, %280, %279 : vector<16x128xi1>, vector<16x128xf32>
    %282 = vector.extract_strided_slice %281 {offsets = [0, 0], sizes = [16, 32], strides = [1, 1]} : vector<16x128xf32> to vector<16x32xf32>
    %283 = vector.extract_strided_slice %281 {offsets = [0, 32], sizes = [16, 32], strides = [1, 1]} : vector<16x128xf32> to vector<16x32xf32>
    %284 = vector.extract_strided_slice %281 {offsets = [0, 64], sizes = [16, 32], strides = [1, 1]} : vector<16x128xf32> to vector<16x32xf32>
    %285 = vector.extract_strided_slice %281 {offsets = [0, 96], sizes = [16, 32], strides = [1, 1]} : vector<16x128xf32> to vector<16x32xf32>
    %286 = arith.mulf %283, %248 : vector<16x32xf32>
    %287 = arith.mulf %282, %284 : vector<16x32xf32>
    %288 = arith.addf %286, %287 : vector<16x32xf32>
    %289 = math.tanh %288 : vector<16x32xf32>
    %290 = arith.mulf %285, %289 : vector<16x32xf32>
    %291 = vector.extract_strided_slice %290 {offsets = [0, 0], sizes = [8, 32], strides = [1, 1]} : vector<16x32xf32> to vector<8x32xf32>
    %292 = arith.index_cast %258 : i32 to index
    %c0_76 = arith.constant 0 : index
    %293 = vector.load %arg12[%292, %c0_76] : memref<64x32xf32, #tpu.memory_space<vmem>>, vector<8x32xf32>
    tpu.vector_store %arg12[%292, %c0_76], %291 {strides = array<i32>} : memref<64x32xf32, #tpu.memory_space<vmem>>, vector<8x32xf32>,
    %294 = vector.extract_strided_slice %290 {offsets = [8, 0], sizes = [8, 32], strides = [1, 1]} : vector<16x32xf32> to vector<8x32xf32>
    %295 = arith.index_cast %261 : i32 to index
    %c0_77 = arith.constant 0 : index
    %296 = vector.load %arg13[%295, %c0_77] : memref<64x32xf32, #tpu.memory_space<vmem>>, vector<8x32xf32>
    tpu.vector_store %arg13[%295, %c0_77], %294 {strides = array<i32>} : memref<64x32xf32, #tpu.memory_space<vmem>>, vector<8x32xf32>,
    %c7_i32_78 = arith.constant 7 : i32
    %c8_i32_79 = arith.constant 8 : i32
    %297 = arith.muli %c7_i32_78, %c8_i32_79 : i32
    %298 = tpu.assume_multiple %297, 8 : i32
    %c7_i32_80 = arith.constant 7 : i32
    %299 = arith.subi %c7_i32_80, %c7_i32_78 : i32
    %c8_i32_81 = arith.constant 8 : i32
    %300 = arith.muli %299, %c8_i32_81 : i32
    %301 = tpu.assume_multiple %300, 8 : i32
    %302 = arith.index_cast %298 : i32 to index
    %c0_82 = arith.constant 0 : index
    %303 = vector.load %arg11[%302, %c0_82] : memref<64x256xf32, #tpu.memory_space<vmem>>, vector<8x256xf32>
    %304 = arith.index_cast %301 : i32 to index
    %c0_83 = arith.constant 0 : index
    %305 = vector.load %arg11[%304, %c0_83] : memref<64x256xf32, #tpu.memory_space<vmem>>, vector<8x256xf32>
    %306 = vector.extract_strided_slice %290 {offsets = [0, 0], sizes = [8, 32], strides = [1, 1]} : vector<16x32xf32> to vector<8x32xf32>
    %cst_84 = arith.constant dense<0.000000e+00> : vector<8x128xf32>
    %307 = tpu.matmul %306, %14, %cst_84 {dimension_numbers = #tpu.dot_dimension_numbers<[1], [0], [0], [1], [0, 0, 1, 1], [], []>} : vector<8x32xf32>, vector<32x128xf32>, vector<8x128xf32> -> vector<8x128xf32>
    %308 = vector.extract_strided_slice %290 {offsets = [8, 0], sizes = [8, 32], strides = [1, 1]} : vector<16x32xf32> to vector<8x32xf32>
    %cst_85 = arith.constant dense<0.000000e+00> : vector<8x128xf32>
    %309 = tpu.matmul %308, %15, %cst_85 {dimension_numbers = #tpu.dot_dimension_numbers<[1], [0], [0], [1], [0, 0, 1, 1], [], []>} : vector<8x32xf32>, vector<32x128xf32>, vector<8x128xf32> -> vector<8x128xf32>
    %310 = vector.extract_strided_slice %303 {offsets = [0, 0], sizes = [8, 128], strides = [1, 1]} : vector<8x256xf32> to vector<8x128xf32>
    %311 = arith.addf %307, %310 : vector<8x128xf32>
    %312 = vector.extract_strided_slice %305 {offsets = [0, 128], sizes = [8, 128], strides = [1, 1]} : vector<8x256xf32> to vector<8x128xf32>
    %313 = arith.addf %309, %312 : vector<8x128xf32>
    %314 = tpu.concatenate %311, %313 in 0 : vector<8x128xf32>, vector<8x128xf32> -> vector<16x128xf32>
    %315 = arith.negf %314 : vector<16x128xf32>
    %316 = math.exp %315 : vector<16x128xf32>
    %cst_86 = arith.constant 1.000000e+00 : f32
    %317 = vector.broadcast %cst_86 : f32 to vector<16x128xf32>
    %318 = arith.addf %317, %316 : vector<16x128xf32>
    %319 = arith.divf %317, %318 : vector<16x128xf32>
    %320 = math.tanh %314 : vector<16x128xf32>
    %321 = arith.select %5, %320, %319 : vector<16x128xi1>, vector<16x128xf32>
    %322 = vector.extract_strided_slice %321 {offsets = [0, 0], sizes = [16, 32], strides = [1, 1]} : vector<16x128xf32> to vector<16x32xf32>
    %323 = vector.extract_strided_slice %321 {offsets = [0, 32], sizes = [16, 32], strides = [1, 1]} : vector<16x128xf32> to vector<16x32xf32>
    %324 = vector.extract_strided_slice %321 {offsets = [0, 64], sizes = [16, 32], strides = [1, 1]} : vector<16x128xf32> to vector<16x32xf32>
    %325 = vector.extract_strided_slice %321 {offsets = [0, 96], sizes = [16, 32], strides = [1, 1]} : vector<16x128xf32> to vector<16x32xf32>
    %326 = arith.mulf %323, %288 : vector<16x32xf32>
    %327 = arith.mulf %322, %324 : vector<16x32xf32>
    %328 = arith.addf %326, %327 : vector<16x32xf32>
    %329 = math.tanh %328 : vector<16x32xf32>
    %330 = arith.mulf %325, %329 : vector<16x32xf32>
    %331 = vector.extract_strided_slice %330 {offsets = [0, 0], sizes = [8, 32], strides = [1, 1]} : vector<16x32xf32> to vector<8x32xf32>
    %332 = arith.index_cast %298 : i32 to index
    %c0_87 = arith.constant 0 : index
    %333 = vector.load %arg12[%332, %c0_87] : memref<64x32xf32, #tpu.memory_space<vmem>>, vector<8x32xf32>
    tpu.vector_store %arg12[%332, %c0_87], %331 {strides = array<i32>} : memref<64x32xf32, #tpu.memory_space<vmem>>, vector<8x32xf32>,
    %334 = vector.extract_strided_slice %330 {offsets = [8, 0], sizes = [8, 32], strides = [1, 1]} : vector<16x32xf32> to vector<8x32xf32>
    %335 = arith.index_cast %301 : i32 to index
    %c0_88 = arith.constant 0 : index
    %336 = vector.load %arg13[%335, %c0_88] : memref<64x32xf32, #tpu.memory_space<vmem>>, vector<8x32xf32>
    tpu.vector_store %arg13[%335, %c0_88], %334 {strides = array<i32>} : memref<64x32xf32, #tpu.memory_space<vmem>>, vector<8x32xf32>,
    %c8_i32_89 = arith.constant 8 : i32
    %c0_90 = arith.constant 0 : index
    %c0_91 = arith.constant 0 : index
    %337 = vector.load %arg12[%c0_90, %c0_91] : memref<64x32xf32, #tpu.memory_space<vmem>>, vector<64x32xf32>
    %c0_92 = arith.constant 0 : index
    %c0_93 = arith.constant 0 : index
    %338 = vector.load %arg4[%c0_92, %c0_93] : memref<64x256xf32, #tpu.memory_space<vmem>>, vector<32x256xf32>
    %cst_94 = arith.constant dense<0.000000e+00> : vector<64x256xf32>
    %339 = tpu.matmul %337, %338, %cst_94 {dimension_numbers = #tpu.dot_dimension_numbers<[1], [0], [0], [1], [0, 0, 1, 1], [], []>} : vector<64x32xf32>, vector<32x256xf32>, vector<64x256xf32> -> vector<64x256xf32>
    %c0_95 = arith.constant 0 : index
    %c0_96 = arith.constant 0 : index
    %340 = vector.load %arg13[%c0_95, %c0_96] : memref<64x32xf32, #tpu.memory_space<vmem>>, vector<64x32xf32>
    %c32 = arith.constant 32 : index
    %c0_97 = arith.constant 0 : index
    %341 = vector.load %arg4[%c32, %c0_97] : memref<64x256xf32, #tpu.memory_space<vmem>>, vector<32x256xf32>
    %cst_98 = arith.constant dense<0.000000e+00> : vector<64x256xf32>
    %342 = tpu.matmul %340, %341, %cst_98 {dimension_numbers = #tpu.dot_dimension_numbers<[1], [0], [0], [1], [0, 0, 1, 1], [], []>} : vector<64x32xf32>, vector<32x256xf32>, vector<64x256xf32> -> vector<64x256xf32>
    %343 = arith.addf %339, %342 : vector<64x256xf32>
    %c0_99 = arith.constant 0 : index
    %c0_100 = arith.constant 0 : index
    %344 = vector.load %arg6[%c0_99, %c0_100] : memref<1x256xf32, #tpu.memory_space<vmem>>, vector<1x256xf32>
    %345 = vector.broadcast %344 : vector<1x256xf32> to vector<64x256xf32>
    %346 = arith.addf %343, %345 : vector<64x256xf32>
    %c0_101 = arith.constant 0 : index
    %c0_102 = arith.constant 0 : index
    %347 = vector.load %arg11[%c0_101, %c0_102] : memref<64x256xf32, #tpu.memory_space<vmem>>, vector<64x256xf32>
    tpu.vector_store %arg11[%c0_101, %c0_102], %346 {strides = array<i32>} : memref<64x256xf32, #tpu.memory_space<vmem>>, vector<64x256xf32>,
    %c0_103 = arith.constant 0 : index
    %c0_104 = arith.constant 0 : index
    %348 = vector.load %arg5[%c0_103, %c0_104] : memref<32x256xf32, #tpu.memory_space<vmem>>, vector<32x256xf32>
    %349 = vector.extract_strided_slice %348 {offsets = [0, 0], sizes = [32, 128], strides = [1, 1]} : vector<32x256xf32> to vector<32x128xf32>
    %350 = vector.extract_strided_slice %348 {offsets = [0, 128], sizes = [32, 128], strides = [1, 1]} : vector<32x256xf32> to vector<32x128xf32>
    %cst_105 = arith.constant 0.000000e+00 : f32
    %351 = vector.broadcast %cst_105 : f32 to vector<16x32xf32>
    %cst_106 = arith.constant 0.000000e+00 : f32
    %352 = vector.broadcast %cst_106 : f32 to vector<8x32xf32>
    %c0_i32_107 = arith.constant 0 : i32
    %c8_i32_108 = arith.constant 8 : i32
    %353 = arith.muli %c0_i32_107, %c8_i32_108 : i32
    %354 = tpu.assume_multiple %353, 8 : i32
    %c7_i32_109 = arith.constant 7 : i32
    %355 = arith.subi %c7_i32_109, %c0_i32_107 : i32
    %c8_i32_110 = arith.constant 8 : i32
    %356 = arith.muli %355, %c8_i32_110 : i32
    %357 = tpu.assume_multiple %356, 8 : i32
    %358 = arith.index_cast %354 : i32 to index
    %c0_111 = arith.constant 0 : index
    %359 = vector.load %arg11[%358, %c0_111] : memref<64x256xf32, #tpu.memory_space<vmem>>, vector<8x256xf32>
    %360 = arith.index_cast %357 : i32 to index
    %c0_112 = arith.constant 0 : index
    %361 = vector.load %arg11[%360, %c0_112] : memref<64x256xf32, #tpu.memory_space<vmem>>, vector<8x256xf32>
    %362 = vector.extract_strided_slice %351 {offsets = [0, 0], sizes = [8, 32], strides = [1, 1]} : vector<16x32xf32> to vector<8x32xf32>
    %cst_113 = arith.constant dense<0.000000e+00> : vector<8x128xf32>
    %363 = tpu.matmul %362, %349, %cst_113 {dimension_numbers = #tpu.dot_dimension_numbers<[1], [0], [0], [1], [0, 0, 1, 1], [], []>} : vector<8x32xf32>, vector<32x128xf32>, vector<8x128xf32> -> vector<8x128xf32>
    %364 = vector.extract_strided_slice %351 {offsets = [8, 0], sizes = [8, 32], strides = [1, 1]} : vector<16x32xf32> to vector<8x32xf32>
    %cst_114 = arith.constant dense<0.000000e+00> : vector<8x128xf32>
    %365 = tpu.matmul %364, %350, %cst_114 {dimension_numbers = #tpu.dot_dimension_numbers<[1], [0], [0], [1], [0, 0, 1, 1], [], []>} : vector<8x32xf32>, vector<32x128xf32>, vector<8x128xf32> -> vector<8x128xf32>
    %366 = vector.extract_strided_slice %359 {offsets = [0, 0], sizes = [8, 128], strides = [1, 1]} : vector<8x256xf32> to vector<8x128xf32>
    %367 = arith.addf %363, %366 : vector<8x128xf32>
    %368 = vector.extract_strided_slice %361 {offsets = [0, 128], sizes = [8, 128], strides = [1, 1]} : vector<8x256xf32> to vector<8x128xf32>
    %369 = arith.addf %365, %368 : vector<8x128xf32>
    %370 = tpu.concatenate %367, %369 in 0 : vector<8x128xf32>, vector<8x128xf32> -> vector<16x128xf32>
    %371 = arith.negf %370 : vector<16x128xf32>
    %372 = math.exp %371 : vector<16x128xf32>
    %cst_115 = arith.constant 1.000000e+00 : f32
    %373 = vector.broadcast %cst_115 : f32 to vector<16x128xf32>
    %374 = arith.addf %373, %372 : vector<16x128xf32>
    %375 = arith.divf %373, %374 : vector<16x128xf32>
    %376 = math.tanh %370 : vector<16x128xf32>
    %377 = arith.select %5, %376, %375 : vector<16x128xi1>, vector<16x128xf32>
    %378 = vector.extract_strided_slice %377 {offsets = [0, 0], sizes = [16, 32], strides = [1, 1]} : vector<16x128xf32> to vector<16x32xf32>
    %379 = vector.extract_strided_slice %377 {offsets = [0, 32], sizes = [16, 32], strides = [1, 1]} : vector<16x128xf32> to vector<16x32xf32>
    %380 = vector.extract_strided_slice %377 {offsets = [0, 64], sizes = [16, 32], strides = [1, 1]} : vector<16x128xf32> to vector<16x32xf32>
    %381 = vector.extract_strided_slice %377 {offsets = [0, 96], sizes = [16, 32], strides = [1, 1]} : vector<16x128xf32> to vector<16x32xf32>
    %382 = arith.mulf %379, %351 : vector<16x32xf32>
    %383 = arith.mulf %378, %380 : vector<16x32xf32>
    %384 = arith.addf %382, %383 : vector<16x32xf32>
    %385 = math.tanh %384 : vector<16x32xf32>
    %386 = arith.mulf %381, %385 : vector<16x32xf32>
    %c0_i32_116 = arith.constant 0 : i32
    %387 = arith.cmpi eq, %c0_i32_107, %c0_i32_116 : i32
    %cst_117 = arith.constant 1.000000e+00 : f32
    %cst_118 = arith.constant 0.000000e+00 : f32
    %388 = arith.select %387, %cst_117, %cst_118 : f32
    %389 = vector.extract_strided_slice %386 {offsets = [8, 0], sizes = [8, 32], strides = [1, 1]} : vector<16x32xf32> to vector<8x32xf32>
    %390 = vector.broadcast %388 : f32 to vector<8x32xf32>
    %391 = arith.mulf %390, %389 : vector<8x32xf32>
    %392 = arith.addf %352, %391 : vector<8x32xf32>
    %c1_i32_119 = arith.constant 1 : i32
    %c8_i32_120 = arith.constant 8 : i32
    %393 = arith.muli %c1_i32_119, %c8_i32_120 : i32
    %394 = tpu.assume_multiple %393, 8 : i32
    %c7_i32_121 = arith.constant 7 : i32
    %395 = arith.subi %c7_i32_121, %c1_i32_119 : i32
    %c8_i32_122 = arith.constant 8 : i32
    %396 = arith.muli %395, %c8_i32_122 : i32
    %397 = tpu.assume_multiple %396, 8 : i32
    %398 = arith.index_cast %394 : i32 to index
    %c0_123 = arith.constant 0 : index
    %399 = vector.load %arg11[%398, %c0_123] : memref<64x256xf32, #tpu.memory_space<vmem>>, vector<8x256xf32>
    %400 = arith.index_cast %397 : i32 to index
    %c0_124 = arith.constant 0 : index
    %401 = vector.load %arg11[%400, %c0_124] : memref<64x256xf32, #tpu.memory_space<vmem>>, vector<8x256xf32>
    %402 = vector.extract_strided_slice %386 {offsets = [0, 0], sizes = [8, 32], strides = [1, 1]} : vector<16x32xf32> to vector<8x32xf32>
    %cst_125 = arith.constant dense<0.000000e+00> : vector<8x128xf32>
    %403 = tpu.matmul %402, %349, %cst_125 {dimension_numbers = #tpu.dot_dimension_numbers<[1], [0], [0], [1], [0, 0, 1, 1], [], []>} : vector<8x32xf32>, vector<32x128xf32>, vector<8x128xf32> -> vector<8x128xf32>
    %404 = vector.extract_strided_slice %386 {offsets = [8, 0], sizes = [8, 32], strides = [1, 1]} : vector<16x32xf32> to vector<8x32xf32>
    %cst_126 = arith.constant dense<0.000000e+00> : vector<8x128xf32>
    %405 = tpu.matmul %404, %350, %cst_126 {dimension_numbers = #tpu.dot_dimension_numbers<[1], [0], [0], [1], [0, 0, 1, 1], [], []>} : vector<8x32xf32>, vector<32x128xf32>, vector<8x128xf32> -> vector<8x128xf32>
    %406 = vector.extract_strided_slice %399 {offsets = [0, 0], sizes = [8, 128], strides = [1, 1]} : vector<8x256xf32> to vector<8x128xf32>
    %407 = arith.addf %403, %406 : vector<8x128xf32>
    %408 = vector.extract_strided_slice %401 {offsets = [0, 128], sizes = [8, 128], strides = [1, 1]} : vector<8x256xf32> to vector<8x128xf32>
    %409 = arith.addf %405, %408 : vector<8x128xf32>
    %410 = tpu.concatenate %407, %409 in 0 : vector<8x128xf32>, vector<8x128xf32> -> vector<16x128xf32>
    %411 = arith.negf %410 : vector<16x128xf32>
    %412 = math.exp %411 : vector<16x128xf32>
    %cst_127 = arith.constant 1.000000e+00 : f32
    %413 = vector.broadcast %cst_127 : f32 to vector<16x128xf32>
    %414 = arith.addf %413, %412 : vector<16x128xf32>
    %415 = arith.divf %413, %414 : vector<16x128xf32>
    %416 = math.tanh %410 : vector<16x128xf32>
    %417 = arith.select %5, %416, %415 : vector<16x128xi1>, vector<16x128xf32>
    %418 = vector.extract_strided_slice %417 {offsets = [0, 0], sizes = [16, 32], strides = [1, 1]} : vector<16x128xf32> to vector<16x32xf32>
    %419 = vector.extract_strided_slice %417 {offsets = [0, 32], sizes = [16, 32], strides = [1, 1]} : vector<16x128xf32> to vector<16x32xf32>
    %420 = vector.extract_strided_slice %417 {offsets = [0, 64], sizes = [16, 32], strides = [1, 1]} : vector<16x128xf32> to vector<16x32xf32>
    %421 = vector.extract_strided_slice %417 {offsets = [0, 96], sizes = [16, 32], strides = [1, 1]} : vector<16x128xf32> to vector<16x32xf32>
    %422 = arith.mulf %419, %384 : vector<16x32xf32>
    %423 = arith.mulf %418, %420 : vector<16x32xf32>
    %424 = arith.addf %422, %423 : vector<16x32xf32>
    %425 = math.tanh %424 : vector<16x32xf32>
    %426 = arith.mulf %421, %425 : vector<16x32xf32>
    %c0_i32_128 = arith.constant 0 : i32
    %427 = arith.cmpi eq, %c1_i32_119, %c0_i32_128 : i32
    %cst_129 = arith.constant 1.000000e+00 : f32
    %cst_130 = arith.constant 0.000000e+00 : f32
    %428 = arith.select %427, %cst_129, %cst_130 : f32
    %429 = vector.extract_strided_slice %426 {offsets = [8, 0], sizes = [8, 32], strides = [1, 1]} : vector<16x32xf32> to vector<8x32xf32>
    %430 = vector.broadcast %428 : f32 to vector<8x32xf32>
    %431 = arith.mulf %430, %429 : vector<8x32xf32>
    %432 = arith.addf %392, %431 : vector<8x32xf32>
    %c2_i32_131 = arith.constant 2 : i32
    %c8_i32_132 = arith.constant 8 : i32
    %433 = arith.muli %c2_i32_131, %c8_i32_132 : i32
    %434 = tpu.assume_multiple %433, 8 : i32
    %c7_i32_133 = arith.constant 7 : i32
    %435 = arith.subi %c7_i32_133, %c2_i32_131 : i32
    %c8_i32_134 = arith.constant 8 : i32
    %436 = arith.muli %435, %c8_i32_134 : i32
    %437 = tpu.assume_multiple %436, 8 : i32
    %438 = arith.index_cast %434 : i32 to index
    %c0_135 = arith.constant 0 : index
    %439 = vector.load %arg11[%438, %c0_135] : memref<64x256xf32, #tpu.memory_space<vmem>>, vector<8x256xf32>
    %440 = arith.index_cast %437 : i32 to index
    %c0_136 = arith.constant 0 : index
    %441 = vector.load %arg11[%440, %c0_136] : memref<64x256xf32, #tpu.memory_space<vmem>>, vector<8x256xf32>
    %442 = vector.extract_strided_slice %426 {offsets = [0, 0], sizes = [8, 32], strides = [1, 1]} : vector<16x32xf32> to vector<8x32xf32>
    %cst_137 = arith.constant dense<0.000000e+00> : vector<8x128xf32>
    %443 = tpu.matmul %442, %349, %cst_137 {dimension_numbers = #tpu.dot_dimension_numbers<[1], [0], [0], [1], [0, 0, 1, 1], [], []>} : vector<8x32xf32>, vector<32x128xf32>, vector<8x128xf32> -> vector<8x128xf32>
    %444 = vector.extract_strided_slice %426 {offsets = [8, 0], sizes = [8, 32], strides = [1, 1]} : vector<16x32xf32> to vector<8x32xf32>
    %cst_138 = arith.constant dense<0.000000e+00> : vector<8x128xf32>
    %445 = tpu.matmul %444, %350, %cst_138 {dimension_numbers = #tpu.dot_dimension_numbers<[1], [0], [0], [1], [0, 0, 1, 1], [], []>} : vector<8x32xf32>, vector<32x128xf32>, vector<8x128xf32> -> vector<8x128xf32>
    %446 = vector.extract_strided_slice %439 {offsets = [0, 0], sizes = [8, 128], strides = [1, 1]} : vector<8x256xf32> to vector<8x128xf32>
    %447 = arith.addf %443, %446 : vector<8x128xf32>
    %448 = vector.extract_strided_slice %441 {offsets = [0, 128], sizes = [8, 128], strides = [1, 1]} : vector<8x256xf32> to vector<8x128xf32>
    %449 = arith.addf %445, %448 : vector<8x128xf32>
    %450 = tpu.concatenate %447, %449 in 0 : vector<8x128xf32>, vector<8x128xf32> -> vector<16x128xf32>
    %451 = arith.negf %450 : vector<16x128xf32>
    %452 = math.exp %451 : vector<16x128xf32>
    %cst_139 = arith.constant 1.000000e+00 : f32
    %453 = vector.broadcast %cst_139 : f32 to vector<16x128xf32>
    %454 = arith.addf %453, %452 : vector<16x128xf32>
    %455 = arith.divf %453, %454 : vector<16x128xf32>
    %456 = math.tanh %450 : vector<16x128xf32>
    %457 = arith.select %5, %456, %455 : vector<16x128xi1>, vector<16x128xf32>
    %458 = vector.extract_strided_slice %457 {offsets = [0, 0], sizes = [16, 32], strides = [1, 1]} : vector<16x128xf32> to vector<16x32xf32>
    %459 = vector.extract_strided_slice %457 {offsets = [0, 32], sizes = [16, 32], strides = [1, 1]} : vector<16x128xf32> to vector<16x32xf32>
    %460 = vector.extract_strided_slice %457 {offsets = [0, 64], sizes = [16, 32], strides = [1, 1]} : vector<16x128xf32> to vector<16x32xf32>
    %461 = vector.extract_strided_slice %457 {offsets = [0, 96], sizes = [16, 32], strides = [1, 1]} : vector<16x128xf32> to vector<16x32xf32>
    %462 = arith.mulf %459, %424 : vector<16x32xf32>
    %463 = arith.mulf %458, %460 : vector<16x32xf32>
    %464 = arith.addf %462, %463 : vector<16x32xf32>
    %465 = math.tanh %464 : vector<16x32xf32>
    %466 = arith.mulf %461, %465 : vector<16x32xf32>
    %c0_i32_140 = arith.constant 0 : i32
    %467 = arith.cmpi eq, %c2_i32_131, %c0_i32_140 : i32
    %cst_141 = arith.constant 1.000000e+00 : f32
    %cst_142 = arith.constant 0.000000e+00 : f32
    %468 = arith.select %467, %cst_141, %cst_142 : f32
    %469 = vector.extract_strided_slice %466 {offsets = [8, 0], sizes = [8, 32], strides = [1, 1]} : vector<16x32xf32> to vector<8x32xf32>
    %470 = vector.broadcast %468 : f32 to vector<8x32xf32>
    %471 = arith.mulf %470, %469 : vector<8x32xf32>
    %472 = arith.addf %432, %471 : vector<8x32xf32>
    %c3_i32_143 = arith.constant 3 : i32
    %c8_i32_144 = arith.constant 8 : i32
    %473 = arith.muli %c3_i32_143, %c8_i32_144 : i32
    %474 = tpu.assume_multiple %473, 8 : i32
    %c7_i32_145 = arith.constant 7 : i32
    %475 = arith.subi %c7_i32_145, %c3_i32_143 : i32
    %c8_i32_146 = arith.constant 8 : i32
    %476 = arith.muli %475, %c8_i32_146 : i32
    %477 = tpu.assume_multiple %476, 8 : i32
    %478 = arith.index_cast %474 : i32 to index
    %c0_147 = arith.constant 0 : index
    %479 = vector.load %arg11[%478, %c0_147] : memref<64x256xf32, #tpu.memory_space<vmem>>, vector<8x256xf32>
    %480 = arith.index_cast %477 : i32 to index
    %c0_148 = arith.constant 0 : index
    %481 = vector.load %arg11[%480, %c0_148] : memref<64x256xf32, #tpu.memory_space<vmem>>, vector<8x256xf32>
    %482 = vector.extract_strided_slice %466 {offsets = [0, 0], sizes = [8, 32], strides = [1, 1]} : vector<16x32xf32> to vector<8x32xf32>
    %cst_149 = arith.constant dense<0.000000e+00> : vector<8x128xf32>
    %483 = tpu.matmul %482, %349, %cst_149 {dimension_numbers = #tpu.dot_dimension_numbers<[1], [0], [0], [1], [0, 0, 1, 1], [], []>} : vector<8x32xf32>, vector<32x128xf32>, vector<8x128xf32> -> vector<8x128xf32>
    %484 = vector.extract_strided_slice %466 {offsets = [8, 0], sizes = [8, 32], strides = [1, 1]} : vector<16x32xf32> to vector<8x32xf32>
    %cst_150 = arith.constant dense<0.000000e+00> : vector<8x128xf32>
    %485 = tpu.matmul %484, %350, %cst_150 {dimension_numbers = #tpu.dot_dimension_numbers<[1], [0], [0], [1], [0, 0, 1, 1], [], []>} : vector<8x32xf32>, vector<32x128xf32>, vector<8x128xf32> -> vector<8x128xf32>
    %486 = vector.extract_strided_slice %479 {offsets = [0, 0], sizes = [8, 128], strides = [1, 1]} : vector<8x256xf32> to vector<8x128xf32>
    %487 = arith.addf %483, %486 : vector<8x128xf32>
    %488 = vector.extract_strided_slice %481 {offsets = [0, 128], sizes = [8, 128], strides = [1, 1]} : vector<8x256xf32> to vector<8x128xf32>
    %489 = arith.addf %485, %488 : vector<8x128xf32>
    %490 = tpu.concatenate %487, %489 in 0 : vector<8x128xf32>, vector<8x128xf32> -> vector<16x128xf32>
    %491 = arith.negf %490 : vector<16x128xf32>
    %492 = math.exp %491 : vector<16x128xf32>
    %cst_151 = arith.constant 1.000000e+00 : f32
    %493 = vector.broadcast %cst_151 : f32 to vector<16x128xf32>
    %494 = arith.addf %493, %492 : vector<16x128xf32>
    %495 = arith.divf %493, %494 : vector<16x128xf32>
    %496 = math.tanh %490 : vector<16x128xf32>
    %497 = arith.select %5, %496, %495 : vector<16x128xi1>, vector<16x128xf32>
    %498 = vector.extract_strided_slice %497 {offsets = [0, 0], sizes = [16, 32], strides = [1, 1]} : vector<16x128xf32> to vector<16x32xf32>
    %499 = vector.extract_strided_slice %497 {offsets = [0, 32], sizes = [16, 32], strides = [1, 1]} : vector<16x128xf32> to vector<16x32xf32>
    %500 = vector.extract_strided_slice %497 {offsets = [0, 64], sizes = [16, 32], strides = [1, 1]} : vector<16x128xf32> to vector<16x32xf32>
    %501 = vector.extract_strided_slice %497 {offsets = [0, 96], sizes = [16, 32], strides = [1, 1]} : vector<16x128xf32> to vector<16x32xf32>
    %502 = arith.mulf %499, %464 : vector<16x32xf32>
    %503 = arith.mulf %498, %500 : vector<16x32xf32>
    %504 = arith.addf %502, %503 : vector<16x32xf32>
    %505 = math.tanh %504 : vector<16x32xf32>
    %506 = arith.mulf %501, %505 : vector<16x32xf32>
    %c0_i32_152 = arith.constant 0 : i32
    %507 = arith.cmpi eq, %c3_i32_143, %c0_i32_152 : i32
    %cst_153 = arith.constant 1.000000e+00 : f32
    %cst_154 = arith.constant 0.000000e+00 : f32
    %508 = arith.select %507, %cst_153, %cst_154 : f32
    %509 = vector.extract_strided_slice %506 {offsets = [8, 0], sizes = [8, 32], strides = [1, 1]} : vector<16x32xf32> to vector<8x32xf32>
    %510 = vector.broadcast %508 : f32 to vector<8x32xf32>
    %511 = arith.mulf %510, %509 : vector<8x32xf32>
    %512 = arith.addf %472, %511 : vector<8x32xf32>
    %c4_i32_155 = arith.constant 4 : i32
    %c8_i32_156 = arith.constant 8 : i32
    %513 = arith.muli %c4_i32_155, %c8_i32_156 : i32
    %514 = tpu.assume_multiple %513, 8 : i32
    %c7_i32_157 = arith.constant 7 : i32
    %515 = arith.subi %c7_i32_157, %c4_i32_155 : i32
    %c8_i32_158 = arith.constant 8 : i32
    %516 = arith.muli %515, %c8_i32_158 : i32
    %517 = tpu.assume_multiple %516, 8 : i32
    %518 = arith.index_cast %514 : i32 to index
    %c0_159 = arith.constant 0 : index
    %519 = vector.load %arg11[%518, %c0_159] : memref<64x256xf32, #tpu.memory_space<vmem>>, vector<8x256xf32>
    %520 = arith.index_cast %517 : i32 to index
    %c0_160 = arith.constant 0 : index
    %521 = vector.load %arg11[%520, %c0_160] : memref<64x256xf32, #tpu.memory_space<vmem>>, vector<8x256xf32>
    %522 = vector.extract_strided_slice %506 {offsets = [0, 0], sizes = [8, 32], strides = [1, 1]} : vector<16x32xf32> to vector<8x32xf32>
    %cst_161 = arith.constant dense<0.000000e+00> : vector<8x128xf32>
    %523 = tpu.matmul %522, %349, %cst_161 {dimension_numbers = #tpu.dot_dimension_numbers<[1], [0], [0], [1], [0, 0, 1, 1], [], []>} : vector<8x32xf32>, vector<32x128xf32>, vector<8x128xf32> -> vector<8x128xf32>
    %524 = vector.extract_strided_slice %506 {offsets = [8, 0], sizes = [8, 32], strides = [1, 1]} : vector<16x32xf32> to vector<8x32xf32>
    %cst_162 = arith.constant dense<0.000000e+00> : vector<8x128xf32>
    %525 = tpu.matmul %524, %350, %cst_162 {dimension_numbers = #tpu.dot_dimension_numbers<[1], [0], [0], [1], [0, 0, 1, 1], [], []>} : vector<8x32xf32>, vector<32x128xf32>, vector<8x128xf32> -> vector<8x128xf32>
    %526 = vector.extract_strided_slice %519 {offsets = [0, 0], sizes = [8, 128], strides = [1, 1]} : vector<8x256xf32> to vector<8x128xf32>
    %527 = arith.addf %523, %526 : vector<8x128xf32>
    %528 = vector.extract_strided_slice %521 {offsets = [0, 128], sizes = [8, 128], strides = [1, 1]} : vector<8x256xf32> to vector<8x128xf32>
    %529 = arith.addf %525, %528 : vector<8x128xf32>
    %530 = tpu.concatenate %527, %529 in 0 : vector<8x128xf32>, vector<8x128xf32> -> vector<16x128xf32>
    %531 = arith.negf %530 : vector<16x128xf32>
    %532 = math.exp %531 : vector<16x128xf32>
    %cst_163 = arith.constant 1.000000e+00 : f32
    %533 = vector.broadcast %cst_163 : f32 to vector<16x128xf32>
    %534 = arith.addf %533, %532 : vector<16x128xf32>
    %535 = arith.divf %533, %534 : vector<16x128xf32>
    %536 = math.tanh %530 : vector<16x128xf32>
    %537 = arith.select %5, %536, %535 : vector<16x128xi1>, vector<16x128xf32>
    %538 = vector.extract_strided_slice %537 {offsets = [0, 0], sizes = [16, 32], strides = [1, 1]} : vector<16x128xf32> to vector<16x32xf32>
    %539 = vector.extract_strided_slice %537 {offsets = [0, 32], sizes = [16, 32], strides = [1, 1]} : vector<16x128xf32> to vector<16x32xf32>
    %540 = vector.extract_strided_slice %537 {offsets = [0, 64], sizes = [16, 32], strides = [1, 1]} : vector<16x128xf32> to vector<16x32xf32>
    %541 = vector.extract_strided_slice %537 {offsets = [0, 96], sizes = [16, 32], strides = [1, 1]} : vector<16x128xf32> to vector<16x32xf32>
    %542 = arith.mulf %539, %504 : vector<16x32xf32>
    %543 = arith.mulf %538, %540 : vector<16x32xf32>
    %544 = arith.addf %542, %543 : vector<16x32xf32>
    %545 = math.tanh %544 : vector<16x32xf32>
    %546 = arith.mulf %541, %545 : vector<16x32xf32>
    %c0_i32_164 = arith.constant 0 : i32
    %547 = arith.cmpi eq, %c4_i32_155, %c0_i32_164 : i32
    %cst_165 = arith.constant 1.000000e+00 : f32
    %cst_166 = arith.constant 0.000000e+00 : f32
    %548 = arith.select %547, %cst_165, %cst_166 : f32
    %549 = vector.extract_strided_slice %546 {offsets = [8, 0], sizes = [8, 32], strides = [1, 1]} : vector<16x32xf32> to vector<8x32xf32>
    %550 = vector.broadcast %548 : f32 to vector<8x32xf32>
    %551 = arith.mulf %550, %549 : vector<8x32xf32>
    %552 = arith.addf %512, %551 : vector<8x32xf32>
    %c5_i32_167 = arith.constant 5 : i32
    %c8_i32_168 = arith.constant 8 : i32
    %553 = arith.muli %c5_i32_167, %c8_i32_168 : i32
    %554 = tpu.assume_multiple %553, 8 : i32
    %c7_i32_169 = arith.constant 7 : i32
    %555 = arith.subi %c7_i32_169, %c5_i32_167 : i32
    %c8_i32_170 = arith.constant 8 : i32
    %556 = arith.muli %555, %c8_i32_170 : i32
    %557 = tpu.assume_multiple %556, 8 : i32
    %558 = arith.index_cast %554 : i32 to index
    %c0_171 = arith.constant 0 : index
    %559 = vector.load %arg11[%558, %c0_171] : memref<64x256xf32, #tpu.memory_space<vmem>>, vector<8x256xf32>
    %560 = arith.index_cast %557 : i32 to index
    %c0_172 = arith.constant 0 : index
    %561 = vector.load %arg11[%560, %c0_172] : memref<64x256xf32, #tpu.memory_space<vmem>>, vector<8x256xf32>
    %562 = vector.extract_strided_slice %546 {offsets = [0, 0], sizes = [8, 32], strides = [1, 1]} : vector<16x32xf32> to vector<8x32xf32>
    %cst_173 = arith.constant dense<0.000000e+00> : vector<8x128xf32>
    %563 = tpu.matmul %562, %349, %cst_173 {dimension_numbers = #tpu.dot_dimension_numbers<[1], [0], [0], [1], [0, 0, 1, 1], [], []>} : vector<8x32xf32>, vector<32x128xf32>, vector<8x128xf32> -> vector<8x128xf32>
    %564 = vector.extract_strided_slice %546 {offsets = [8, 0], sizes = [8, 32], strides = [1, 1]} : vector<16x32xf32> to vector<8x32xf32>
    %cst_174 = arith.constant dense<0.000000e+00> : vector<8x128xf32>
    %565 = tpu.matmul %564, %350, %cst_174 {dimension_numbers = #tpu.dot_dimension_numbers<[1], [0], [0], [1], [0, 0, 1, 1], [], []>} : vector<8x32xf32>, vector<32x128xf32>, vector<8x128xf32> -> vector<8x128xf32>
    %566 = vector.extract_strided_slice %559 {offsets = [0, 0], sizes = [8, 128], strides = [1, 1]} : vector<8x256xf32> to vector<8x128xf32>
    %567 = arith.addf %563, %566 : vector<8x128xf32>
    %568 = vector.extract_strided_slice %561 {offsets = [0, 128], sizes = [8, 128], strides = [1, 1]} : vector<8x256xf32> to vector<8x128xf32>
    %569 = arith.addf %565, %568 : vector<8x128xf32>
    %570 = tpu.concatenate %567, %569 in 0 : vector<8x128xf32>, vector<8x128xf32> -> vector<16x128xf32>
    %571 = arith.negf %570 : vector<16x128xf32>
    %572 = math.exp %571 : vector<16x128xf32>
    %cst_175 = arith.constant 1.000000e+00 : f32
    %573 = vector.broadcast %cst_175 : f32 to vector<16x128xf32>
    %574 = arith.addf %573, %572 : vector<16x128xf32>
    %575 = arith.divf %573, %574 : vector<16x128xf32>
    %576 = math.tanh %570 : vector<16x128xf32>
    %577 = arith.select %5, %576, %575 : vector<16x128xi1>, vector<16x128xf32>
    %578 = vector.extract_strided_slice %577 {offsets = [0, 0], sizes = [16, 32], strides = [1, 1]} : vector<16x128xf32> to vector<16x32xf32>
    %579 = vector.extract_strided_slice %577 {offsets = [0, 32], sizes = [16, 32], strides = [1, 1]} : vector<16x128xf32> to vector<16x32xf32>
    %580 = vector.extract_strided_slice %577 {offsets = [0, 64], sizes = [16, 32], strides = [1, 1]} : vector<16x128xf32> to vector<16x32xf32>
    %581 = vector.extract_strided_slice %577 {offsets = [0, 96], sizes = [16, 32], strides = [1, 1]} : vector<16x128xf32> to vector<16x32xf32>
    %582 = arith.mulf %579, %544 : vector<16x32xf32>
    %583 = arith.mulf %578, %580 : vector<16x32xf32>
    %584 = arith.addf %582, %583 : vector<16x32xf32>
    %585 = math.tanh %584 : vector<16x32xf32>
    %586 = arith.mulf %581, %585 : vector<16x32xf32>
    %c0_i32_176 = arith.constant 0 : i32
    %587 = arith.cmpi eq, %c5_i32_167, %c0_i32_176 : i32
    %cst_177 = arith.constant 1.000000e+00 : f32
    %cst_178 = arith.constant 0.000000e+00 : f32
    %588 = arith.select %587, %cst_177, %cst_178 : f32
    %589 = vector.extract_strided_slice %586 {offsets = [8, 0], sizes = [8, 32], strides = [1, 1]} : vector<16x32xf32> to vector<8x32xf32>
    %590 = vector.broadcast %588 : f32 to vector<8x32xf32>
    %591 = arith.mulf %590, %589 : vector<8x32xf32>
    %592 = arith.addf %552, %591 : vector<8x32xf32>
    %c6_i32_179 = arith.constant 6 : i32
    %c8_i32_180 = arith.constant 8 : i32
    %593 = arith.muli %c6_i32_179, %c8_i32_180 : i32
    %594 = tpu.assume_multiple %593, 8 : i32
    %c7_i32_181 = arith.constant 7 : i32
    %595 = arith.subi %c7_i32_181, %c6_i32_179 : i32
    %c8_i32_182 = arith.constant 8 : i32
    %596 = arith.muli %595, %c8_i32_182 : i32
    %597 = tpu.assume_multiple %596, 8 : i32
    %598 = arith.index_cast %594 : i32 to index
    %c0_183 = arith.constant 0 : index
    %599 = vector.load %arg11[%598, %c0_183] : memref<64x256xf32, #tpu.memory_space<vmem>>, vector<8x256xf32>
    %600 = arith.index_cast %597 : i32 to index
    %c0_184 = arith.constant 0 : index
    %601 = vector.load %arg11[%600, %c0_184] : memref<64x256xf32, #tpu.memory_space<vmem>>, vector<8x256xf32>
    %602 = vector.extract_strided_slice %586 {offsets = [0, 0], sizes = [8, 32], strides = [1, 1]} : vector<16x32xf32> to vector<8x32xf32>
    %cst_185 = arith.constant dense<0.000000e+00> : vector<8x128xf32>
    %603 = tpu.matmul %602, %349, %cst_185 {dimension_numbers = #tpu.dot_dimension_numbers<[1], [0], [0], [1], [0, 0, 1, 1], [], []>} : vector<8x32xf32>, vector<32x128xf32>, vector<8x128xf32> -> vector<8x128xf32>
    %604 = vector.extract_strided_slice %586 {offsets = [8, 0], sizes = [8, 32], strides = [1, 1]} : vector<16x32xf32> to vector<8x32xf32>
    %cst_186 = arith.constant dense<0.000000e+00> : vector<8x128xf32>
    %605 = tpu.matmul %604, %350, %cst_186 {dimension_numbers = #tpu.dot_dimension_numbers<[1], [0], [0], [1], [0, 0, 1, 1], [], []>} : vector<8x32xf32>, vector<32x128xf32>, vector<8x128xf32> -> vector<8x128xf32>
    %606 = vector.extract_strided_slice %599 {offsets = [0, 0], sizes = [8, 128], strides = [1, 1]} : vector<8x256xf32> to vector<8x128xf32>
    %607 = arith.addf %603, %606 : vector<8x128xf32>
    %608 = vector.extract_strided_slice %601 {offsets = [0, 128], sizes = [8, 128], strides = [1, 1]} : vector<8x256xf32> to vector<8x128xf32>
    %609 = arith.addf %605, %608 : vector<8x128xf32>
    %610 = tpu.concatenate %607, %609 in 0 : vector<8x128xf32>, vector<8x128xf32> -> vector<16x128xf32>
    %611 = arith.negf %610 : vector<16x128xf32>
    %612 = math.exp %611 : vector<16x128xf32>
    %cst_187 = arith.constant 1.000000e+00 : f32
    %613 = vector.broadcast %cst_187 : f32 to vector<16x128xf32>
    %614 = arith.addf %613, %612 : vector<16x128xf32>
    %615 = arith.divf %613, %614 : vector<16x128xf32>
    %616 = math.tanh %610 : vector<16x128xf32>
    %617 = arith.select %5, %616, %615 : vector<16x128xi1>, vector<16x128xf32>
    %618 = vector.extract_strided_slice %617 {offsets = [0, 0], sizes = [16, 32], strides = [1, 1]} : vector<16x128xf32> to vector<16x32xf32>
    %619 = vector.extract_strided_slice %617 {offsets = [0, 32], sizes = [16, 32], strides = [1, 1]} : vector<16x128xf32> to vector<16x32xf32>
    %620 = vector.extract_strided_slice %617 {offsets = [0, 64], sizes = [16, 32], strides = [1, 1]} : vector<16x128xf32> to vector<16x32xf32>
    %621 = vector.extract_strided_slice %617 {offsets = [0, 96], sizes = [16, 32], strides = [1, 1]} : vector<16x128xf32> to vector<16x32xf32>
    %622 = arith.mulf %619, %584 : vector<16x32xf32>
    %623 = arith.mulf %618, %620 : vector<16x32xf32>
    %624 = arith.addf %622, %623 : vector<16x32xf32>
    %625 = math.tanh %624 : vector<16x32xf32>
    %626 = arith.mulf %621, %625 : vector<16x32xf32>
    %c0_i32_188 = arith.constant 0 : i32
    %627 = arith.cmpi eq, %c6_i32_179, %c0_i32_188 : i32
    %cst_189 = arith.constant 1.000000e+00 : f32
    %cst_190 = arith.constant 0.000000e+00 : f32
    %628 = arith.select %627, %cst_189, %cst_190 : f32
    %629 = vector.extract_strided_slice %626 {offsets = [8, 0], sizes = [8, 32], strides = [1, 1]} : vector<16x32xf32> to vector<8x32xf32>
    %630 = vector.broadcast %628 : f32 to vector<8x32xf32>
    %631 = arith.mulf %630, %629 : vector<8x32xf32>
    %632 = arith.addf %592, %631 : vector<8x32xf32>
    %c7_i32_191 = arith.constant 7 : i32
    %c8_i32_192 = arith.constant 8 : i32
    %633 = arith.muli %c7_i32_191, %c8_i32_192 : i32
    %634 = tpu.assume_multiple %633, 8 : i32
    %c7_i32_193 = arith.constant 7 : i32
    %635 = arith.subi %c7_i32_193, %c7_i32_191 : i32
    %c8_i32_194 = arith.constant 8 : i32
    %636 = arith.muli %635, %c8_i32_194 : i32
    %637 = tpu.assume_multiple %636, 8 : i32
    %638 = arith.index_cast %634 : i32 to index
    %c0_195 = arith.constant 0 : index
    %639 = vector.load %arg11[%638, %c0_195] : memref<64x256xf32, #tpu.memory_space<vmem>>, vector<8x256xf32>
    %640 = arith.index_cast %637 : i32 to index
    %c0_196 = arith.constant 0 : index
    %641 = vector.load %arg11[%640, %c0_196] : memref<64x256xf32, #tpu.memory_space<vmem>>, vector<8x256xf32>
    %642 = vector.extract_strided_slice %626 {offsets = [0, 0], sizes = [8, 32], strides = [1, 1]} : vector<16x32xf32> to vector<8x32xf32>
    %cst_197 = arith.constant dense<0.000000e+00> : vector<8x128xf32>
    %643 = tpu.matmul %642, %349, %cst_197 {dimension_numbers = #tpu.dot_dimension_numbers<[1], [0], [0], [1], [0, 0, 1, 1], [], []>} : vector<8x32xf32>, vector<32x128xf32>, vector<8x128xf32> -> vector<8x128xf32>
    %644 = vector.extract_strided_slice %626 {offsets = [8, 0], sizes = [8, 32], strides = [1, 1]} : vector<16x32xf32> to vector<8x32xf32>
    %cst_198 = arith.constant dense<0.000000e+00> : vector<8x128xf32>
    %645 = tpu.matmul %644, %350, %cst_198 {dimension_numbers = #tpu.dot_dimension_numbers<[1], [0], [0], [1], [0, 0, 1, 1], [], []>} : vector<8x32xf32>, vector<32x128xf32>, vector<8x128xf32> -> vector<8x128xf32>
    %646 = vector.extract_strided_slice %639 {offsets = [0, 0], sizes = [8, 128], strides = [1, 1]} : vector<8x256xf32> to vector<8x128xf32>
    %647 = arith.addf %643, %646 : vector<8x128xf32>
    %648 = vector.extract_strided_slice %641 {offsets = [0, 128], sizes = [8, 128], strides = [1, 1]} : vector<8x256xf32> to vector<8x128xf32>
    %649 = arith.addf %645, %648 : vector<8x128xf32>
    %650 = tpu.concatenate %647, %649 in 0 : vector<8x128xf32>, vector<8x128xf32> -> vector<16x128xf32>
    %651 = arith.negf %650 : vector<16x128xf32>
    %652 = math.exp %651 : vector<16x128xf32>
    %cst_199 = arith.constant 1.000000e+00 : f32
    %653 = vector.broadcast %cst_199 : f32 to vector<16x128xf32>
    %654 = arith.addf %653, %652 : vector<16x128xf32>
    %655 = arith.divf %653, %654 : vector<16x128xf32>
    %656 = math.tanh %650 : vector<16x128xf32>
    %657 = arith.select %5, %656, %655 : vector<16x128xi1>, vector<16x128xf32>
    %658 = vector.extract_strided_slice %657 {offsets = [0, 0], sizes = [16, 32], strides = [1, 1]} : vector<16x128xf32> to vector<16x32xf32>
    %659 = vector.extract_strided_slice %657 {offsets = [0, 32], sizes = [16, 32], strides = [1, 1]} : vector<16x128xf32> to vector<16x32xf32>
    %660 = vector.extract_strided_slice %657 {offsets = [0, 64], sizes = [16, 32], strides = [1, 1]} : vector<16x128xf32> to vector<16x32xf32>
    %661 = vector.extract_strided_slice %657 {offsets = [0, 96], sizes = [16, 32], strides = [1, 1]} : vector<16x128xf32> to vector<16x32xf32>
    %662 = arith.mulf %659, %624 : vector<16x32xf32>
    %663 = arith.mulf %658, %660 : vector<16x32xf32>
    %664 = arith.addf %662, %663 : vector<16x32xf32>
    %665 = math.tanh %664 : vector<16x32xf32>
    %666 = arith.mulf %661, %665 : vector<16x32xf32>
    %c0_i32_200 = arith.constant 0 : i32
    %667 = arith.cmpi eq, %c7_i32_191, %c0_i32_200 : i32
    %cst_201 = arith.constant 1.000000e+00 : f32
    %cst_202 = arith.constant 0.000000e+00 : f32
    %668 = arith.select %667, %cst_201, %cst_202 : f32
    %669 = vector.extract_strided_slice %666 {offsets = [8, 0], sizes = [8, 32], strides = [1, 1]} : vector<16x32xf32> to vector<8x32xf32>
    %670 = vector.broadcast %668 : f32 to vector<8x32xf32>
    %671 = arith.mulf %670, %669 : vector<8x32xf32>
    %672 = arith.addf %632, %671 : vector<8x32xf32>
    %c8_i32_203 = arith.constant 8 : i32
    %673 = vector.extract_strided_slice %666 {offsets = [0, 0], sizes = [8, 32], strides = [1, 1]} : vector<16x32xf32> to vector<8x32xf32>
    %c0_204 = arith.constant 0 : index
    %c0_205 = arith.constant 0 : index
    %674 = vector.load %arg7[%c0_204, %c0_205] : memref<32x4xf32, #tpu.memory_space<vmem>>, vector<32x4xf32>
    %cst_206 = arith.constant dense<0.000000e+00> : vector<8x4xf32>
    %675 = tpu.matmul %673, %674, %cst_206 {dimension_numbers = #tpu.dot_dimension_numbers<[1], [0], [0], [1], [0, 0, 1, 1], [], []>} : vector<8x32xf32>, vector<32x4xf32>, vector<8x4xf32> -> vector<8x4xf32>
    %c0_207 = arith.constant 0 : index
    %c0_208 = arith.constant 0 : index
    %676 = vector.load %arg8[%c0_207, %c0_208] : memref<32x4xf32, #tpu.memory_space<vmem>>, vector<32x4xf32>
    %cst_209 = arith.constant dense<0.000000e+00> : vector<8x4xf32>
    %677 = tpu.matmul %672, %676, %cst_209 {dimension_numbers = #tpu.dot_dimension_numbers<[1], [0], [0], [1], [0, 0, 1, 1], [], []>} : vector<8x32xf32>, vector<32x4xf32>, vector<8x4xf32> -> vector<8x4xf32>
    %678 = arith.addf %675, %677 : vector<8x4xf32>
    %c0_210 = arith.constant 0 : index
    %c0_211 = arith.constant 0 : index
    %679 = vector.load %arg9[%c0_210, %c0_211] : memref<1x4xf32, #tpu.memory_space<vmem>>, vector<1x4xf32>
    %680 = vector.broadcast %679 : vector<1x4xf32> to vector<8x4xf32>
    %681 = arith.addf %678, %680 : vector<8x4xf32>
    %c0_212 = arith.constant 0 : index
    %c0_213 = arith.constant 0 : index
    %682 = vector.load %arg10[%c0_212, %c0_213] : memref<8x4xf32, #tpu.memory_space<vmem>>, vector<8x4xf32>
    tpu.vector_store %arg10[%c0_212, %c0_213], %681 {strides = array<i32>} : memref<8x4xf32, #tpu.memory_space<vmem>>, vector<8x4xf32>,
    return
  }
}

</mosaic_0001>

<bundles_post_ra>
// kernel: birnn_forward.1
= control target key start
LH: loop header
LB: loop body
LE: loop exit
PB: predicated region body
PF: predicated region fallthrough
CT: control target
= control target key end

     0   :  { %vm58_vm0 = vcmask 130048   ;;  %v3052_v9 = vmov 0.0   ;;  %v35_v39 = vlaneseq  ;;  %vm197_vm12 = vcmask 261120   ;;  %s3958_s1 = inlined_call_operand.vmem [shape: f32[16,256], index: 1, kind: input, shape index: {}]   ;;  %s3959_s2 = inlined_call_operand.vmem [shape: f32[32,256], index: 2, kind: input, shape index: {}]   ;;  %s3960_s0 = inlined_call_operand.vmem [shape: f32[64,16], index: 0, kind: input, shape index: {}]   ;;  %s3961_s3 = inlined_call_operand.vmem [shape: f32[1,256], index: 3, kind: input, shape index: {}]   ;;  %s3962_s4 = inlined_call_operand.vmem [shape: f32[64,256], index: 4, kind: input, shape index: {}]   ;;  %s3963_s5 = inlined_call_operand.vmem [shape: f32[32,256], index: 5, kind: input, shape index: {}]   ;;  %s3964_s6 = inlined_call_operand.vmem [shape: f32[1,256], index: 6, kind: input, shape index: {}]   ;;  %s3965_s7 = inlined_call_operand.vmem [shape: f32[32,4], index: 7, kind: input, shape index: {}]   ;;  %s3966_s8 = inlined_call_operand.vmem [shape: f32[32,4], index: 8, kind: input, shape index: {}]   ;;  %s3967_s9 = inlined_call_operand.vmem [shape: f32[1,4], index: 9, kind: input, shape index: {}]   ;;  %s3968_s10 = inlined_call_operand.vmem [shape: f32[8,4], index: 10, kind: output, shape index: {}]  }
   0x1   :  { %v51_v0 = vld [vmem:[%s3958_s1 + $0x18] sm:$0xff]  ;;  %v3116_v1 = vld [vmem:[%s3959_s2 + $0x30] sm:$0xff]  ;;  %v49_v2 = vld [vmem:[%s3958_s1 + $0x8] sm:$0xff] }
   0x2   :  { %138 = vmatpush.msra.mxu1 %v51_v0  ;;  %213 = vmatpush.msra.mxu2 %v3116_v1  ;;  %v3125_v3 = vld [vmem:[%s3959_s2 + $0x20] sm:$0xff]  ;;  %v3133_v5 = vld [vmem:[%s3959_s2 + $0x10] sm:$0xff]  ;;  %v41_v10 = vld [vmem:[%s3960_s0 + $0x8] sm:$0xff]  ;;  %v36_v41 = vand.u32 127, %v35_v39 }
   0x3   :  { %v40_v4 = vld [vmem:[%s3960_s0] sm:$0xff]  ;;  %v50_v6 = vld [vmem:[%s3958_s1 + $0x10] sm:$0xff]  ;;  %v3161_v11 = vld [vmem:[%s3959_s2 + $0x38] sm:$0xff] }
   0x4   :  { %139 = vmatpush.msra.mxu1 %v49_v2  ;;  %214 = vmatpush.msra.mxu2 %v3125_v3  ;;  %v48_v7 = vld [vmem:[%s3958_s1] sm:$0xff]  ;;  %v3166_v12 = vld [vmem:[%s3959_s2 + $0x28] sm:$0xff]  ;;  %v42_v13 = vld [vmem:[%s3960_s0 + $0x10] sm:$0xff]  ;;  %vm37_vm3 = vcmp.ge.s32.totalorder %v36_v41, 64  ;;  %vm38_vm4 = vcmp.lt.s32.totalorder %v36_v41, 96 }
   0x5   :  { %2686 = vmatmul.msk.f32.vlgmr.msra.gmra.mxu1 %vm58_vm0, %v40_v4  ;;  %v3146_v8 = vld [vmem:[%s3959_s2] sm:$0xff]  ;;  %97 = vmatpush.msra.mxu0 %v50_v6  ;;  %v3182_v14 = vld [vmem:[%s3959_s2 + $0x18] sm:$0xff]  ;;  %v3187_v15 = vld [vmem:[%s3959_s2 + $0x8] sm:$0xff] }
   0x6   :  { %215 = vmatpush.msra.mxu2 %v3133_v5  ;;  %233 = vmatpush.msra.mxu3 %v3161_v11  ;;  %v43_v16 = vld [vmem:[%s3960_s0 + $0x18] sm:$0xff]  ;;  %v44_v17 = vld [vmem:[%s3960_s0 + $0x20] sm:$0xff]  ;;  %v45_v18 = vld [vmem:[%s3960_s0 + $0x28] sm:$0xff] }
   0x7   :  { %98 = vmatpush.msra.mxu0 %v48_v7  ;;  %v46_v19 = vld [vmem:[%s3960_s0 + $0x30] sm:$0xff]  ;;  %v47_v20 = vld [vmem:[%s3960_s0 + $0x38] sm:$0xff]  ;;  %v52_v21 = vld [vmem:[%s3961_s3] sm:$0x3]  ;;  %s3053_s0 = smov 64   ;;  %s3054_s3 = smov 32  }
   0x8   :  { %216 = vmatpush.msra.mxu2 %v3146_v8  ;;  %2678 = vmatmul.msk.f32.vlgmr.msra.gmra.mxu0 %vm58_vm0, %v40_v4  ;;  %v55_v22 = vperm.slane %v52_v21, 1  ;;  %v3233_v25 = vperm.slane %v52_v21, 0  ;;  %vm3244_vm7 = vmand %vm37_vm3, %vm38_vm4 }
   0x9   :  { %217 = vmatmul.f32.vlgmr.msra.gmra.mxu2 %v3052_v9  ;;  %234 = vmatpush.msra.mxu3 %v3166_v12 }
   0xa   :  { %350 = vmatpush.msrb.mxu2 %v3116_v1 }
   0xb   :  { %235 = vmatpush.msra.mxu3 %v3182_v14 }
   0xc   :  { %351 = vmatpush.msrb.mxu2 %v3125_v3 }
   0xd   :  { %2687 = vmatmul.msk.f32.gmra.mxu1 %vm58_vm0, %v41_v10  ;;  %236 = vmatpush.msra.mxu3 %v3187_v15 }
   0xe   :  { %352 = vmatpush.msrb.mxu2 %v3133_v5  ;;  %237 = vmatmul.f32.vlgmr.msra.gmra.mxu3 %v3052_v9 }
   0xf   :  { %372 = vmatpush.msrb.mxu3 %v3161_v11 }
  0x10   :  { %353 = vmatpush.msrb.mxu2 %v3146_v8  ;;  %2679 = vmatmul.msk.f32.gmra.mxu0 %vm58_vm0, %v41_v10 }
  0x11   :  { %373 = vmatpush.msrb.mxu3 %v3166_v12 }
  0x12   :  { %490 = vmatpush.msra.mxu2 %v3116_v1 }
  0x13   :  { %374 = vmatpush.msrb.mxu3 %v3182_v14 }
  0x14   :  { %491 = vmatpush.msra.mxu2 %v3125_v3 }
  0x15   :  { %2688 = vmatmul.msk.f32.gmra.mxu1 %vm58_vm0, %v42_v13  ;;  %375 = vmatpush.msrb.mxu3 %v3187_v15 }
  0x16   :  { %492 = vmatpush.msra.mxu2 %v3133_v5 }
  0x17   :  { %512 = vmatpush.msra.mxu3 %v3161_v11 }
  0x18   :  { %493 = vmatpush.msra.mxu2 %v3146_v8  ;;  %2680 = vmatmul.msk.f32.gmra.mxu0 %vm58_vm0, %v42_v13 }
  0x19   :  { %513 = vmatpush.msra.mxu3 %v3166_v12 }
  0x1b   :  { %514 = vmatpush.msra.mxu3 %v3182_v14 }
  0x1d   :  { %2689 = vmatmul.msk.f32.gmra.mxu1 %vm58_vm0, %v43_v16  ;;  %515 = vmatpush.msra.mxu3 %v3187_v15 }
  0x20   :  { %2681 = vmatmul.msk.f32.gmra.mxu0 %vm58_vm0, %v43_v16 }
  0x25   :  { %2690 = vmatmul.msk.f32.gmra.mxu1 %vm58_vm0, %v44_v17 }
  0x28   :  { %2682 = vmatmul.msk.f32.gmra.mxu0 %vm58_vm0, %v44_v17 }
  0x2d   :  { %2691 = vmatmul.msk.f32.gmra.mxu1 %vm58_vm0, %v45_v18 }
  0x30   :  { %2683 = vmatmul.msk.f32.gmra.mxu0 %vm58_vm0, %v45_v18 }
  0x35   :  { %2692 = vmatmul.msk.f32.gmra.mxu1 %vm58_vm0, %v46_v19 }
  0x38   :  { %2684 = vmatmul.msk.f32.gmra.mxu0 %vm58_vm0, %v46_v19 }
  0x3d   :  { %2693 = vmatmul.msk.f32.gmra.mxu1 %vm58_vm0, %v47_v20 }
  0x40   :  { %2685 = vmatmul.msk.f32.gmra.mxu0 %vm58_vm0, %v47_v20 }
  0x82   :  { %v141_v23 = vpop.f32.mrf.mxu1 }
  0x83   :  { %v3231_v24 = vadd.f32 %v141_v23, %v55_v22 }
  0x85   :  { %v100_v26 = vpop.f32.mrf.mxu0 }
  0x86   :  { %v101_v27 = vadd.f32 %v100_v26, %v3233_v25 }
  0x8a   :  { %v144_v28 = vpop.f32.mrf.mxu1 }
  0x8b   :  { %v3236_v29 = vadd.f32 %v144_v28, %v55_v22 }
  0x8c   :  { %v218_v30 = vpop.f32.mrf.mxu2 }
  0x8d   :  { %v219_v31 = vadd.f32 %v218_v30, %v101_v27 }
  0x8f   :  { %v2694_v32 = vmul.f32 -1.442695, %v219_v31 }
  0x91   :  { %2792 = vpow2.f32 %v2694_v32  ;;  %v238_v61 = vpop.f32.mrf.mxu3 }
  0x92   :  { %v147_v33 = vpop.f32.mrf.mxu1 }
  0x93   :  { %v3238_v34 = vadd.f32 %v147_v33, %v55_v22 }
  0x97   :  { %v2793_v35 = vpop.eup %2792 }
  0x98   :  { %v247_v36 = vadd.f32 1.0, %v2793_v35 }
  0x9a   :  { %2794 = vrcp.f32 %v247_v36  ;;  %v150_v37 = vpop.f32.mrf.mxu1  ;;  %vm254_vm1 = vweird.f32 %v247_v36  ;;  %v260_v44 = vand.u32 2147483648, %v247_v36  ;;  %v258_v47 = vand.u32 2147483647, %v247_v36 }
  0x9b   :  { %v3240_v38 = vadd.f32 %v150_v37, %v55_v22  ;;  %2796 = vtanh.f32 %v219_v31 }
  0x9c   :  { %v261_v49 = vor.u32 1.1754944e-38, %v260_v44  ;;  %vm259_vm6 = vcmp.eq.f32.partialorder %v258_v47, 8.507059e+37 }
  0xa0   :  { %v2795_v40 = vpop.eup %2794 }
  0xa1   :  { %v250_v42 = vmul.f32 %v2795_v40, %v247_v36  ;;  %vm255_vm2 = vweird.f32 %v2795_v40  ;;  %v2797_v51 = vpop.eup %2796 }
  0xa2   :  { %v153_v43 = vpop.f32.mrf.mxu1  ;;  %vm256_vm5 = vmor %vm254_vm1, %vm255_vm2 }
  0xa3   :  { %v3242_v45 = vadd.f32 %v153_v43, %v55_v22  ;;  %v251_v46 = vsub.f32 1.0, %v250_v42 }
  0xa5   :  { %v252_v48 = vmul.f32 %v2795_v40, %v251_v46 }
  0xa7   :  { %v253_v50 = vadd.f32 %v2795_v40, %v252_v48  ;;  %v103_v48 = vpop.f32.mrf.mxu0 }
  0xa9   :  { %v257_v53 = vsel %vm256_vm5, %v2795_v40, %v253_v50 }
  0xaa   :  { %v156_v54 = vpop.f32.mrf.mxu1  ;;  %v262_v55 = vsel %vm259_vm6, %v261_v49, %v257_v53  ;;  %v104_v49 = vadd.f32 %v103_v48, %v3233_v25 }
  0xab   :  { %v3248_v56 = vadd.f32 %v156_v54, %v55_v22  ;;  %v281_v57 = vsel %vm3244_vm7, %v2797_v51, %v262_v55 }
  0xac   :  { %287 = vrot.lane.b32.xlu1 %v281_v57, %s3053_s0  ;;  %v283_v31 = vmul.f32 0.0, %v281_v57 }
  0xb2   :  { %v159_v58 = vpop.f32.mrf.mxu1 }
  0xb3   :  { %v3253_v59 = vadd.f32 %v159_v58, %v55_v22 }
  0xba   :  { %v162_v60 = vpop.f32.mrf.mxu1 }
  0xbb   :  { %v163_v62 = vadd.f32 %v162_v60, %v55_v22 }
  0xbd   :  { %v239_v63 = vadd.f32 %v238_v61, %v163_v62 }
  0xbf   :  { %v2695_v0 = vmul.f32 -1.442695, %v239_v63 }
  0xc1   :  { %2798 = vpow2.f32 %v2695_v0 }
  0xc7   :  { %v2799_v2 = vpop.eup %2798 }
  0xc8   :  { %v248_v4 = vadd.f32 1.0, %v2799_v2 }
  0xca   :  { %2800 = vrcp.f32 %v248_v4  ;;  %v275_v13 = vand.u32 2147483648, %v248_v4  ;;  %v273_v17 = vand.u32 2147483647, %v248_v4  ;;  %vm269_vm9 = vweird.f32 %v248_v4 }
  0xcb   :  { %2802 = vtanh.f32 %v239_v63 }
  0xcc   :  { %v276_v19 = vor.u32 1.1754944e-38, %v275_v13  ;;  %vm274_vm11 = vcmp.eq.f32.partialorder %v273_v17, 8.507059e+37 }
  0xd0   :  { %v2801_v6 = vpop.eup %2800 }
  0xd1   :  { %v265_v7 = vmul.f32 %v2801_v6, %v248_v4  ;;  %vm270_vm8 = vweird.f32 %v2801_v6  ;;  %v2803_v21 = vpop.eup %2802 }
  0xd2   :  { %vm271_vm10 = vmor %vm269_vm9, %vm270_vm8 }
  0xd3   :  { %v266_v10 = vsub.f32 1.0, %v265_v7 }
  0xd5   :  { %v267_v16 = vmul.f32 %v2801_v6, %v266_v10 }
  0xd7   :  { %v268_v18 = vadd.f32 %v2801_v6, %v267_v16 }
  0xd9   :  { %v272_v20 = vsel %vm271_vm10, %v2801_v6, %v268_v18 }
  0xda   :  { %v277_v22 = vsel %vm274_vm11, %v276_v19, %v272_v20 }
  0xdb   :  { %v282_v23 = vsel %vm3244_vm7, %v2803_v21, %v277_v22 }
  0xdc   :  { %289 = vrot.lane.b32.xlu0 %v282_v23, %s3053_s0  ;;  %v284_v36 = vmul.f32 0.0, %v282_v23 }
 0x11e   :  { %v288_v26 = vpop.permute.xlu1 %287 }
 0x11f   :  { %v293_v27 = vmul.f32 %v288_v26, %v281_v57 }
 0x121   :  { %297 = vrot.lane.b32.xlu2 %v293_v27, %s3054_s3 }
 0x14e   :  { %v290_v28 = vpop.permute.xlu0 %289 }
 0x14f   :  { %v294_v30 = vmul.f32 %v290_v28, %v282_v23 }
 0x151   :  { %299 = vrot.lane.b32.xlu0 %v294_v30, %s3054_s3 }
 0x17b   :  { %v298_v32 = vpop.permute.xlu2 %297 }
 0x17c   :  { %v3260_v33 = vadd.f32 %v298_v32, %v283_v31 }
 0x17e   :  { %2804 = vtanh.f32 %v3260_v33 }
 0x184   :  { %v2805_v35 = vpop.eup %2804 }
 0x185   :  { %309 = vrot.lane.b32.xlu0 %v2805_v35, %s3053_s0 }
 0x1c3   :  { %v300_v37 = vpop.permute.xlu0 %299 }
 0x1c4   :  { %v3264_v39 = vadd.f32 %v300_v37, %v284_v36 }
 0x1c6   :  { %2806 = vtanh.f32 %v3264_v39 }
 0x1cc   :  { %v2807_v40 = vpop.eup %2806 }
 0x1cd   :  { %311 = vrot.lane.b32.xlu1 %v2807_v40, %s3053_s0 }
 0x1f7   :  { %v310_v41 = vpop.permute.xlu0 %309 }
 0x1f8   :  { %v315_v42 = vmul.f32 %v310_v41, %v281_v57 }
 0x1fa   :  { %318 = vrot.lane.b32.xlu1 %v315_v42, %s3054_s3 }
 0x23f   :  { %v312_v43 = vpop.permute.xlu1 %311 }
 0x240   :  { %v316_v44 = vmul.f32 %v312_v43, %v282_v23 }
 0x242   :  { %323 = vrot.lane.b32.xlu2 %v316_v44, %s3054_s3 }
 0x26c   :  { %v319_v46 = vpop.permute.xlu1 %318 }
 0x26d   :  { %321 = vst.msk [vmem:[#allocation3] sm:$0xff] %vm197_vm12, %v319_v46  ;;  %2696 = vmatmul.msk.f32.vlgmr.msrb.gmra.mxu2 %vm197_vm12, %v319_v46 }
 0x26e   :  { %630 = vmatpush.msrb.mxu2 %v3116_v1 }
 0x270   :  { %631 = vmatpush.msrb.mxu2 %v3125_v3 }
 0x272   :  { %632 = vmatpush.msrb.mxu2 %v3133_v5 }
 0x274   :  { %633 = vmatpush.msrb.mxu2 %v3146_v8 }
 0x29c   :  { %v324_v47 = vpop.permute.xlu2 %323 }
 0x29d   :  { %327 = vst.msk [vmem:[#allocation4 + $0x38] sm:$0xff] %vm197_vm12, %v324_v47  ;;  %2697 = vmatmul.msk.f32.vlgmr.msrb.gmra.mxu3 %vm197_vm12, %v324_v47 }
 0x29e   :  { %652 = vmatpush.msrb.mxu3 %v3161_v11 }
 0x2a0   :  { %653 = vmatpush.msrb.mxu3 %v3166_v12 }
 0x2a2   :  { %654 = vmatpush.msrb.mxu3 %v3182_v14 }
 0x2a4   :  { %655 = vmatpush.msrb.mxu3 %v3187_v15 }
 0x2f0   :  { %v355_v50 = vpop.f32.mrf.mxu2 }
 0x2f1   :  { %v356_v51 = vadd.f32 %v355_v50, %v104_v49 }
 0x2f3   :  { %v2698_v53 = vmul.f32 -1.442695, %v356_v51 }
 0x2f5   :  { %2808 = vpow2.f32 %v2698_v53 }
 0x2fb   :  { %v2809_v54 = vpop.eup %2808 }
 0x2fc   :  { %v386_v55 = vadd.f32 1.0, %v2809_v54 }
 0x2fe   :  { %2810 = vrcp.f32 %v386_v55  ;;  %v399_v61 = vand.u32 2147483648, %v386_v55  ;;  %v397_v63 = vand.u32 2147483647, %v386_v55  ;;  %vm393_vm14 = vweird.f32 %v386_v55 }
 0x2ff   :  { %2812 = vtanh.f32 %v356_v51 }
 0x300   :  { %v400_v2 = vor.u32 1.1754944e-38, %v399_v61  ;;  %vm398_vm0 = vcmp.eq.f32.partialorder %v397_v63, 8.507059e+37 }
 0x304   :  { %v2811_v57 = vpop.eup %2810 }
 0x305   :  { %v389_v58 = vmul.f32 %v2811_v57, %v386_v55  ;;  %vm394_vm13 = vweird.f32 %v2811_v57  ;;  %v2813_v6 = vpop.eup %2812 }
 0x306   :  { %vm395_vm15 = vmor %vm393_vm14, %vm394_vm13 }
 0x307   :  { %v390_v60 = vsub.f32 1.0, %v389_v58 }
 0x309   :  { %v391_v62 = vmul.f32 %v2811_v57, %v390_v60  ;;  %v106_v60 = vpop.f32.mrf.mxu0 }
 0x30b   :  { %v392_v0 = vadd.f32 %v2811_v57, %v391_v62  ;;  %v107_v62 = vadd.f32 %v106_v60, %v3233_v25 }
 0x30d   :  { %v396_v4 = vsel %vm395_vm15, %v2811_v57, %v392_v0 }
 0x30e   :  { %v401_v7 = vsel %vm398_vm0, %v400_v2, %v396_v4 }
 0x30f   :  { %v420_v10 = vsel %vm3244_vm7, %v2813_v6, %v401_v7 }
 0x310   :  { %426 = vrot.lane.b32.xlu1 %v420_v10, %s3053_s0  ;;  %v422_v46 = vmul.f32 %v420_v10, %v3260_v33 }
 0x320   :  { %v377_v13 = vpop.f32.mrf.mxu3 }
 0x321   :  { %v378_v16 = vadd.f32 %v377_v13, %v3253_v59 }
 0x323   :  { %v2699_v17 = vmul.f32 -1.442695, %v378_v16 }
 0x325   :  { %2814 = vpow2.f32 %v2699_v17 }
 0x32b   :  { %v2815_v18 = vpop.eup %2814 }
 0x32c   :  { %v387_v19 = vadd.f32 1.0, %v2815_v18 }
 0x32e   :  { %2816 = vrcp.f32 %v387_v19  ;;  %v414_v23 = vand.u32 2147483648, %v387_v19  ;;  %v412_v27 = vand.u32 2147483647, %v387_v19  ;;  %vm408_vm2 = vweird.f32 %v387_v19 }
 0x32f   :  { %2818 = vtanh.f32 %v378_v16 }
 0x330   :  { %v415_v30 = vor.u32 1.1754944e-38, %v414_v23  ;;  %vm413_vm4 = vcmp.eq.f32.partialorder %v412_v27, 8.507059e+37 }
 0x334   :  { %v2817_v20 = vpop.eup %2816 }
 0x335   :  { %v404_v21 = vmul.f32 %v2817_v20, %v387_v19  ;;  %vm409_vm1 = vweird.f32 %v2817_v20  ;;  %v2819_v59 = vpop.eup %2818 }
 0x336   :  { %vm410_vm3 = vmor %vm408_vm2, %vm409_vm1 }
 0x337   :  { %v405_v22 = vsub.f32 1.0, %v404_v21 }
 0x339   :  { %v406_v26 = vmul.f32 %v2817_v20, %v405_v22 }
 0x33b   :  { %v407_v28 = vadd.f32 %v2817_v20, %v406_v26 }
 0x33d   :  { %v411_v31 = vsel %vm410_vm3, %v2817_v20, %v407_v28 }
 0x33e   :  { %v416_v32 = vsel %vm413_vm4, %v415_v30, %v411_v31 }
 0x33f   :  { %v421_v35 = vsel %vm3244_vm7, %v2819_v59, %v416_v32 }
 0x340   :  { %428 = vrot.lane.b32.xlu2 %v421_v35, %s3053_s0  ;;  %v423_v42 = vmul.f32 %v421_v35, %v3264_v39 }
 0x382   :  { %v427_v40 = vpop.permute.xlu1 %426 }
 0x383   :  { %v432_v41 = vmul.f32 %v427_v40, %v420_v10 }
 0x39a   :  { %v429_v36 = vpop.permute.xlu2 %428 }
 0x39b   :  { %v433_v37 = vmul.f32 %v429_v36, %v421_v35 }
 0x39d   :  { %438 = vrot.lane.b32.xlu0 %v433_v37, %s3054_s3 }
 0x3a5   :  { %436 = vrot.lane.b32.xlu0 %v432_v41, %s3054_s3 }
 0x40f   :  { %v439_v43 = vpop.permute.xlu0 %438 }
 0x410   :  { %v3293_v44 = vadd.f32 %v439_v43, %v423_v42 }
 0x412   :  { %2820 = vtanh.f32 %v3293_v44 }
 0x417   :  { %v437_v47 = vpop.permute.xlu0 %436 }
 0x418   :  { %v2821_v48 = vpop.eup %2820  ;;  %v3297_v49 = vadd.f32 %v437_v47, %v422_v46 }
 0x419   :  { %450 = vrot.lane.b32.xlu2 %v2821_v48, %s3053_s0 }
 0x41a   :  { %2822 = vtanh.f32 %v3297_v49 }
 0x420   :  { %v2823_v50 = vpop.eup %2822 }
 0x421   :  { %448 = vrot.lane.b32.xlu2 %v2823_v50, %s3053_s0 }
 0x473   :  { %v451_v51 = vpop.permute.xlu2 %450 }
 0x474   :  { %v455_v39 = vmul.f32 %v451_v51, %v421_v35 }
 0x476   :  { %463 = vrot.lane.b32.xlu1 %v455_v39, %s3054_s3 }
 0x47b   :  { %v449_v53 = vpop.permute.xlu2 %448 }
 0x47c   :  { %v454_v54 = vmul.f32 %v449_v53, %v420_v10 }
 0x47e   :  { %457 = vrot.lane.b32.xlu0 %v454_v54, %s3054_s3 }
 0x4e8   :  { %v464_v33 = vpop.permute.xlu1 %463 }
 0x4e9   :  { %467 = vst.msk [vmem:[#allocation4 + $0x30] sm:$0xff] %vm197_vm12, %v464_v33  ;;  %2701 = vmatmul.msk.f32.vlgmr.msra.gmra.mxu3 %vm197_vm12, %v464_v33 }
 0x4ea   :  { %786 = vmatpush.msra.mxu3 %v3161_v11 }
 0x4ec   :  { %787 = vmatpush.msra.mxu3 %v3166_v12 }
 0x4ee   :  { %788 = vmatpush.msra.mxu3 %v3182_v14 }
 0x4f0   :  { %v458_v55 = vpop.permute.xlu0 %457  ;;  %789 = vmatpush.msra.mxu3 %v3187_v15 }
 0x4f1   :  { %461 = vst.msk [vmem:[#allocation3 + $0x8] sm:$0xff] %vm197_vm12, %v458_v55  ;;  %2700 = vmatmul.msk.f32.vlgmr.msra.gmra.mxu2 %vm197_vm12, %v458_v55 }
 0x4f2   :  { %764 = vmatpush.msra.mxu2 %v3116_v1 }
 0x4f4   :  { %765 = vmatpush.msra.mxu2 %v3125_v3 }
 0x4f6   :  { %766 = vmatpush.msra.mxu2 %v3133_v5 }
 0x4f8   :  { %767 = vmatpush.msra.mxu2 %v3146_v8 }
 0x56c   :  { %v517_v57 = vpop.f32.mrf.mxu3 }
 0x56d   :  { %v518_v58 = vadd.f32 %v517_v57, %v3248_v56 }
 0x56f   :  { %v2703_v61 = vmul.f32 -1.442695, %v518_v58 }
 0x571   :  { %2824 = vpow2.f32 %v2703_v61 }
 0x574   :  { %v495_v63 = vpop.f32.mrf.mxu2 }
 0x575   :  { %v496_v0 = vadd.f32 %v495_v63, %v107_v62 }
 0x577   :  { %v2825_v2 = vpop.eup %2824  ;;  %v2702_v4 = vmul.f32 -1.442695, %v496_v0 }
 0x578   :  { %v527_v6 = vadd.f32 1.0, %v2825_v2 }
 0x579   :  { %2826 = vpow2.f32 %v2702_v4 }
 0x57a   :  { %2828 = vrcp.f32 %v527_v6  ;;  %v554_v56 = vand.u32 2147483648, %v527_v6  ;;  %v552_v19 = vand.u32 2147483647, %v527_v6  ;;  %vm548_vm6 = vweird.f32 %v527_v6 }
 0x57c   :  { %v555_v22 = vor.u32 1.1754944e-38, %v554_v56  ;;  %vm553_vm9 = vcmp.eq.f32.partialorder %v552_v19, 8.507059e+37 }
 0x57f   :  { %v2827_v7 = vpop.eup %2826 }
 0x580   :  { %v2829_v10 = vpop.eup %2828  ;;  %v526_v13 = vadd.f32 1.0, %v2827_v7 }
 0x581   :  { %v544_v16 = vmul.f32 %v2829_v10, %v527_v6  ;;  %vm549_vm5 = vweird.f32 %v2829_v10 }
 0x582   :  { %2830 = vrcp.f32 %v526_v13  ;;  %vm550_vm8 = vmor %vm548_vm6, %vm549_vm5  ;;  %v539_v59 = vand.u32 2147483648, %v526_v13  ;;  %v537_v35 = vand.u32 2147483647, %v526_v13  ;;  %vm533_vm11 = vweird.f32 %v526_v13 }
 0x583   :  { %v545_v17 = vsub.f32 1.0, %v544_v16  ;;  %2832 = vtanh.f32 %v518_v58 }
 0x584   :  { %2834 = vtanh.f32 %v496_v0  ;;  %v540_v37 = vor.u32 1.1754944e-38, %v539_v59  ;;  %vm538_vm14 = vcmp.eq.f32.partialorder %v537_v35, 8.507059e+37  ;;  %v109_v0 = vpop.f32.mrf.mxu0 }
 0x585   :  { %v546_v18 = vmul.f32 %v2829_v10, %v545_v17  ;;  %v110_v2 = vadd.f32 %v109_v0, %v3233_v25 }
 0x587   :  { %v547_v20 = vadd.f32 %v2829_v10, %v546_v18 }
 0x588   :  { %v2831_v21 = vpop.eup %2830 }
 0x589   :  { %v551_v23 = vsel %vm550_vm8, %v2829_v10, %v547_v20  ;;  %v529_v26 = vmul.f32 %v2831_v21, %v526_v13  ;;  %v2833_v27 = vpop.eup %2832  ;;  %vm534_vm10 = vweird.f32 %v2831_v21 }
 0x58a   :  { %v556_v28 = vsel %vm553_vm9, %v555_v22, %v551_v23  ;;  %vm535_vm13 = vmor %vm533_vm11, %vm534_vm10  ;;  %v2835_v41 = vpop.eup %2834 }
 0x58b   :  { %v561_v30 = vsel %vm3244_vm7, %v2833_v27, %v556_v28  ;;  %v530_v31 = vsub.f32 1.0, %v529_v26 }
 0x58c   :  { %568 = vrot.lane.b32.xlu1 %v561_v30, %s3053_s0  ;;  %v563_v51 = vmul.f32 %v561_v30, %v3293_v44 }
 0x58d   :  { %v531_v32 = vmul.f32 %v2831_v21, %v530_v31 }
 0x58f   :  { %v532_v36 = vadd.f32 %v2831_v21, %v531_v32 }
 0x591   :  { %v536_v40 = vsel %vm535_vm13, %v2831_v21, %v532_v36 }
 0x592   :  { %v541_v42 = vsel %vm538_vm14, %v540_v37, %v536_v40 }
 0x593   :  { %v560_v43 = vsel %vm3244_vm7, %v2835_v41, %v541_v42 }
 0x594   :  { %566 = vrot.lane.b32.xlu0 %v560_v43, %s3053_s0  ;;  %v562_v54 = vmul.f32 %v560_v43, %v3297_v49 }
 0x5fe   :  { %v569_v46 = vpop.permute.xlu1 %568 }
 0x5ff   :  { %v573_v47 = vmul.f32 %v569_v46, %v561_v30 }
 0x601   :  { %578 = vrot.lane.b32.xlu2 %v573_v47, %s3054_s3 }
 0x606   :  { %v567_v48 = vpop.permute.xlu0 %566 }
 0x607   :  { %v572_v50 = vmul.f32 %v567_v48, %v560_v43 }
 0x609   :  { %576 = vrot.lane.b32.xlu2 %v572_v50, %s3054_s3 }
 0x65b   :  { %v579_v39 = vpop.permute.xlu2 %578 }
 0x65c   :  { %v3327_v53 = vadd.f32 %v579_v39, %v563_v51 }
 0x65e   :  { %2836 = vtanh.f32 %v3327_v53 }
 0x663   :  { %v577_v33 = vpop.permute.xlu2 %576 }
 0x664   :  { %v2837_v55 = vpop.eup %2836  ;;  %v3331_v57 = vadd.f32 %v577_v33, %v562_v54 }
 0x665   :  { %590 = vrot.lane.b32.xlu1 %v2837_v55, %s3053_s0 }
 0x666   :  { %2838 = vtanh.f32 %v3331_v57 }
 0x66c   :  { %v2839_v58 = vpop.eup %2838 }
 0x66d   :  { %588 = vrot.lane.b32.xlu1 %v2839_v58, %s3053_s0 }
 0x6d7   :  { %v591_v60 = vpop.permute.xlu1 %590 }
 0x6d8   :  { %v595_v44 = vmul.f32 %v591_v60, %v561_v30 }
 0x6da   :  { %603 = vrot.lane.b32.xlu0 %v595_v44, %s3054_s3 }
 0x6df   :  { %v589_v61 = vpop.permute.xlu1 %588 }
 0x6e0   :  { %v594_v62 = vmul.f32 %v589_v61, %v560_v43 }
 0x6e2   :  { %597 = vrot.lane.b32.xlu2 %v594_v62, %s3054_s3 }
 0x73c   :  { %v598_v49 = vpop.permute.xlu2 %597 }
 0x73d   :  { %601 = vst.msk [vmem:[#allocation3 + $0x10] sm:$0xff] %vm197_vm12, %v598_v49  ;;  %2704 = vmatmul.msk.f32.vlgmr.msrb.gmra.mxu2 %vm197_vm12, %v598_v49 }
 0x73e   :  { %898 = vmatpush.msrb.mxu2 %v3116_v1 }
 0x740   :  { %899 = vmatpush.msrb.mxu2 %v3125_v3 }
 0x742   :  { %900 = vmatpush.msrb.mxu2 %v3133_v5 }
 0x744   :  { %901 = vmatpush.msrb.mxu2 %v3146_v8 }
 0x74c   :  { %v604_v63 = vpop.permute.xlu0 %603 }
 0x74d   :  { %607 = vst.msk [vmem:[#allocation4 + $0x28] sm:$0xff] %vm197_vm12, %v604_v63  ;;  %2705 = vmatmul.msk.f32.vlgmr.msrb.gmra.mxu3 %vm197_vm12, %v604_v63 }
 0x74e   :  { %920 = vmatpush.msrb.mxu3 %v3161_v11 }
 0x750   :  { %921 = vmatpush.msrb.mxu3 %v3166_v12 }
 0x752   :  { %922 = vmatpush.msrb.mxu3 %v3182_v14 }
 0x754   :  { %923 = vmatpush.msrb.mxu3 %v3187_v15 }
 0x7c0   :  { %v635_v4 = vpop.f32.mrf.mxu2 }
 0x7c1   :  { %v636_v6 = vadd.f32 %v635_v4, %v110_v2 }
 0x7c3   :  { %v2706_v7 = vmul.f32 -1.442695, %v636_v6 }
 0x7c5   :  { %2840 = vpow2.f32 %v2706_v7 }
 0x7cb   :  { %v2841_v10 = vpop.eup %2840 }
 0x7cc   :  { %v666_v13 = vadd.f32 1.0, %v2841_v10 }
 0x7ce   :  { %2842 = vrcp.f32 %v666_v13  ;;  %v679_v21 = vand.u32 2147483648, %v666_v13  ;;  %v677_v23 = vand.u32 2147483647, %v666_v13  ;;  %vm673_vm0 = vweird.f32 %v666_v13 }
 0x7d0   :  { %v657_v16 = vpop.f32.mrf.mxu3  ;;  %v680_v30 = vor.u32 1.1754944e-38, %v679_v21  ;;  %vm678_vm2 = vcmp.eq.f32.partialorder %v677_v23, 8.507059e+37 }
 0x7d1   :  { %v658_v17 = vadd.f32 %v657_v16, %v3242_v45 }
 0x7d3   :  { %v2707_v56 = vmul.f32 -1.442695, %v658_v17 }
 0x7d4   :  { %v2843_v18 = vpop.eup %2842 }
 0x7d5   :  { %2844 = vpow2.f32 %v2707_v56  ;;  %v669_v19 = vmul.f32 %v2843_v18, %v666_v13  ;;  %vm674_vm15 = vweird.f32 %v2843_v18 }
 0x7d6   :  { %2846 = vtanh.f32 %v636_v6  ;;  %vm675_vm1 = vmor %vm673_vm0, %vm674_vm15 }
 0x7d7   :  { %v670_v20 = vsub.f32 1.0, %v669_v19 }
 0x7d9   :  { %v671_v22 = vmul.f32 %v2843_v18, %v670_v20 }
 0x7db   :  { %v2845_v26 = vpop.eup %2844  ;;  %v672_v27 = vadd.f32 %v2843_v18, %v671_v22  ;;  %v112_v22 = vpop.f32.mrf.mxu0 }
 0x7dc   :  { %v667_v28 = vadd.f32 1.0, %v2845_v26  ;;  %v2847_v59 = vpop.eup %2846 }
 0x7dd   :  { %v676_v31 = vsel %vm675_vm1, %v2843_v18, %v672_v27 }
 0x7de   :  { %2848 = vrcp.f32 %v667_v28  ;;  %v681_v45 = vsel %vm678_vm2, %v680_v30, %v676_v31  ;;  %v694_v40 = vand.u32 2147483648, %v667_v28  ;;  %v692_v42 = vand.u32 2147483647, %v667_v28 }
 0x7df   :  { %v700_v32 = vsel %vm3244_vm7, %v2847_v59, %v681_v45  ;;  %2850 = vtanh.f32 %v658_v17  ;;  %vm688_vm4 = vweird.f32 %v667_v28 }
 0x7e0   :  { %706 = vrot.lane.b32.xlu2 %v700_v32, %s3053_s0  ;;  %v695_v46 = vor.u32 1.1754944e-38, %v694_v40  ;;  %vm693_vm6 = vcmp.eq.f32.partialorder %v692_v42, 8.507059e+37  ;;  %v702_v61 = vmul.f32 %v700_v32, %v3331_v57 }
 0x7e4   :  { %v2849_v35 = vpop.eup %2848 }
 0x7e5   :  { %v684_v36 = vmul.f32 %v2849_v35, %v667_v28  ;;  %vm689_vm3 = vweird.f32 %v2849_v35  ;;  %v2851_v48 = vpop.eup %2850 }
 0x7e6   :  { %vm690_vm5 = vmor %vm688_vm4, %vm689_vm3 }
 0x7e7   :  { %v685_v37 = vsub.f32 1.0, %v684_v36 }
 0x7e9   :  { %v686_v41 = vmul.f32 %v2849_v35, %v685_v37 }
 0x7eb   :  { %v687_v43 = vadd.f32 %v2849_v35, %v686_v41 }
 0x7ed   :  { %v691_v47 = vsel %vm690_vm5, %v2849_v35, %v687_v43 }
 0x7ee   :  { %v696_v50 = vsel %vm693_vm6, %v695_v46, %v691_v47 }
 0x7ef   :  { %v701_v51 = vsel %vm3244_vm7, %v2851_v48, %v696_v50 }
 0x7f0   :  { %708 = vrot.lane.b32.xlu0 %v701_v51, %s3053_s0  ;;  %v703_v58 = vmul.f32 %v701_v51, %v3327_v53 }
 0x83a   :  { %v707_v33 = vpop.permute.xlu2 %706 }
 0x83b   :  { %v712_v55 = vmul.f32 %v707_v33, %v700_v32 }
 0x862   :  { %v709_v39 = vpop.permute.xlu0 %708 }
 0x863   :  { %v713_v54 = vmul.f32 %v709_v39, %v701_v51 }
 0x865   :  { %718 = vrot.lane.b32.xlu1 %v713_v54, %s3054_s3 }
 0x86d   :  { %716 = vrot.lane.b32.xlu1 %v712_v55, %s3054_s3 }
 0x8d7   :  { %v719_v60 = vpop.permute.xlu1 %718 }
 0x8d8   :  { %v3361_v44 = vadd.f32 %v719_v60, %v703_v58 }
 0x8da   :  { %2852 = vtanh.f32 %v3361_v44 }
 0x8df   :  { %v717_v62 = vpop.permute.xlu1 %716 }
 0x8e0   :  { %v2853_v49 = vpop.eup %2852  ;;  %v3365_v63 = vadd.f32 %v717_v62, %v702_v61 }
 0x8e1   :  { %730 = vrot.lane.b32.xlu0 %v2853_v49, %s3053_s0 }
 0x8e2   :  { %2854 = vtanh.f32 %v3365_v63 }
 0x8e8   :  { %v2855_v0 = vpop.eup %2854 }
 0x8e9   :  { %728 = vrot.lane.b32.xlu0 %v2855_v0, %s3053_s0 }
 0x953   :  { %v731_v2 = vpop.permute.xlu0 %730 }
 0x954   :  { %v735_v53 = vmul.f32 %v731_v2, %v701_v51 }
 0x956   :  { %743 = vrot.lane.b32.xlu2 %v735_v53, %s3054_s3 }
 0x95b   :  { %v729_v4 = vpop.permute.xlu0 %728 }
 0x95c   :  { %v734_v6 = vmul.f32 %v729_v4, %v700_v32 }
 0x95e   :  { %737 = vrot.lane.b32.xlu1 %v734_v6, %s3054_s3 }
 0x9b0   :  { %v744_v57 = vpop.permute.xlu2 %743 }
 0x9b1   :  { %747 = vst.msk [vmem:[#allocation4 + $0x20] sm:$0xff] %vm197_vm12, %v744_v57  ;;  %2709 = vmatmul.msk.f32.vlgmr.msra.gmra.mxu3 %vm197_vm12, %v744_v57 }
 0x9b2   :  { %1054 = vmatpush.msra.mxu3 %v3161_v11 }
 0x9b4   :  { %1055 = vmatpush.msra.mxu3 %v3166_v12 }
 0x9b6   :  { %1056 = vmatpush.msra.mxu3 %v3182_v14 }
 0x9b8   :  { %1057 = vmatpush.msra.mxu3 %v3187_v15 }
 0x9d0   :  { %v738_v7 = vpop.permute.xlu1 %737 }
 0x9d1   :  { %741 = vst.msk [vmem:[#allocation3 + $0x18] sm:$0xff] %vm197_vm12, %v738_v7  ;;  %2708 = vmatmul.msk.f32.vlgmr.msra.gmra.mxu2 %vm197_vm12, %v738_v7 }
 0x9d2   :  { %1032 = vmatpush.msra.mxu2 %v3116_v1 }
 0x9d4   :  { %1033 = vmatpush.msra.mxu2 %v3125_v3 }
 0x9d6   :  { %1034 = vmatpush.msra.mxu2 %v3133_v5 }
 0x9d8   :  { %1035 = vmatpush.msra.mxu2 %v3146_v8 }
 0xa34   :  { %v791_v10 = vpop.f32.mrf.mxu3 }
 0xa35   :  { %v792_v13 = vadd.f32 %v791_v10, %v3240_v38  ;;  %v113_v38 = vadd.f32 %v112_v22, %v3233_v25  ;;  %v3048_v10 = vld [vmem:[%s3959_s2 + $0x30] sm:$0xff] }
 0xa37   :  { %v2711_v16 = vmul.f32 -1.442695, %v792_v13 }
 0xa39   :  { %2856 = vpow2.f32 %v2711_v16 }
 0xa3f   :  { %v2857_v17 = vpop.eup %2856 }
 0xa40   :  { %v801_v56 = vadd.f32 1.0, %v2857_v17 }
 0xa42   :  { %2858 = vrcp.f32 %v801_v56  ;;  %v828_v21 = vand.u32 2147483648, %v801_v56  ;;  %v826_v3 = vand.u32 2147483647, %v801_v56  ;;  %vm822_vm9 = vweird.f32 %v801_v56 }
 0xa43   :  { %2860 = vtanh.f32 %v792_v13 }
 0xa44   :  { %v829_v8 = vor.u32 1.1754944e-38, %v828_v21  ;;  %vm827_vm11 = vcmp.eq.f32.partialorder %v826_v3, 8.507059e+37 }
 0xa48   :  { %v2859_v18 = vpop.eup %2858 }
 0xa49   :  { %v818_v19 = vmul.f32 %v2859_v18, %v801_v56  ;;  %vm823_vm8 = vweird.f32 %v2859_v18  ;;  %v2861_v26 = vpop.eup %2860 }
 0xa4a   :  { %vm824_vm10 = vmor %vm822_vm9, %vm823_vm8 }
 0xa4b   :  { %v819_v20 = vsub.f32 1.0, %v818_v19 }
 0xa4d   :  { %v820_v1 = vmul.f32 %v2859_v18, %v819_v20 }
 0xa4f   :  { %v821_v5 = vadd.f32 %v2859_v18, %v820_v1 }
 0xa51   :  { %v825_v23 = vsel %vm824_vm10, %v2859_v18, %v821_v5 }
 0xa52   :  { %v830_v27 = vsel %vm827_vm11, %v829_v8, %v825_v23 }
 0xa53   :  { %v835_v28 = vsel %vm3244_vm7, %v2861_v26, %v830_v27  ;;  %v115_v26 = vpop.f32.mrf.mxu0 }
 0xa54   :  { %842 = vrot.lane.b32.xlu2 %v835_v28, %s3053_s0  ;;  %v769_v30 = vpop.f32.mrf.mxu2  ;;  %v837_v58 = vmul.f32 %v835_v28, %v3361_v44  ;;  %v116_v27 = vadd.f32 %v115_v26, %v3233_v25 }
 0xa55   :  { %v770_v31 = vadd.f32 %v769_v30, %v113_v38 }
 0xa57   :  { %v2710_v59 = vmul.f32 -1.442695, %v770_v31 }
 0xa59   :  { %2862 = vpow2.f32 %v2710_v59 }
 0xa5f   :  { %v2863_v45 = vpop.eup %2862 }
 0xa60   :  { %v800_v32 = vadd.f32 1.0, %v2863_v45 }
 0xa62   :  { %2864 = vrcp.f32 %v800_v32  ;;  %v813_v40 = vand.u32 2147483648, %v800_v32  ;;  %v811_v42 = vand.u32 2147483647, %v800_v32  ;;  %vm807_vm14 = vweird.f32 %v800_v32 }
 0xa63   :  { %2866 = vtanh.f32 %v770_v31 }
 0xa64   :  { %v814_v46 = vor.u32 1.1754944e-38, %v813_v40  ;;  %vm812_vm0 = vcmp.eq.f32.partialorder %v811_v42, 8.507059e+37 }
 0xa68   :  { %v2865_v35 = vpop.eup %2864 }
 0xa69   :  { %v803_v36 = vmul.f32 %v2865_v35, %v800_v32  ;;  %vm808_vm13 = vweird.f32 %v2865_v35  ;;  %v2867_v48 = vpop.eup %2866 }
 0xa6a   :  { %vm809_vm15 = vmor %vm807_vm14, %vm808_vm13 }
 0xa6b   :  { %v804_v37 = vsub.f32 1.0, %v803_v36 }
 0xa6d   :  { %v805_v41 = vmul.f32 %v2865_v35, %v804_v37 }
 0xa6f   :  { %v806_v43 = vadd.f32 %v2865_v35, %v805_v41 }
 0xa71   :  { %v810_v47 = vsel %vm809_vm15, %v2865_v35, %v806_v43 }
 0xa72   :  { %v815_v50 = vsel %vm812_vm0, %v814_v46, %v810_v47 }
 0xa73   :  { %v834_v51 = vsel %vm3244_vm7, %v2867_v48, %v815_v50 }
 0xa74   :  { %840 = vrot.lane.b32.xlu1 %v834_v51, %s3053_s0  ;;  %v836_v49 = vmul.f32 %v834_v51, %v3365_v63 }
 0xaae   :  { %v843_v39 = vpop.permute.xlu2 %842 }
 0xaaf   :  { %v847_v54 = vmul.f32 %v843_v39, %v835_v28 }
 0xab1   :  { %852 = vrot.lane.b32.xlu0 %v847_v54, %s3054_s3 }
 0xae6   :  { %v841_v33 = vpop.permute.xlu1 %840 }
 0xae7   :  { %v846_v55 = vmul.f32 %v841_v33, %v834_v51 }
 0xae9   :  { %850 = vrot.lane.b32.xlu0 %v846_v55, %s3054_s3 }
 0xb23   :  { %v853_v60 = vpop.permute.xlu0 %852 }
 0xb24   :  { %v3395_v61 = vadd.f32 %v853_v60, %v837_v58 }
 0xb26   :  { %2868 = vtanh.f32 %v3395_v61 }
 0xb2c   :  { %v2869_v62 = vpop.eup %2868 }
 0xb2d   :  { %864 = vrot.lane.b32.xlu2 %v2869_v62, %s3053_s0 }
 0xb5b   :  { %v851_v0 = vpop.permute.xlu0 %850 }
 0xb5c   :  { %v3400_v2 = vadd.f32 %v851_v0, %v836_v49 }
 0xb5e   :  { %2870 = vtanh.f32 %v3400_v2 }
 0xb64   :  { %v2871_v53 = vpop.eup %2870 }
 0xb65   :  { %862 = vrot.lane.b32.xlu2 %v2871_v53, %s3053_s0 }
 0xb87   :  { %v865_v4 = vpop.permute.xlu2 %864 }
 0xb88   :  { %v869_v44 = vmul.f32 %v865_v4, %v835_v28 }
 0xb8a   :  { %877 = vrot.lane.b32.xlu1 %v869_v44, %s3054_s3 }
 0xbbf   :  { %v863_v6 = vpop.permute.xlu2 %862 }
 0xbc0   :  { %v868_v57 = vmul.f32 %v863_v6, %v834_v51 }
 0xbc2   :  { %871 = vrot.lane.b32.xlu0 %v868_v57, %s3054_s3 }
 0xbfc   :  { %v878_v7 = vpop.permute.xlu1 %877 }
 0xbfd   :  { %881 = vst.msk [vmem:[#allocation4 + $0x18] sm:$0xff] %vm197_vm12, %v878_v7  ;;  %2713 = vmatmul.msk.f32.vlgmr.msrb.gmra.mxu3 %vm197_vm12, %v878_v7 }
 0xbfe   :  { %1188 = vmatpush.msrb.mxu3 %v3161_v11  ;;  %v3049_v11 = vld [vmem:[%s3959_s2 + $0x20] sm:$0xff] }
 0xc00   :  { %1189 = vmatpush.msrb.mxu3 %v3166_v12  ;;  %v3050_v12 = vld [vmem:[%s3959_s2 + $0x10] sm:$0xff] }
 0xc02   :  { %1190 = vmatpush.msrb.mxu3 %v3182_v14  ;;  %v3051_v14 = vld [vmem:[%s3959_s2] sm:$0xff] }
 0xc04   :  { %1191 = vmatpush.msrb.mxu3 %v3187_v15 }
 0xc34   :  { %v872_v63 = vpop.permute.xlu0 %871 }
 0xc35   :  { %875 = vst.msk [vmem:[#allocation3 + $0x20] sm:$0xff] %vm197_vm12, %v872_v63  ;;  %2712 = vmatmul.msk.f32.vlgmr.msrb.gmra.mxu2 %vm197_vm12, %v872_v63 }
 0xc36   :  { %1166 = vmatpush.msrb.mxu2 %v3048_v10 }
 0xc38   :  { %1167 = vmatpush.msrb.mxu2 %v3049_v11 }
 0xc3a   :  { %1168 = vmatpush.msrb.mxu2 %v3050_v12 }
 0xc3c   :  { %1169 = vmatpush.msrb.mxu2 %v3051_v14 }
 0xc80   :  { %v925_v15 = vpop.f32.mrf.mxu3 }
 0xc81   :  { %v926_v13 = vadd.f32 %v925_v15, %v3238_v34 }
 0xc83   :  { %v2715_v16 = vmul.f32 -1.442695, %v926_v13 }
 0xc85   :  { %2872 = vpow2.f32 %v2715_v16 }
 0xc8b   :  { %v2873_v17 = vpop.eup %2872 }
 0xc8c   :  { %v935_v56 = vadd.f32 1.0, %v2873_v17 }
 0xc8e   :  { %2874 = vrcp.f32 %v935_v56  ;;  %v962_v21 = vand.u32 2147483648, %v935_v56  ;;  %v960_v3 = vand.u32 2147483647, %v935_v56  ;;  %vm956_vm2 = vweird.f32 %v935_v56 }
 0xc8f   :  { %2876 = vtanh.f32 %v926_v13 }
 0xc90   :  { %v963_v5 = vor.u32 1.1754944e-38, %v962_v21  ;;  %vm961_vm4 = vcmp.eq.f32.partialorder %v960_v3, 8.507059e+37 }
 0xc94   :  { %v2875_v18 = vpop.eup %2874 }
 0xc95   :  { %v952_v19 = vmul.f32 %v2875_v18, %v935_v56  ;;  %vm957_vm1 = vweird.f32 %v2875_v18  ;;  %v2877_v34 = vpop.eup %2876 }
 0xc96   :  { %vm958_vm3 = vmor %vm956_vm2, %vm957_vm1 }
 0xc97   :  { %v953_v20 = vsub.f32 1.0, %v952_v19  ;;  %v118_v19 = vpop.f32.mrf.mxu0 }
 0xc99   :  { %v954_v1 = vmul.f32 %v2875_v18, %v953_v20 }
 0xc9b   :  { %v955_v22 = vadd.f32 %v2875_v18, %v954_v1 }
 0xc9d   :  { %v959_v8 = vsel %vm958_vm3, %v2875_v18, %v955_v22 }
 0xc9e   :  { %v964_v38 = vsel %vm961_vm4, %v963_v5, %v959_v8 }
 0xc9f   :  { %v969_v23 = vsel %vm3244_vm7, %v2877_v34, %v964_v38 }
 0xca0   :  { %976 = vrot.lane.b32.xlu1 %v969_v23, %s3053_s0  ;;  %v971_v55 = vmul.f32 %v969_v23, %v3395_v61 }
 0xcb8   :  { %v903_v28 = vpop.f32.mrf.mxu2 }
 0xcb9   :  { %v904_v30 = vadd.f32 %v903_v28, %v116_v27 }
 0xcbb   :  { %v2714_v31 = vmul.f32 -1.442695, %v904_v30 }
 0xcbd   :  { %2878 = vpow2.f32 %v2714_v31 }
 0xcc3   :  { %v2879_v59 = vpop.eup %2878 }
 0xcc4   :  { %v934_v45 = vadd.f32 1.0, %v2879_v59 }
 0xcc6   :  { %2880 = vrcp.f32 %v934_v45  ;;  %v947_v37 = vand.u32 2147483648, %v934_v45  ;;  %v945_v41 = vand.u32 2147483647, %v934_v45  ;;  %vm941_vm6 = vweird.f32 %v934_v45 }
 0xcc7   :  { %2882 = vtanh.f32 %v904_v30 }
 0xcc8   :  { %v948_v43 = vor.u32 1.1754944e-38, %v947_v37  ;;  %vm946_vm9 = vcmp.eq.f32.partialorder %v945_v41, 8.507059e+37 }
 0xccc   :  { %v2881_v32 = vpop.eup %2880 }
 0xccd   :  { %v937_v35 = vmul.f32 %v2881_v32, %v934_v45  ;;  %vm942_vm5 = vweird.f32 %v2881_v32  ;;  %v2883_v47 = vpop.eup %2882 }
 0xcce   :  { %vm943_vm8 = vmor %vm941_vm6, %vm942_vm5 }
 0xccf   :  { %v938_v36 = vsub.f32 1.0, %v937_v35 }
 0xcd1   :  { %v939_v40 = vmul.f32 %v2881_v32, %v938_v36 }
 0xcd3   :  { %v940_v42 = vadd.f32 %v2881_v32, %v939_v40 }
 0xcd5   :  { %v944_v46 = vsel %vm943_vm8, %v2881_v32, %v940_v42 }
 0xcd6   :  { %v949_v48 = vsel %vm946_vm9, %v948_v43, %v944_v46 }
 0xcd7   :  { %v968_v50 = vsel %vm3244_vm7, %v2883_v47, %v949_v48 }
 0xcd8   :  { %974 = vrot.lane.b32.xlu0 %v968_v50, %s3053_s0  ;;  %v970_v49 = vmul.f32 %v968_v50, %v3400_v2 }
 0xd12   :  { %v977_v51 = vpop.permute.xlu1 %976 }
 0xd13   :  { %v981_v39 = vmul.f32 %v977_v51, %v969_v23 }
 0xd15   :  { %986 = vrot.lane.b32.xlu2 %v981_v39, %s3054_s3 }
 0xd4a   :  { %v975_v54 = vpop.permute.xlu0 %974 }
 0xd4b   :  { %v980_v33 = vmul.f32 %v975_v54, %v968_v50 }
 0xd4d   :  { %984 = vrot.lane.b32.xlu2 %v980_v33, %s3054_s3 }
 0xd6f   :  { %v987_v58 = vpop.permute.xlu2 %986 }
 0xd70   :  { %v3437_v60 = vadd.f32 %v987_v58, %v971_v55 }
 0xd72   :  { %2884 = vtanh.f32 %v3437_v60 }
 0xd78   :  { %v2885_v62 = vpop.eup %2884 }
 0xd79   :  { %998 = vrot.lane.b32.xlu1 %v2885_v62, %s3053_s0 }
 0xda7   :  { %v985_v0 = vpop.permute.xlu2 %984 }
 0xda8   :  { %v3442_v53 = vadd.f32 %v985_v0, %v970_v49 }
 0xdaa   :  { %2886 = vtanh.f32 %v3442_v53 }
 0xdb0   :  { %v2887_v4 = vpop.eup %2886 }
 0xdb1   :  { %996 = vrot.lane.b32.xlu1 %v2887_v4, %s3053_s0  ;;  %v1296_v4 = vld [vmem:[%s3962_s4 + $0x28] sm:$0xff] }
 0xdeb   :  { %v999_v44 = vpop.permute.xlu1 %998 }
 0xdec   :  { %v1003_v61 = vmul.f32 %v999_v44, %v969_v23  ;;  %v1294_v44 = vld [vmem:[%s3962_s4 + $0x18] sm:$0xff] }
 0xdee   :  { %1011 = vrot.lane.b32.xlu0 %v1003_v61, %s3054_s3  ;;  %v1292_v61 = vld [vmem:[%s3962_s4 + $0x8] sm:$0xff] }
 0xe23   :  { %v997_v6 = vpop.permute.xlu1 %996 }
 0xe24   :  { %v1002_v57 = vmul.f32 %v997_v6, %v968_v50 }
 0xe26   :  { %1005 = vrot.lane.b32.xlu2 %v1002_v57, %s3054_s3  ;;  %v1297_v57 = vld [vmem:[%s3962_s4 + $0x30] sm:$0xff] }
 0xe60   :  { %v1012_v7 = vpop.permute.xlu0 %1011 }
 0xe61   :  { %1015 = vst.msk [vmem:[#allocation4 + $0x10] sm:$0xff] %vm197_vm12, %v1012_v7  ;;  %2717 = vmatmul.msk.f32.vlgmr.msra.gmra.mxu3 %vm197_vm12, %v1012_v7  ;;  %v1295_v7 = vld [vmem:[%s3962_s4 + $0x20] sm:$0xff] }
 0xe80   :  { %v1006_v2 = vpop.permute.xlu2 %1005 }
 0xe81   :  { %1009 = vst.msk [vmem:[#allocation3 + $0x28] sm:$0xff] %vm197_vm12, %v1006_v2  ;;  %2716 = vmatmul.msk.f32.vlgmr.msra.gmra.mxu2 %vm197_vm12, %v1006_v2  ;;  %v1293_v2 = vld [vmem:[%s3962_s4 + $0x10] sm:$0xff] }
 0xe82   :  { %1457 = vmatpush.msra.mxu2 %v1297_v57 }
 0xe84   :  { %1458 = vmatpush.msra.mxu2 %v1295_v7 }
 0xe86   :  { %1459 = vmatpush.msra.mxu2 %v1293_v2  ;;  %v1312_v2 = vld [vmem:[%s3962_s4 + $0x68] sm:$0xff] }
 0xee4   :  { %v1059_v63 = vpop.f32.mrf.mxu3 }
 0xee5   :  { %v1060_v10 = vadd.f32 %v1059_v63, %v3236_v29  ;;  %v119_v29 = vadd.f32 %v118_v19, %v3233_v25  ;;  %v1291_v63 = vld [vmem:[%s3962_s4] sm:$0xff] }
 0xee6   :  { %1460 = vmatpush.msra.mxu2 %v1291_v63  ;;  %v1311_v63 = vld [vmem:[%s3962_s4 + $0x60] sm:$0xff] }
 0xee7   :  { %v2719_v11 = vmul.f32 -1.442695, %v1060_v10 }
 0xee9   :  { %2888 = vpow2.f32 %v2719_v11  ;;  %v1284_v11 = vld [vmem:[#allocation3 + $0x8] sm:$0xff] }
 0xeef   :  { %v2889_v12 = vpop.eup %2888 }
 0xef0   :  { %v1069_v14 = vadd.f32 1.0, %v2889_v12  ;;  %v1285_v12 = vld [vmem:[#allocation3 + $0x10] sm:$0xff] }
 0xef2   :  { %2890 = vrcp.f32 %v1069_v14  ;;  %v1096_v17 = vand.u32 2147483648, %v1069_v14  ;;  %v1094_v18 = vand.u32 2147483647, %v1069_v14  ;;  %vm1090_vm11 = vweird.f32 %v1069_v14 }
 0xef3   :  { %2892 = vtanh.f32 %v1060_v10  ;;  %v1283_v10 = vld [vmem:[#allocation3] sm:$0xff] }
 0xef4   :  { %v1097_v21 = vor.u32 1.1754944e-38, %v1096_v17  ;;  %vm1095_vm14 = vcmp.eq.f32.partialorder %v1094_v18, 8.507059e+37 }
 0xef8   :  { %v2891_v15 = vpop.eup %2890 }
 0xef9   :  { %v1086_v13 = vmul.f32 %v2891_v15, %v1069_v14  ;;  %vm1091_vm10 = vweird.f32 %v2891_v15  ;;  %v2893_v3 = vpop.eup %2892 }
 0xefa   :  { %vm1092_vm13 = vmor %vm1090_vm11, %vm1091_vm10 }
 0xefb   :  { %v1087_v16 = vsub.f32 1.0, %v1086_v13  ;;  %v1287_v13 = vld [vmem:[#allocation3 + $0x20] sm:$0xff] }
 0xefd   :  { %v1088_v56 = vmul.f32 %v2891_v15, %v1087_v16  ;;  %v1288_v16 = vld [vmem:[#allocation3 + $0x28] sm:$0xff] }
 0xeff   :  { %v1089_v20 = vadd.f32 %v2891_v15, %v1088_v56 }
 0xf01   :  { %v1093_v1 = vsel %vm1092_vm13, %v2891_v15, %v1089_v20  ;;  %v1286_v15 = vld [vmem:[#allocation3 + $0x18] sm:$0xff] }
 0xf02   :  { %v1098_v22 = vsel %vm1095_vm14, %v1097_v21, %v1093_v1 }
 0xf03   :  { %v1103_v5 = vsel %vm3244_vm7, %v2893_v3, %v1098_v22 }
 0xf04   :  { %1110 = vrot.lane.b32.xlu0 %v1103_v5, %s3053_s0  ;;  %v1037_v8 = vpop.f32.mrf.mxu2  ;;  %v1105_v48 = vmul.f32 %v1103_v5, %v3437_v60 }
 0xf05   :  { %v1038_v34 = vadd.f32 %v1037_v8, %v119_v29 }
 0xf07   :  { %v2718_v38 = vmul.f32 -1.442695, %v1038_v34 }
 0xf09   :  { %2894 = vpow2.f32 %v2718_v38 }
 0xf0f   :  { %v2895_v23 = vpop.eup %2894 }
 0xf10   :  { %v1068_v26 = vadd.f32 1.0, %v2895_v23 }
 0xf12   :  { %2896 = vrcp.f32 %v1068_v26  ;;  %v1081_v31 = vand.u32 2147483648, %v1068_v26  ;;  %v1079_v45 = vand.u32 2147483647, %v1068_v26  ;;  %vm1075_vm0 = vweird.f32 %v1068_v26 }
 0xf13   :  { %2898 = vtanh.f32 %v1038_v34  ;;  %v121_v34 = vpop.f32.mrf.mxu0 }
 0xf14   :  { %v1082_v35 = vor.u32 1.1754944e-38, %v1081_v31  ;;  %vm1080_vm2 = vcmp.eq.f32.partialorder %v1079_v45, 8.507059e+37 }
 0xf18   :  { %v2897_v27 = vpop.eup %2896 }
 0xf19   :  { %v1071_v28 = vmul.f32 %v2897_v27, %v1068_v26  ;;  %vm1076_vm15 = vweird.f32 %v2897_v27  ;;  %v2899_v37 = vpop.eup %2898 }
 0xf1a   :  { %vm1077_vm1 = vmor %vm1075_vm0, %vm1076_vm15 }
 0xf1b   :  { %v1072_v30 = vsub.f32 1.0, %v1071_v28 }
 0xf1d   :  { %v1073_v59 = vmul.f32 %v2897_v27, %v1072_v30 }
 0xf1f   :  { %v1074_v32 = vadd.f32 %v2897_v27, %v1073_v59 }
 0xf21   :  { %v1078_v36 = vsel %vm1077_vm1, %v2897_v27, %v1074_v32 }
 0xf22   :  { %v1083_v40 = vsel %vm1080_vm2, %v1082_v35, %v1078_v36 }
 0xf23   :  { %v1102_v41 = vsel %vm3244_vm7, %v2899_v37, %v1083_v40 }
 0xf24   :  { %1108 = vrot.lane.b32.xlu2 %v1102_v41, %s3053_s0  ;;  %v1104_v39 = vmul.f32 %v1102_v41, %v3442_v53  ;;  %v1298_v53 = vld [vmem:[%s3962_s4 + $0x38] sm:$0xff] }
 0xf25   :  { %1498 = vmatpush.msra.mxu3 %v1298_v53 }
 0xf27   :  { %1499 = vmatpush.msra.mxu3 %v1296_v4 }
 0xf29   :  { %1500 = vmatpush.msra.mxu3 %v1294_v44 }
 0xf2b   :  { %1501 = vmatpush.msra.mxu3 %v1292_v61 }
 0xf76   :  { %v1111_v42 = vpop.permute.xlu0 %1110 }
 0xf77   :  { %v1115_v43 = vmul.f32 %v1111_v42, %v1103_v5 }
 0xf79   :  { %1120 = vrot.lane.b32.xlu1 %v1115_v43, %s3054_s3 }
 0xf7e   :  { %v1109_v46 = vpop.permute.xlu2 %1108 }
 0xf7f   :  { %v1114_v47 = vmul.f32 %v1109_v46, %v1102_v41 }
 0xf81   :  { %1118 = vrot.lane.b32.xlu1 %v1114_v47, %s3054_s3 }
 0xfeb   :  { %v1121_v50 = vpop.permute.xlu1 %1120 }
 0xfec   :  { %v3463_v51 = vadd.f32 %v1121_v50, %v1105_v48 }
 0xfee   :  { %2900 = vtanh.f32 %v3463_v51 }
 0xff3   :  { %v1119_v54 = vpop.permute.xlu1 %1118 }
 0xff4   :  { %v2901_v33 = vpop.eup %2900  ;;  %v3467_v55 = vadd.f32 %v1119_v54, %v1104_v39 }
 0xff5   :  { %1132 = vrot.lane.b32.xlu0 %v2901_v33, %s3053_s0 }
 0xff6   :  { %2902 = vtanh.f32 %v3467_v55 }
 0xffc   :  { %v2903_v58 = vpop.eup %2902 }
 0xffd   :  { %1130 = vrot.lane.b32.xlu0 %v2903_v58, %s3053_s0 }
0x1067   :  { %v1133_v62 = vpop.permute.xlu0 %1132 }
0x1068   :  { %v1137_v60 = vmul.f32 %v1133_v62, %v1103_v5 }
0x106a   :  { %1145 = vrot.lane.b32.xlu2 %v1137_v60, %s3054_s3 }
0x106f   :  { %v1131_v49 = vpop.permute.xlu0 %1130 }
0x1070   :  { %v1136_v0 = vmul.f32 %v1131_v49, %v1102_v41 }
0x1072   :  { %1139 = vrot.lane.b32.xlu1 %v1136_v0, %s3054_s3 }
0x10c4   :  { %v1146_v6 = vpop.permute.xlu2 %1145 }
0x10c5   :  { %1149 = vst.msk [vmem:[#allocation4 + $0x8] sm:$0xff] %vm197_vm12, %v1146_v6  ;;  %2721 = vmatmul.msk.f32.vlgmr.msrb.gmra.mxu3 %vm197_vm12, %v1146_v6 }
0x10cd   :  { %2748 = vmatmul.msk.f32.vlgmr.msra.gmra.mxu3 %vm197_vm12, %v1283_v10 }
0x10d5   :  { %2749 = vmatmul.msk.f32.gmra.mxu3 %vm197_vm12, %v1284_v11 }
0x10dd   :  { %2750 = vmatmul.msk.f32.gmra.mxu3 %vm197_vm12, %v1285_v12 }
0x10e4   :  { %v1140_v14 = vpop.permute.xlu1 %1139 }
0x10e5   :  { %1143 = vst.msk [vmem:[#allocation3 + $0x30] sm:$0xff] %vm197_vm12, %v1140_v14  ;;  %2720 = vmatmul.msk.f32.vlgmr.msrb.gmra.mxu2 %vm197_vm12, %v1140_v14  ;;  %2751 = vmatmul.msk.f32.gmra.mxu3 %vm197_vm12, %v1286_v15 }
0x10ec   :  { %v1289_v17 = vld [vmem:[#allocation3 + $0x30] sm:$0xff] }
0x10ed   :  { %2740 = vmatmul.msk.f32.vlgmr.msra.gmra.mxu2 %vm197_vm12, %v1283_v10  ;;  %2752 = vmatmul.msk.f32.gmra.mxu3 %vm197_vm12, %v1287_v13  ;;  %v1310_v10 = vld [vmem:[%s3962_s4 + $0x58] sm:$0xff] }
0x10f5   :  { %2741 = vmatmul.msk.f32.gmra.mxu2 %vm197_vm12, %v1284_v11  ;;  %2753 = vmatmul.msk.f32.gmra.mxu3 %vm197_vm12, %v1288_v16  ;;  %v1308_v11 = vld [vmem:[%s3962_s4 + $0x48] sm:$0xff] }
0x10fd   :  { %2742 = vmatmul.msk.f32.gmra.mxu2 %vm197_vm12, %v1285_v12  ;;  %2754 = vmatmul.msk.f32.gmra.mxu3 %vm197_vm12, %v1289_v17 }
0x1105   :  { %2743 = vmatmul.msk.f32.gmra.mxu2 %vm197_vm12, %v1286_v15  ;;  %v1309_v15 = vld [vmem:[%s3962_s4 + $0x50] sm:$0xff] }
0x110d   :  { %2744 = vmatmul.msk.f32.gmra.mxu2 %vm197_vm12, %v1287_v13  ;;  %v1307_v13 = vld [vmem:[%s3962_s4 + $0x40] sm:$0xff] }
0x1115   :  { %2745 = vmatmul.msk.f32.gmra.mxu2 %vm197_vm12, %v1288_v16  ;;  %v3559_v16 = vld [vmem:[%s3963_s5 + $0x38] sm:$0xff] }
0x1116   :  { %1740 = vmatpush.msrb.mxu3 %v3559_v16 }
0x111d   :  { %2746 = vmatmul.msk.f32.gmra.mxu2 %vm197_vm12, %v1289_v17  ;;  %v3566_v17 = vld [vmem:[%s3963_s5 + $0x28] sm:$0xff] }
0x111e   :  { %1741 = vmatpush.msrb.mxu3 %v3566_v17 }
0x1148   :  { %v1193_v56 = vpop.f32.mrf.mxu3 }
0x1149   :  { %v1194_v18 = vadd.f32 %v1193_v56, %v3231_v24  ;;  %v122_v24 = vadd.f32 %v121_v34, %v3233_v25  ;;  %v1303_v34 = vld [vmem:[#allocation4 + $0x20] sm:$0xff] }
0x114b   :  { %v2723_v19 = vmul.f32 -1.442695, %v1194_v18 }
0x114d   :  { %2904 = vpow2.f32 %v2723_v19 }
0x1153   :  { %v2905_v20 = vpop.eup %2904 }
0x1154   :  { %v1203_v21 = vadd.f32 1.0, %v2905_v20  ;;  %v3583_v20 = vld [vmem:[%s3963_s5 + $0x18] sm:$0xff] }
0x1155   :  { %1742 = vmatpush.msrb.mxu3 %v3583_v20 }
0x1156   :  { %2906 = vrcp.f32 %v1203_v21  ;;  %v1230_v22 = vand.u32 2147483648, %v1203_v21  ;;  %v1228_v8 = vand.u32 2147483647, %v1203_v21  ;;  %vm1224_vm4 = vweird.f32 %v1203_v21 }
0x1157   :  { %2908 = vtanh.f32 %v1194_v18  ;;  %v3574_v18 = vld [vmem:[%s3963_s5 + $0x30] sm:$0xff] }
0x1158   :  { %v1231_v23 = vor.u32 1.1754944e-38, %v1230_v22  ;;  %vm1229_vm6 = vcmp.eq.f32.partialorder %v1228_v8, 8.507059e+37  ;;  %1715 = vmatpush.msrb.mxu2 %v3574_v18  ;;  %v1302_v22 = vld [vmem:[#allocation4 + $0x18] sm:$0xff]  ;;  %v3621_v8 = vld [vmem:[%s3963_s5] sm:$0xff] }
0x115c   :  { %v2907_v29 = vpop.eup %2906 }
0x115d   :  { %v1220_v1 = vmul.f32 %v2907_v29, %v1203_v21  ;;  %vm1225_vm3 = vweird.f32 %v2907_v29  ;;  %v2909_v27 = vpop.eup %2908  ;;  %v1300_v21 = vld [vmem:[#allocation4 + $0x8] sm:$0xff] }
0x115e   :  { %vm1226_vm5 = vmor %vm1224_vm4, %vm1225_vm3 }
0x115f   :  { %v1221_v3 = vsub.f32 1.0, %v1220_v1  ;;  %v1301_v1 = vld [vmem:[#allocation4 + $0x10] sm:$0xff] }
0x1161   :  { %v1222_v5 = vmul.f32 %v2907_v29, %v1221_v3  ;;  %v3601_v3 = vld [vmem:[%s3963_s5 + $0x8] sm:$0xff] }
0x1162   :  { %1743 = vmatpush.msrb.mxu3 %v3601_v3 }
0x1163   :  { %v1223_v38 = vadd.f32 %v2907_v29, %v1222_v5  ;;  %v3616_v5 = vld [vmem:[%s3963_s5 + $0x10] sm:$0xff] }
0x1164   :  { %2004 = vmatpush.msra.mxu3 %v3559_v16 }
0x1165   :  { %v1227_v26 = vsel %vm1226_vm5, %v2907_v29, %v1223_v38  ;;  %v3592_v29 = vld [vmem:[%s3963_s5 + $0x20] sm:$0xff]  ;;  %v1304_v38 = vld [vmem:[#allocation4 + $0x28] sm:$0xff] }
0x1166   :  { %v1232_v28 = vsel %vm1229_vm6, %v1231_v23, %v1227_v26  ;;  %1716 = vmatpush.msrb.mxu2 %v3592_v29  ;;  %2005 = vmatpush.msra.mxu3 %v3566_v17  ;;  %v1306_v26 = vld [vmem:[#allocation4 + $0x38] sm:$0xff] }
0x1167   :  { %v1237_v30 = vsel %vm3244_vm7, %v2909_v27, %v1232_v28  ;;  %v1503_v28 = vpop.f32.mrf.mxu3 }
0x1168   :  { %1244 = vrot.lane.b32.xlu2 %v1237_v30, %s3053_s0  ;;  %v1171_v31 = vpop.f32.mrf.mxu2  ;;  %v1239_v60 = vmul.f32 %v1237_v30, %v3463_v51  ;;  %v1314_v51 = vld [vmem:[%s3962_s4 + $0x78] sm:$0xff]  ;;  %2006 = vmatpush.msra.mxu3 %v3583_v20 }
0x1169   :  { %v1172_v59 = vadd.f32 %v1171_v31, %v122_v24  ;;  %1392 = vmatpush.msrb.mxu1 %v1314_v51  ;;  %1717 = vmatpush.msrb.mxu2 %v3616_v5  ;;  %v1305_v24 = vld [vmem:[#allocation4 + $0x30] sm:$0xff] }
0x116a   :  { %2007 = vmatpush.msra.mxu3 %v3601_v3 }
0x116b   :  { %v2722_v45 = vmul.f32 -1.442695, %v1172_v59  ;;  %1393 = vmatpush.msrb.mxu1 %v1312_v2  ;;  %1718 = vmatpush.msrb.mxu2 %v3621_v8 }
0x116d   :  { %2910 = vpow2.f32 %v2722_v45  ;;  %1394 = vmatpush.msrb.mxu1 %v1310_v10  ;;  %1979 = vmatpush.msra.mxu2 %v3574_v18 }
0x116f   :  { %1395 = vmatpush.msrb.mxu1 %v1308_v11  ;;  %1980 = vmatpush.msra.mxu2 %v3592_v29  ;;  %v1506_v31 = vpop.f32.mrf.mxu3 }
0x1171   :  { %1609 = vmatpush.msra.mxu1 %v3559_v16  ;;  %1981 = vmatpush.msra.mxu2 %v3616_v5 }
0x1173   :  { %v2911_v32 = vpop.eup %2910  ;;  %1610 = vmatpush.msra.mxu1 %v3566_v17  ;;  %1982 = vmatpush.msra.mxu2 %v3621_v8 }
0x1174   :  { %v1202_v35 = vadd.f32 1.0, %v2911_v32 }
0x1175   :  { %1611 = vmatpush.msra.mxu1 %v3583_v20 }
0x1176   :  { %2912 = vrcp.f32 %v1202_v35  ;;  %v1215_v25 = vand.u32 2147483648, %v1202_v35  ;;  %v1213_v42 = vand.u32 2147483647, %v1202_v35  ;;  %vm1209_vm9 = vweird.f32 %v1202_v35 }
0x1177   :  { %2914 = vtanh.f32 %v1172_v59  ;;  %1612 = vmatpush.msra.mxu1 %v3601_v3 }
0x1178   :  { %v1216_v46 = vor.u32 1.1754944e-38, %v1215_v25  ;;  %vm1214_vm11 = vcmp.eq.f32.partialorder %v1213_v42, 8.507059e+37 }
0x117c   :  { %v2913_v36 = vpop.eup %2912 }
0x117d   :  { %v1205_v37 = vmul.f32 %v2913_v36, %v1202_v35  ;;  %vm1210_vm8 = vweird.f32 %v2913_v36  ;;  %v2915_v48 = vpop.eup %2914 }
0x117e   :  { %vm1211_vm10 = vmor %vm1209_vm9, %vm1210_vm8 }
0x117f   :  { %v1206_v40 = vsub.f32 1.0, %v1205_v37 }
0x1181   :  { %v1207_v41 = vmul.f32 %v2913_v36, %v1206_v40  ;;  %v1509_v40 = vpop.f32.mrf.mxu3 }
0x1183   :  { %v1208_v43 = vadd.f32 %v2913_v36, %v1207_v41 }
0x1185   :  { %v1212_v47 = vsel %vm1211_vm10, %v2913_v36, %v1208_v43 }
0x1186   :  { %v1217_v50 = vsel %vm1214_vm11, %v1216_v46, %v1212_v47 }
0x1187   :  { %v1236_v39 = vsel %vm3244_vm7, %v2915_v48, %v1217_v50 }
0x1188   :  { %1242 = vrot.lane.b32.xlu1 %v1236_v39, %s3053_s0  ;;  %v1238_v4 = vmul.f32 %v1236_v39, %v3467_v55  ;;  %v1313_v55 = vld [vmem:[%s3962_s4 + $0x70] sm:$0xff] }
0x1189   :  { %1351 = vmatpush.msrb.mxu0 %v1313_v55 }
0x118b   :  { %1352 = vmatpush.msrb.mxu0 %v1311_v63 }
0x118d   :  { %1353 = vmatpush.msrb.mxu0 %v1309_v15 }
0x118f   :  { %1354 = vmatpush.msrb.mxu0 %v1307_v13 }
0x1191   :  { %1589 = vmatpush.msra.mxu0 %v3574_v18 }
0x1193   :  { %1590 = vmatpush.msra.mxu0 %v3592_v29 }
0x1195   :  { %1591 = vmatpush.msra.mxu0 %v3616_v5 }
0x1197   :  { %1592 = vmatpush.msra.mxu0 %v3621_v8 }
0x11c2   :  { %v1245_v54 = vpop.permute.xlu2 %1244 }
0x11c3   :  { %v1249_v33 = vmul.f32 %v1245_v54, %v1237_v30 }
0x11c5   :  { %1254 = vrot.lane.b32.xlu0 %v1249_v33, %s3054_s3  ;;  %v1512_v33 = vpop.f32.mrf.mxu3 }
0x11fa   :  { %v1243_v58 = vpop.permute.xlu1 %1242 }
0x11fb   :  { %v1248_v62 = vmul.f32 %v1243_v58, %v1236_v39 }
0x11fd   :  { %1252 = vrot.lane.b32.xlu0 %v1248_v62, %s3054_s3 }
0x1237   :  { %v1255_v49 = vpop.permute.xlu0 %1254 }
0x1238   :  { %v1259_v0 = vadd.f32 %v1255_v49, %v1239_v60 }
0x123a   :  { %2916 = vtanh.f32 %v1259_v0 }
0x1240   :  { %v2917_v53 = vpop.eup %2916 }
0x1241   :  { %1266 = vrot.lane.b32.xlu2 %v2917_v53, %s3053_s0 }
0x126f   :  { %v1253_v44 = vpop.permute.xlu0 %1252 }
0x1270   :  { %v1258_v61 = vadd.f32 %v1253_v44, %v1238_v4 }
0x1272   :  { %2918 = vtanh.f32 %v1258_v61 }
0x1278   :  { %v2919_v6 = vpop.eup %2918 }
0x1279   :  { %1264 = vrot.lane.b32.xlu2 %v2919_v6, %s3053_s0  ;;  %v1515_v6 = vpop.f32.mrf.mxu3 }
0x129b   :  { %v1267_v57 = vpop.permute.xlu2 %1266 }
0x129c   :  { %v1271_v7 = vmul.f32 %v1267_v57, %v1237_v30  ;;  %v1462_v30 = vpop.f32.mrf.mxu2 }
0x129e   :  { %1279 = vrot.lane.b32.xlu1 %v1271_v7, %s3054_s3 }
0x12a4   :  { %v1465_v59 = vpop.f32.mrf.mxu2 }
0x12ac   :  { %v1468_v25 = vpop.f32.mrf.mxu2 }
0x12b4   :  { %v1471_v58 = vpop.f32.mrf.mxu2 }
0x12bc   :  { %v1474_v57 = vpop.f32.mrf.mxu2 }
0x12c4   :  { %v1477_v15 = vpop.f32.mrf.mxu2 }
0x12d3   :  { %v1265_v12 = vpop.permute.xlu2 %1264 }
0x12d4   :  { %v1270_v14 = vmul.f32 %v1265_v12, %v1236_v39 }
0x12d6   :  { %1273 = vrot.lane.b32.xlu0 %v1270_v14, %s3054_s3  ;;  %v1518_v14 = vpop.f32.mrf.mxu3 }
0x1310   :  { %v1280_v56 = vpop.permute.xlu1 %1279 }
0x1311   :  { %1282 = vst.msk [vmem:[#allocation4] sm:$0xff] %vm197_vm12, %v1280_v56 }
0x1318   :  { %v1299_v19 = vld [vmem:[#allocation4] sm:$0xff] }
0x1319   :  { %2724 = vmatmul.msk.f32.vlgmr.msrb.gmra.mxu0 %vm197_vm12, %v1299_v19  ;;  %2732 = vmatmul.msk.f32.vlgmr.msrb.gmra.mxu1 %vm197_vm12, %v1299_v19 }
0x131a   :  { %1872 = vmatpush.msrb.mxu1 %v3559_v16  ;;  %1847 = vmatpush.msrb.mxu0 %v3574_v18 }
0x131c   :  { %1873 = vmatpush.msrb.mxu1 %v3566_v17  ;;  %1848 = vmatpush.msrb.mxu0 %v3592_v29 }
0x131e   :  { %1874 = vmatpush.msrb.mxu1 %v3583_v20  ;;  %1849 = vmatpush.msrb.mxu0 %v3616_v5 }
0x1320   :  { %1875 = vmatpush.msrb.mxu1 %v3601_v3  ;;  %1850 = vmatpush.msrb.mxu0 %v3621_v8 }
0x1321   :  { %2725 = vmatmul.msk.f32.gmra.mxu0 %vm197_vm12, %v1300_v21  ;;  %2733 = vmatmul.msk.f32.gmra.mxu1 %vm197_vm12, %v1300_v21 }
0x1329   :  { %2726 = vmatmul.msk.f32.gmra.mxu0 %vm197_vm12, %v1301_v1  ;;  %2734 = vmatmul.msk.f32.gmra.mxu1 %vm197_vm12, %v1301_v1 }
0x1331   :  { %2727 = vmatmul.msk.f32.gmra.mxu0 %vm197_vm12, %v1302_v22  ;;  %2735 = vmatmul.msk.f32.gmra.mxu1 %vm197_vm12, %v1302_v22 }
0x1339   :  { %2728 = vmatmul.msk.f32.gmra.mxu0 %vm197_vm12, %v1303_v34  ;;  %2736 = vmatmul.msk.f32.gmra.mxu1 %vm197_vm12, %v1303_v34  ;;  %v1521_v34 = vpop.f32.mrf.mxu3 }
0x1341   :  { %2729 = vmatmul.msk.f32.gmra.mxu0 %vm197_vm12, %v1304_v38  ;;  %2737 = vmatmul.msk.f32.gmra.mxu1 %vm197_vm12, %v1304_v38  ;;  %v1480_v38 = vpop.f32.mrf.mxu2 }
0x1348   :  { %v1274_v23 = vpop.permute.xlu0 %1273 }
0x1349   :  { %1277 = vst.msk [vmem:[#allocation3 + $0x38] sm:$0xff] %vm197_vm12, %v1274_v23  ;;  %2730 = vmatmul.msk.f32.gmra.mxu0 %vm197_vm12, %v1305_v24  ;;  %2738 = vmatmul.msk.f32.gmra.mxu1 %vm197_vm12, %v1305_v24 }
0x1350   :  { %v1290_v27 = vld [vmem:[#allocation3 + $0x38] sm:$0xff] }
0x1351   :  { %2731 = vmatmul.msk.f32.gmra.mxu0 %vm197_vm12, %v1306_v26  ;;  %2739 = vmatmul.msk.f32.gmra.mxu1 %vm197_vm12, %v1306_v26 }
0x1352   :  { %2747 = vmatmul.msk.f32.gmra.mxu2 %vm197_vm12, %v1290_v27  ;;  %2755 = vmatmul.msk.f32.gmra.mxu3 %vm197_vm12, %v1290_v27 }
0x1359   :  { %1593 = vmatmul.f32.vlgmr.msra.gmra.mxu0 %v3052_v9  ;;  %1613 = vmatmul.f32.vlgmr.msra.gmra.mxu1 %v3052_v9  ;;  %v1527_v9 = vld [vmem:[%s3964_s6] sm:$0x3] }
0x135a   :  { %2107 = vmatpush.msra.mxu0 %v3574_v18  ;;  %2132 = vmatpush.msra.mxu1 %v3559_v16  ;;  %v3661_v45 = vperm.slane %v1527_v9, 1  ;;  %v1529_v47 = vperm.slane %v1527_v9, 0 }
0x135c   :  { %2108 = vmatpush.msra.mxu0 %v3592_v29  ;;  %2133 = vmatpush.msra.mxu1 %v3566_v17 }
0x135e   :  { %2109 = vmatpush.msra.mxu0 %v3616_v5  ;;  %2134 = vmatpush.msra.mxu1 %v3583_v20 }
0x1360   :  { %2110 = vmatpush.msra.mxu0 %v3621_v8  ;;  %2135 = vmatpush.msra.mxu1 %v3601_v3 }
0x1396   :  { %v1356_v32 = vpop.f32.mrf.mxu0  ;;  %v1397_v35 = vpop.f32.mrf.mxu1 }
0x1397   :  { %v1504_v36 = vadd.f32 %v1503_v28, %v1397_v35  ;;  %v1463_v35 = vadd.f32 %v1462_v30, %v1356_v32 }
0x1399   :  { %v3664_v37 = vadd.f32 %v3661_v45, %v1504_v36 }
0x139e   :  { %v1359_v41 = vpop.f32.mrf.mxu0  ;;  %v1400_v42 = vpop.f32.mrf.mxu1 }
0x139f   :  { %v1466_v43 = vadd.f32 %v1465_v59, %v1359_v41  ;;  %v1507_v46 = vadd.f32 %v1506_v31, %v1400_v42 }
0x13a1   :  { %v3666_v48 = vadd.f32 %v1529_v47, %v1466_v43  ;;  %v3669_v50 = vadd.f32 %v3661_v45, %v1507_v46 }
0x13a6   :  { %v1362_v39 = vpop.f32.mrf.mxu0  ;;  %v1403_v54 = vpop.f32.mrf.mxu1 }
0x13a7   :  { %v1469_v62 = vadd.f32 %v1468_v25, %v1362_v39  ;;  %v1510_v60 = vadd.f32 %v1509_v40, %v1403_v54  ;;  %v1533_v25 = vadd.f32 %v1529_v47, %v1463_v35 }
0x13a9   :  { %v3671_v49 = vadd.f32 %v1529_v47, %v1469_v62  ;;  %v3674_v0 = vadd.f32 %v3661_v45, %v1510_v60 }
0x13ae   :  { %v1365_v53 = vpop.f32.mrf.mxu0  ;;  %v1406_v4 = vpop.f32.mrf.mxu1 }
0x13af   :  { %v1472_v44 = vadd.f32 %v1471_v58, %v1365_v53  ;;  %v1513_v61 = vadd.f32 %v1512_v33, %v1406_v4 }
0x13b1   :  { %v3676_v7 = vadd.f32 %v1529_v47, %v1472_v44  ;;  %v3679_v51 = vadd.f32 %v3661_v45, %v1513_v61 }
0x13b6   :  { %v1368_v2 = vpop.f32.mrf.mxu0  ;;  %v1409_v55 = vpop.f32.mrf.mxu1 }
0x13b7   :  { %v1475_v63 = vadd.f32 %v1474_v57, %v1368_v2  ;;  %v1516_v10 = vadd.f32 %v1515_v6, %v1409_v55 }
0x13b9   :  { %v3682_v11 = vadd.f32 %v3661_v45, %v1516_v10  ;;  %v3684_v12 = vadd.f32 %v1529_v47, %v1475_v63 }
0x13be   :  { %v1371_v13 = vpop.f32.mrf.mxu0  ;;  %v1412_v56 = vpop.f32.mrf.mxu1 }
0x13bf   :  { %v1478_v19 = vadd.f32 %v1477_v15, %v1371_v13  ;;  %v1519_v21 = vadd.f32 %v1518_v14, %v1412_v56 }
0x13c1   :  { %v3687_v1 = vadd.f32 %v3661_v45, %v1519_v21  ;;  %v3689_v22 = vadd.f32 %v1529_v47, %v1478_v19 }
0x13c6   :  { %v1374_v23 = vpop.f32.mrf.mxu0  ;;  %v1415_v24 = vpop.f32.mrf.mxu1 }
0x13c7   :  { %v1481_v26 = vadd.f32 %v1480_v38, %v1374_v23  ;;  %v1522_v27 = vadd.f32 %v1521_v34, %v1415_v24 }
0x13c9   :  { %v3692_v28 = vadd.f32 %v3661_v45, %v1522_v27  ;;  %v3694_v9 = vadd.f32 %v1529_v47, %v1481_v26 }
0x13ce   :  { %v1377_v31 = vpop.f32.mrf.mxu0  ;;  %v1418_v59 = vpop.f32.mrf.mxu1 }
0x13d5   :  { %v1483_v36 = vpop.f32.mrf.mxu2  ;;  %v1524_v40 = vpop.f32.mrf.mxu3 }
0x13d6   :  { %v1484_v41 = vadd.f32 %v1483_v36, %v1377_v31  ;;  %v1525_v42 = vadd.f32 %v1524_v40, %v1418_v59  ;;  %v1594_v43 = vpop.f32.mrf.mxu0  ;;  %v1614_v39 = vpop.f32.mrf.mxu1 }
0x13d7   :  { %v1595_v46 = vadd.f32 %v1594_v43, %v1533_v25 }
0x13d8   :  { %v1548_v54 = vadd.f32 %v3661_v45, %v1525_v42  ;;  %v3697_v33 = vadd.f32 %v1529_v47, %v1484_v41 }
0x13d9   :  { %v2756_v58 = vmul.f32 -1.442695, %v1595_v46 }
0x13da   :  { %v1615_v62 = vadd.f32 %v1614_v39, %v1548_v54 }
0x13db   :  { %2920 = vpow2.f32 %v2756_v58 }
0x13dc   :  { %v2757_v60 = vmul.f32 -1.442695, %v1615_v62 }
0x13de   :  { %2922 = vpow2.f32 %v2757_v60 }
0x13e1   :  { %v2921_v53 = vpop.eup %2920 }
0x13e2   :  { %v1623_v4 = vadd.f32 1.0, %v2921_v53 }
0x13e4   :  { %v2923_v30 = vpop.eup %2922  ;;  %2924 = vrcp.f32 %v1623_v4  ;;  %v1636_v2 = vand.u32 2147483648, %v1623_v4  ;;  %v1634_v55 = vand.u32 2147483647, %v1623_v4  ;;  %vm1630_vm14 = vweird.f32 %v1623_v4 }
0x13e5   :  { %v1624_v32 = vadd.f32 1.0, %v2923_v30 }
0x13e6   :  { %v1637_v15 = vor.u32 1.1754944e-38, %v1636_v2  ;;  %vm1635_vm1 = vcmp.eq.f32.partialorder %v1634_v55, 8.507059e+37 }
0x13e7   :  { %2926 = vrcp.f32 %v1624_v32  ;;  %v1651_v14 = vand.u32 2147483648, %v1624_v32  ;;  %v1649_v56 = vand.u32 2147483647, %v1624_v32  ;;  %vm1645_vm2 = vweird.f32 %v1624_v32 }
0x13e8   :  { %2928 = vtanh.f32 %v1595_v46 }
0x13e9   :  { %2930 = vtanh.f32 %v1615_v62  ;;  %v1652_v24 = vor.u32 1.1754944e-38, %v1651_v14  ;;  %vm1650_vm4 = vcmp.eq.f32.partialorder %v1649_v56, 8.507059e+37 }
0x13ea   :  { %v2925_v44 = vpop.eup %2924 }
0x13eb   :  { %v1626_v61 = vmul.f32 %v2925_v44, %v1623_v4  ;;  %vm1631_vm13 = vweird.f32 %v2925_v44 }
0x13ec   :  { %vm1632_vm15 = vmor %vm1630_vm14, %vm1631_vm13 }
0x13ed   :  { %v2927_v6 = vpop.eup %2926  ;;  %v1627_v57 = vsub.f32 1.0, %v1626_v61 }
0x13ee   :  { %v1641_v45 = vmul.f32 %v2927_v6, %v1624_v32  ;;  %vm1646_vm0 = vweird.f32 %v2927_v6  ;;  %v2929_v21 = vpop.eup %2928 }
0x13ef   :  { %v1628_v47 = vmul.f32 %v2925_v44, %v1627_v57  ;;  %vm1647_vm3 = vmor %vm1645_vm2, %vm1646_vm0  ;;  %v2931_v27 = vpop.eup %2930 }
0x13f0   :  { %v1642_v63 = vsub.f32 1.0, %v1641_v45 }
0x13f1   :  { %v1629_v10 = vadd.f32 %v2925_v44, %v1628_v47 }
0x13f2   :  { %v1643_v13 = vmul.f32 %v2927_v6, %v1642_v63 }
0x13f3   :  { %v1633_v19 = vsel %vm1632_vm15, %v2925_v44, %v1629_v10 }
0x13f4   :  { %v1638_v34 = vsel %vm1635_vm1, %v1637_v15, %v1633_v19  ;;  %v1644_v38 = vadd.f32 %v2927_v6, %v1643_v13 }
0x13f5   :  { %v1657_v23 = vsel %vm3244_vm7, %v2929_v21, %v1638_v34 }
0x13f6   :  { %1663 = vrot.lane.b32.xlu2 %v1657_v23, %s3053_s0  ;;  %v1648_v26 = vsel %vm1647_vm3, %v2927_v6, %v1644_v38  ;;  %v1659_v41 = vmul.f32 0.0, %v1657_v23 }
0x13f7   :  { %v1653_v31 = vsel %vm1650_vm4, %v1652_v24, %v1648_v26 }
0x13f8   :  { %v1658_v59 = vsel %vm3244_vm7, %v2931_v27, %v1653_v31 }
0x13f9   :  { %1665 = vrot.lane.b32.xlu1 %v1658_v59, %s3053_s0  ;;  %v1660_v39 = vmul.f32 0.0, %v1658_v59 }
0x1450   :  { %v1664_v35 = vpop.permute.xlu2 %1663 }
0x1451   :  { %v1669_v36 = vmul.f32 %v1664_v35, %v1657_v23 }
0x1453   :  { %1673 = vrot.lane.b32.xlu1 %v1669_v36, %s3054_s3 }
0x146b   :  { %v1666_v40 = vpop.permute.xlu1 %1665 }
0x146c   :  { %v1670_v25 = vmul.f32 %v1666_v40, %v1658_v59 }
0x146e   :  { %1675 = vrot.lane.b32.xlu0 %v1670_v25, %s3054_s3 }
0x14c5   :  { %v1674_v42 = vpop.permute.xlu1 %1673 }
0x14c6   :  { %v3707_v43 = vadd.f32 %v1674_v42, %v1659_v41 }
0x14c8   :  { %2932 = vtanh.f32 %v3707_v43 }
0x14ce   :  { %v2933_v46 = vpop.eup %2932 }
0x14cf   :  { %1685 = vrot.lane.b32.xlu0 %v2933_v46, %s3053_s0 }
0x14e0   :  { %v1676_v54 = vpop.permute.xlu0 %1675 }
0x14e1   :  { %v3711_v58 = vadd.f32 %v1676_v54, %v1660_v39 }
0x14e3   :  { %2934 = vtanh.f32 %v3711_v58 }
0x14e9   :  { %v2935_v62 = vpop.eup %2934 }
0x14ea   :  { %1687 = vrot.lane.b32.xlu2 %v2935_v62, %s3053_s0 }
0x1541   :  { %v1686_v60 = vpop.permute.xlu0 %1685 }
0x1542   :  { %v1691_v53 = vmul.f32 %v1686_v60, %v1657_v23 }
0x1544   :  { %v1688_v4 = vpop.permute.xlu2 %1687  ;;  %1699 = vrot.lane.b32.xlu2 %v1691_v53, %s3054_s3 }
0x1545   :  { %v3716_v30 = vmul.f32 %v1688_v4, %v1658_v59 }
0x1547   :  { %1724 = vrot.lane.b32.xlu1 %v3716_v30, %s3054_s3 }
0x159e   :  { %v1700_v32 = vpop.permute.xlu2 %1699 }
0x159f   :  { %2758 = vmatmul.msk.f32.vlgmr.msrb.gmra.mxu2 %vm197_vm12, %v1700_v32 }
0x15a0   :  { %2235 = vmatpush.msrb.mxu2 %v3574_v18 }
0x15a2   :  { %2236 = vmatpush.msrb.mxu2 %v3592_v29 }
0x15a4   :  { %2237 = vmatpush.msrb.mxu2 %v3616_v5 }
0x15a6   :  { %2238 = vmatpush.msrb.mxu2 %v3621_v8 }
0x15b9   :  { %v1725_v44 = vpop.permute.xlu1 %1724 }
0x15ba   :  { %2759 = vmatmul.msk.f32.vlgmr.msrb.gmra.mxu3 %vm197_vm12, %v1725_v44 }
0x15bb   :  { %2260 = vmatpush.msrb.mxu3 %v3559_v16 }
0x15bd   :  { %2261 = vmatpush.msrb.mxu3 %v3566_v17 }
0x15bf   :  { %2262 = vmatpush.msrb.mxu3 %v3583_v20 }
0x15c1   :  { %2263 = vmatpush.msrb.mxu3 %v3601_v3 }
0x1622   :  { %v1720_v61 = vpop.f32.mrf.mxu2 }
0x1623   :  { %v1721_v6 = vadd.f32 %v1720_v61, %v3666_v48 }
0x1625   :  { %v2760_v57 = vmul.f32 -1.442695, %v1721_v6 }
0x1627   :  { %2936 = vpow2.f32 %v2760_v57 }
0x162d   :  { %v2937_v2 = vpop.eup %2936 }
0x162e   :  { %v1754_v45 = vadd.f32 1.0, %v2937_v2 }
0x1630   :  { %2938 = vrcp.f32 %v1754_v45  ;;  %v1767_v10 = vand.u32 2147483648, %v1754_v45  ;;  %v1765_v15 = vand.u32 2147483647, %v1754_v45  ;;  %vm1761_vm6 = vweird.f32 %v1754_v45 }
0x1631   :  { %2940 = vtanh.f32 %v1721_v6 }
0x1632   :  { %v1768_v48 = vor.u32 1.1754944e-38, %v1767_v10  ;;  %vm1766_vm9 = vcmp.eq.f32.partialorder %v1765_v15, 8.507059e+37 }
0x1636   :  { %v2939_v47 = vpop.eup %2938 }
0x1637   :  { %v1757_v55 = vmul.f32 %v2939_v47, %v1754_v45  ;;  %vm1762_vm5 = vweird.f32 %v2939_v47  ;;  %v2941_v34 = vpop.eup %2940 }
0x1638   :  { %vm1763_vm8 = vmor %vm1761_vm6, %vm1762_vm5 }
0x1639   :  { %v1758_v63 = vsub.f32 1.0, %v1757_v55 }
0x163b   :  { %v1759_v14 = vmul.f32 %v2939_v47, %v1758_v63 }
0x163d   :  { %v1745_v13 = vpop.f32.mrf.mxu3  ;;  %v1760_v56 = vadd.f32 %v2939_v47, %v1759_v14 }
0x163e   :  { %v1746_v19 = vadd.f32 %v1745_v13, %v3692_v28 }
0x163f   :  { %v1764_v21 = vsel %vm1763_vm8, %v2939_v47, %v1760_v56 }
0x1640   :  { %v2761_v38 = vmul.f32 -1.442695, %v1746_v19  ;;  %v1769_v23 = vsel %vm1766_vm9, %v1768_v48, %v1764_v21 }
0x1641   :  { %v1788_v24 = vsel %vm3244_vm7, %v2941_v34, %v1769_v23 }
0x1642   :  { %2942 = vpow2.f32 %v2761_v38  ;;  %1794 = vrot.lane.b32.xlu1 %v1788_v24, %s3053_s0  ;;  %v1790_v32 = vmul.f32 %v1788_v24, %v3707_v43 }
0x1648   :  { %v2943_v26 = vpop.eup %2942 }
0x1649   :  { %v1755_v27 = vadd.f32 1.0, %v2943_v26 }
0x164b   :  { %2944 = vrcp.f32 %v1755_v27  ;;  %v1782_v28 = vand.u32 2147483648, %v1755_v27  ;;  %v1780_v40 = vand.u32 2147483647, %v1755_v27  ;;  %vm1776_vm11 = vweird.f32 %v1755_v27 }
0x164c   :  { %2946 = vtanh.f32 %v1746_v19 }
0x164d   :  { %v1783_v41 = vor.u32 1.1754944e-38, %v1782_v28  ;;  %vm1781_vm14 = vcmp.eq.f32.partialorder %v1780_v40, 8.507059e+37 }
0x1651   :  { %v2945_v31 = vpop.eup %2944 }
0x1652   :  { %v1772_v59 = vmul.f32 %v2945_v31, %v1755_v27  ;;  %vm1777_vm10 = vweird.f32 %v2945_v31  ;;  %v2947_v46 = vpop.eup %2946 }
0x1653   :  { %vm1778_vm13 = vmor %vm1776_vm11, %vm1777_vm10 }
0x1654   :  { %v1773_v35 = vsub.f32 1.0, %v1772_v59 }
0x1656   :  { %v1774_v36 = vmul.f32 %v2945_v31, %v1773_v35 }
0x1658   :  { %v1775_v25 = vadd.f32 %v2945_v31, %v1774_v36 }
0x165a   :  { %v1779_v42 = vsel %vm1778_vm13, %v2945_v31, %v1775_v25 }
0x165b   :  { %v1784_v39 = vsel %vm1781_vm14, %v1783_v41, %v1779_v42 }
0x165c   :  { %v1789_v54 = vsel %vm3244_vm7, %v2947_v46, %v1784_v39 }
0x165d   :  { %1796 = vrot.lane.b32.xlu0 %v1789_v54, %s3053_s0  ;;  %v1791_v6 = vmul.f32 %v1789_v54, %v3711_v58 }
0x16b4   :  { %v1795_v62 = vpop.permute.xlu1 %1794 }
0x16b5   :  { %v1800_v60 = vmul.f32 %v1795_v62, %v1788_v24 }
0x16b7   :  { %1804 = vrot.lane.b32.xlu0 %v1800_v60, %s3054_s3 }
0x16cf   :  { %v1797_v53 = vpop.permute.xlu0 %1796 }
0x16d0   :  { %v1801_v4 = vmul.f32 %v1797_v53, %v1789_v54 }
0x16d2   :  { %1806 = vrot.lane.b32.xlu2 %v1801_v4, %s3054_s3 }
0x1729   :  { %v1805_v44 = vpop.permute.xlu0 %1804 }
0x172a   :  { %v3741_v61 = vadd.f32 %v1805_v44, %v1790_v32 }
0x172c   :  { %2948 = vtanh.f32 %v3741_v61  ;;  %v1807_v57 = vpop.permute.xlu2 %1806 }
0x172d   :  { %v3745_v2 = vadd.f32 %v1807_v57, %v1791_v6 }
0x172f   :  { %2950 = vtanh.f32 %v3745_v2 }
0x1732   :  { %v2949_v45 = vpop.eup %2948 }
0x1733   :  { %1816 = vrot.lane.b32.xlu2 %v2949_v45, %s3053_s0 }
0x1735   :  { %v2951_v47 = vpop.eup %2950 }
0x1736   :  { %1818 = vrot.lane.b32.xlu1 %v2951_v47, %s3053_s0 }
0x178d   :  { %v1817_v55 = vpop.permute.xlu2 %1816 }
0x178e   :  { %v1822_v43 = vmul.f32 %v1817_v55, %v1788_v24 }
0x1790   :  { %1831 = vrot.lane.b32.xlu1 %v1822_v43, %s3054_s3 }
0x17a8   :  { %v1819_v63 = vpop.permute.xlu1 %1818 }
0x17a9   :  { %v3751_v10 = vmul.f32 %v1819_v63, %v1789_v54 }
0x17ab   :  { %1856 = vrot.lane.b32.xlu0 %v3751_v10, %s3054_s3 }
0x1802   :  { %v1832_v58 = vpop.permute.xlu1 %1831 }
0x1803   :  { %2762 = vmatmul.msk.f32.vlgmr.msrb.gmra.mxu0 %vm197_vm12, %v1832_v58 }
0x1804   :  { %2363 = vmatpush.msrb.mxu0 %v3574_v18 }
0x1806   :  { %2364 = vmatpush.msrb.mxu0 %v3592_v29 }
0x1808   :  { %2365 = vmatpush.msrb.mxu0 %v3616_v5 }
0x180a   :  { %2366 = vmatpush.msrb.mxu0 %v3621_v8 }
0x181d   :  { %v1857_v14 = vpop.permute.xlu0 %1856 }
0x181e   :  { %2763 = vmatmul.msk.f32.vlgmr.msrb.gmra.mxu1 %vm197_vm12, %v1857_v14 }
0x181f   :  { %2388 = vmatpush.msrb.mxu1 %v3559_v16 }
0x1821   :  { %2389 = vmatpush.msrb.mxu1 %v3566_v17 }
0x1823   :  { %2390 = vmatpush.msrb.mxu1 %v3583_v20 }
0x1825   :  { %2391 = vmatpush.msrb.mxu1 %v3601_v3 }
0x1880   :  { %v1852_v15 = vpop.f32.mrf.mxu0 }
0x1881   :  { %v1853_v13 = vadd.f32 %v1852_v15, %v3671_v49 }
0x1883   :  { %v2764_v56 = vmul.f32 -1.442695, %v1853_v13 }
0x1885   :  { %2952 = vpow2.f32 %v2764_v56 }
0x188b   :  { %v2953_v19 = vpop.eup %2952 }
0x188c   :  { %v1886_v48 = vadd.f32 1.0, %v2953_v19 }
0x188e   :  { %2954 = vrcp.f32 %v1886_v48  ;;  %v1899_v23 = vand.u32 2147483648, %v1886_v48  ;;  %v1897_v26 = vand.u32 2147483647, %v1886_v48  ;;  %vm1893_vm0 = vweird.f32 %v1886_v48 }
0x188f   :  { %2956 = vtanh.f32 %v1853_v13 }
0x1890   :  { %v1900_v49 = vor.u32 1.1754944e-38, %v1899_v23  ;;  %vm1898_vm2 = vcmp.eq.f32.partialorder %v1897_v26, 8.507059e+37 }
0x1894   :  { %v2955_v21 = vpop.eup %2954 }
0x1895   :  { %v1889_v34 = vmul.f32 %v2955_v21, %v1886_v48  ;;  %vm1894_vm15 = vweird.f32 %v2955_v21  ;;  %v2957_v28 = vpop.eup %2956 }
0x1896   :  { %vm1895_vm1 = vmor %vm1893_vm0, %vm1894_vm15 }
0x1897   :  { %v1890_v38 = vsub.f32 1.0, %v1889_v34  ;;  %v1824_v34 = vmul.f32 0.0, %v3751_v10 }
0x1899   :  { %v1891_v24 = vmul.f32 %v2955_v21, %v1890_v38 }
0x189b   :  { %v1877_v27 = vpop.f32.mrf.mxu1  ;;  %v1892_v31 = vadd.f32 %v2955_v21, %v1891_v24  ;;  %v1825_v24 = vadd.f32 %v1824_v34, %v3716_v30 }
0x189c   :  { %v1878_v59 = vadd.f32 %v1877_v27, %v3687_v1 }
0x189d   :  { %v1896_v35 = vsel %vm1895_vm1, %v2955_v21, %v1892_v31 }
0x189e   :  { %v2765_v36 = vmul.f32 -1.442695, %v1878_v59  ;;  %v1901_v40 = vsel %vm1898_vm2, %v1900_v49, %v1896_v35 }
0x189f   :  { %v1920_v25 = vsel %vm3244_vm7, %v2957_v28, %v1901_v40 }
0x18a0   :  { %2958 = vpow2.f32 %v2765_v36  ;;  %1926 = vrot.lane.b32.xlu0 %v1920_v25, %s3053_s0  ;;  %v1922_v63 = vmul.f32 %v1920_v25, %v3741_v61 }
0x18a6   :  { %v2959_v41 = vpop.eup %2958 }
0x18a7   :  { %v1887_v42 = vadd.f32 1.0, %v2959_v41 }
0x18a9   :  { %2960 = vrcp.f32 %v1887_v42  ;;  %v1914_v1 = vand.u32 2147483648, %v1887_v42  ;;  %v1912_v60 = vand.u32 2147483647, %v1887_v42  ;;  %vm1908_vm4 = vweird.f32 %v1887_v42 }
0x18aa   :  { %2962 = vtanh.f32 %v1878_v59 }
0x18ab   :  { %v1915_v4 = vor.u32 1.1754944e-38, %v1914_v1  ;;  %vm1913_vm6 = vcmp.eq.f32.partialorder %v1912_v60, 8.507059e+37 }
0x18af   :  { %v2961_v46 = vpop.eup %2960 }
0x18b0   :  { %v1904_v39 = vmul.f32 %v2961_v46, %v1887_v42  ;;  %vm1909_vm3 = vweird.f32 %v2961_v46  ;;  %v2963_v44 = vpop.eup %2962 }
0x18b1   :  { %vm1910_vm5 = vmor %vm1908_vm4, %vm1909_vm3 }
0x18b2   :  { %v1905_v54 = vsub.f32 1.0, %v1904_v39 }
0x18b4   :  { %v1906_v62 = vmul.f32 %v2961_v46, %v1905_v54 }
0x18b6   :  { %v1907_v53 = vadd.f32 %v2961_v46, %v1906_v62 }
0x18b8   :  { %v1911_v32 = vsel %vm1910_vm5, %v2961_v46, %v1907_v53 }
0x18b9   :  { %v1916_v6 = vsel %vm1913_vm6, %v1915_v4, %v1911_v32 }
0x18ba   :  { %v1921_v57 = vsel %vm3244_vm7, %v2963_v44, %v1916_v6 }
0x18bb   :  { %1928 = vrot.lane.b32.xlu2 %v1921_v57, %s3053_s0  ;;  %v1923_v13 = vmul.f32 %v1921_v57, %v3745_v2 }
0x1912   :  { %v1927_v45 = vpop.permute.xlu0 %1926 }
0x1913   :  { %v1932_v47 = vmul.f32 %v1927_v45, %v1920_v25 }
0x1915   :  { %v1929_v55 = vpop.permute.xlu2 %1928  ;;  %1936 = vrot.lane.b32.xlu2 %v1932_v47, %s3054_s3 }
0x1916   :  { %v1933_v43 = vmul.f32 %v1929_v55, %v1921_v57 }
0x1918   :  { %1938 = vrot.lane.b32.xlu1 %v1933_v43, %s3054_s3 }
0x196f   :  { %v1937_v58 = vpop.permute.xlu2 %1936 }
0x1970   :  { %v3776_v14 = vadd.f32 %v1937_v58, %v1922_v63 }
0x1972   :  { %2964 = vtanh.f32 %v3776_v14 }
0x1978   :  { %v2965_v15 = vpop.eup %2964 }
0x1979   :  { %1948 = vrot.lane.b32.xlu1 %v2965_v15, %s3053_s0 }
0x198a   :  { %v1939_v56 = vpop.permute.xlu1 %1938 }
0x198b   :  { %v3781_v19 = vadd.f32 %v1939_v56, %v1923_v13 }
0x198d   :  { %2966 = vtanh.f32 %v3781_v19 }
0x1993   :  { %v2967_v48 = vpop.eup %2966 }
0x1994   :  { %1950 = vrot.lane.b32.xlu0 %v2967_v48, %s3053_s0 }
0x19eb   :  { %v1949_v21 = vpop.permute.xlu1 %1948 }
0x19ec   :  { %v1954_v61 = vmul.f32 %v1949_v21, %v1920_v25 }
0x19ee   :  { %1963 = vrot.lane.b32.xlu0 %v1954_v61, %s3054_s3 }
0x1a06   :  { %v1951_v38 = vpop.permute.xlu0 %1950 }
0x1a07   :  { %v1955_v23 = vmul.f32 %v1951_v38, %v1921_v57 }
0x1a09   :  { %v1956_v26 = vmul.f32 0.0, %v1955_v23  ;;  %1988 = vrot.lane.b32.xlu2 %v1955_v23, %s3054_s3 }
0x1a0b   :  { %v3789_v2 = vadd.f32 %v1956_v26, %v1825_v24 }
0x1a60   :  { %v1964_v27 = vpop.permute.xlu0 %1963 }
0x1a61   :  { %2766 = vmatmul.msk.f32.vlgmr.msra.gmra.mxu2 %vm197_vm12, %v1964_v27 }
0x1a62   :  { %2491 = vmatpush.msra.mxu2 %v3574_v18 }
0x1a63   :  { %v1989_v31 = vpop.permute.xlu2 %1988 }
0x1a64   :  { %2767 = vmatmul.msk.f32.vlgmr.msra.gmra.mxu3 %vm197_vm12, %v1989_v31  ;;  %2492 = vmatpush.msra.mxu2 %v3592_v29 }
0x1a65   :  { %2516 = vmatpush.msra.mxu3 %v3559_v16 }
0x1a66   :  { %2493 = vmatpush.msra.mxu2 %v3616_v5 }
0x1a67   :  { %2517 = vmatpush.msra.mxu3 %v3566_v17 }
0x1a68   :  { %2494 = vmatpush.msra.mxu2 %v3621_v8 }
0x1a69   :  { %2518 = vmatpush.msra.mxu3 %v3583_v20 }
0x1a6b   :  { %2519 = vmatpush.msra.mxu3 %v3601_v3 }
0x1ae4   :  { %v1984_v30 = vpop.f32.mrf.mxu2 }
0x1ae5   :  { %v1985_v18 = vadd.f32 %v1984_v30, %v3676_v7 }
0x1ae7   :  { %v2768_v10 = vmul.f32 -1.442695, %v1985_v18  ;;  %v2009_v59 = vpop.f32.mrf.mxu3 }
0x1ae8   :  { %v2010_v49 = vadd.f32 %v2009_v59, %v3682_v11 }
0x1ae9   :  { %2968 = vpow2.f32 %v2768_v10 }
0x1aea   :  { %v2769_v29 = vmul.f32 -1.442695, %v2010_v49 }
0x1aec   :  { %2970 = vpow2.f32 %v2769_v29 }
0x1aef   :  { %v2969_v16 = vpop.eup %2968 }
0x1af0   :  { %v2018_v5 = vadd.f32 1.0, %v2969_v16 }
0x1af2   :  { %v2971_v35 = vpop.eup %2970  ;;  %2972 = vrcp.f32 %v2018_v5  ;;  %v2031_v36 = vand.u32 2147483648, %v2018_v5  ;;  %v2029_v25 = vand.u32 2147483647, %v2018_v5  ;;  %vm2025_vm9 = vweird.f32 %v2018_v5 }
0x1af3   :  { %v2019_v17 = vadd.f32 1.0, %v2971_v35 }
0x1af4   :  { %v2032_v46 = vor.u32 1.1754944e-38, %v2031_v36  ;;  %vm2030_vm13 = vcmp.eq.f32.partialorder %v2029_v25, 8.507059e+37 }
0x1af5   :  { %2974 = vrcp.f32 %v2019_v17  ;;  %v2046_v42 = vand.u32 2147483648, %v2019_v17  ;;  %v2044_v54 = vand.u32 2147483647, %v2019_v17  ;;  %vm2040_vm14 = vweird.f32 %v2019_v17 }
0x1af6   :  { %2976 = vtanh.f32 %v1985_v18 }
0x1af7   :  { %2978 = vtanh.f32 %v2010_v49  ;;  %v2047_v32 = vor.u32 1.1754944e-38, %v2046_v42  ;;  %vm2045_vm0 = vcmp.eq.f32.partialorder %v2044_v54, 8.507059e+37 }
0x1af8   :  { %v2973_v8 = vpop.eup %2972 }
0x1af9   :  { %v2021_v20 = vmul.f32 %v2973_v8, %v2018_v5  ;;  %vm2026_vm8 = vweird.f32 %v2973_v8 }
0x1afa   :  { %vm2027_vm10 = vmor %vm2025_vm9, %vm2026_vm8 }
0x1afb   :  { %v2975_v28 = vpop.eup %2974  ;;  %v2022_v3 = vsub.f32 1.0, %v2021_v20 }
0x1afc   :  { %v2036_v7 = vmul.f32 %v2975_v28, %v2019_v17  ;;  %vm2041_vm11 = vweird.f32 %v2975_v28  ;;  %v2977_v62 = vpop.eup %2976 }
0x1afd   :  { %v2023_v40 = vmul.f32 %v2973_v8, %v2022_v3  ;;  %vm2042_vm15 = vmor %vm2040_vm14, %vm2041_vm11  ;;  %v2979_v6 = vpop.eup %2978 }
0x1afe   :  { %v2037_v11 = vsub.f32 1.0, %v2036_v7 }
0x1aff   :  { %v2024_v41 = vadd.f32 %v2973_v8, %v2023_v40 }
0x1b00   :  { %v2038_v39 = vmul.f32 %v2975_v28, %v2037_v11 }
0x1b01   :  { %v2028_v1 = vsel %vm2027_vm10, %v2973_v8, %v2024_v41 }
0x1b02   :  { %v2033_v60 = vsel %vm2030_vm13, %v2032_v46, %v2028_v1  ;;  %v2039_v53 = vadd.f32 %v2975_v28, %v2038_v39 }
0x1b03   :  { %v2052_v4 = vsel %vm3244_vm7, %v2977_v62, %v2033_v60 }
0x1b04   :  { %2058 = vrot.lane.b32.xlu2 %v2052_v4, %s3053_s0  ;;  %v2043_v44 = vsel %vm2042_vm15, %v2975_v28, %v2039_v53  ;;  %v2054_v58 = vmul.f32 %v2052_v4, %v3776_v14 }
0x1b05   :  { %v2048_v57 = vsel %vm2045_vm0, %v2047_v32, %v2043_v44 }
0x1b06   :  { %v2053_v45 = vsel %vm3244_vm7, %v2979_v6, %v2048_v57 }
0x1b07   :  { %2060 = vrot.lane.b32.xlu1 %v2053_v45, %s3053_s0  ;;  %v2055_v48 = vmul.f32 %v2053_v45, %v3781_v19 }
0x1b5e   :  { %v2059_v47 = vpop.permute.xlu2 %2058 }
0x1b5f   :  { %v2064_v55 = vmul.f32 %v2059_v47, %v2052_v4 }
0x1b61   :  { %2068 = vrot.lane.b32.xlu1 %v2064_v55, %s3054_s3 }
0x1b79   :  { %v2061_v43 = vpop.permute.xlu1 %2060 }
0x1b7a   :  { %v2065_v63 = vmul.f32 %v2061_v43, %v2053_v45 }
0x1b7c   :  { %2070 = vrot.lane.b32.xlu0 %v2065_v63, %s3054_s3 }
0x1bd3   :  { %v2069_v15 = vpop.permute.xlu1 %2068 }
0x1bd4   :  { %v3812_v13 = vadd.f32 %v2069_v15, %v2054_v58 }
0x1bd6   :  { %2980 = vtanh.f32 %v3812_v13 }
0x1bdc   :  { %v2981_v56 = vpop.eup %2980 }
0x1bdd   :  { %2080 = vrot.lane.b32.xlu0 %v2981_v56, %s3053_s0 }
0x1bee   :  { %v2071_v21 = vpop.permute.xlu0 %2070 }
0x1bef   :  { %v3817_v61 = vadd.f32 %v2071_v21, %v2055_v48 }
0x1bf1   :  { %2982 = vtanh.f32 %v3817_v61 }
0x1bf7   :  { %v2983_v34 = vpop.eup %2982 }
0x1bf8   :  { %2082 = vrot.lane.b32.xlu2 %v2983_v34, %s3053_s0 }
0x1c4f   :  { %v2081_v38 = vpop.permute.xlu0 %2080 }
0x1c50   :  { %v2086_v14 = vmul.f32 %v2081_v38, %v2052_v4 }
0x1c52   :  { %v2083_v23 = vpop.permute.xlu2 %2082  ;;  %2091 = vrot.lane.b32.xlu2 %v2086_v14, %s3054_s3 }
0x1c53   :  { %v2087_v24 = vmul.f32 %v2083_v23, %v2053_v45 }
0x1c55   :  { %v2088_v26 = vmul.f32 0.0, %v2087_v24  ;;  %2116 = vrot.lane.b32.xlu1 %v2087_v24, %s3054_s3 }
0x1c57   :  { %v3824_v27 = vadd.f32 %v2088_v26, %v3789_v2 }
0x1cac   :  { %v2092_v19 = vpop.permute.xlu2 %2091 }
0x1cad   :  { %2770 = vmatmul.msk.f32.vlgmr.msra.gmra.mxu0 %vm197_vm12, %v2092_v19 }
0x1cc7   :  { %v2117_v31 = vpop.permute.xlu1 %2116 }
0x1cc8   :  { %2771 = vmatmul.msk.f32.vlgmr.msra.gmra.mxu1 %vm197_vm12, %v2117_v31 }
0x1d2a   :  { %v2112_v30 = vpop.f32.mrf.mxu0 }
0x1d2b   :  { %v2113_v18 = vadd.f32 %v2112_v30, %v3684_v12 }
0x1d2d   :  { %v2772_v10 = vmul.f32 -1.442695, %v2113_v18 }
0x1d2f   :  { %2984 = vpow2.f32 %v2772_v10 }
0x1d35   :  { %v2985_v59 = vpop.eup %2984 }
0x1d36   :  { %v2146_v49 = vadd.f32 1.0, %v2985_v59 }
0x1d38   :  { %2986 = vrcp.f32 %v2146_v49  ;;  %v2159_v2 = vand.u32 2147483648, %v2146_v49  ;;  %v2157_v17 = vand.u32 2147483647, %v2146_v49  ;;  %vm2153_vm2 = vweird.f32 %v2146_v49 }
0x1d39   :  { %2988 = vtanh.f32 %v2113_v18 }
0x1d3a   :  { %v2160_v12 = vor.u32 1.1754944e-38, %v2159_v2  ;;  %vm2158_vm4 = vcmp.eq.f32.partialorder %v2157_v17, 8.507059e+37 }
0x1d3e   :  { %v2987_v29 = vpop.eup %2986 }
0x1d3f   :  { %v2149_v16 = vmul.f32 %v2987_v29, %v2146_v49  ;;  %vm2154_vm1 = vweird.f32 %v2987_v29  ;;  %v2989_v36 = vpop.eup %2988 }
0x1d40   :  { %vm2155_vm3 = vmor %vm2153_vm2, %vm2154_vm1 }
0x1d41   :  { %v2150_v5 = vsub.f32 1.0, %v2149_v16 }
0x1d43   :  { %v2151_v35 = vmul.f32 %v2987_v29, %v2150_v5 }
0x1d45   :  { %v2137_v8 = vpop.f32.mrf.mxu1  ;;  %v2152_v20 = vadd.f32 %v2987_v29, %v2151_v35 }
0x1d46   :  { %v2138_v28 = vadd.f32 %v2137_v8, %v3679_v51 }
0x1d47   :  { %v2156_v3 = vsel %vm2155_vm3, %v2987_v29, %v2152_v20 }
0x1d48   :  { %v2773_v7 = vmul.f32 -1.442695, %v2138_v28  ;;  %v2161_v40 = vsel %vm2158_vm4, %v2160_v12, %v2156_v3 }
0x1d49   :  { %v2180_v25 = vsel %vm3244_vm7, %v2989_v36, %v2161_v40 }
0x1d4a   :  { %2990 = vpow2.f32 %v2773_v7  ;;  %2186 = vrot.lane.b32.xlu1 %v2180_v25, %s3053_s0  ;;  %v2182_v55 = vmul.f32 %v2180_v25, %v3812_v13 }
0x1d50   :  { %v2991_v11 = vpop.eup %2990 }
0x1d51   :  { %v2147_v41 = vadd.f32 1.0, %v2991_v11 }
0x1d53   :  { %2992 = vrcp.f32 %v2147_v41  ;;  %v2174_v51 = vand.u32 2147483648, %v2147_v41  ;;  %v2172_v1 = vand.u32 2147483647, %v2147_v41  ;;  %vm2168_vm6 = vweird.f32 %v2147_v41 }
0x1d54   :  { %2994 = vtanh.f32 %v2138_v28 }
0x1d55   :  { %v2175_v60 = vor.u32 1.1754944e-38, %v2174_v51  ;;  %vm2173_vm9 = vcmp.eq.f32.partialorder %v2172_v1, 8.507059e+37 }
0x1d59   :  { %v2993_v42 = vpop.eup %2992 }
0x1d5a   :  { %v2164_v46 = vmul.f32 %v2993_v42, %v2147_v41  ;;  %vm2169_vm5 = vweird.f32 %v2993_v42  ;;  %v2995_v4 = vpop.eup %2994 }
0x1d5b   :  { %vm2170_vm8 = vmor %vm2168_vm6, %vm2169_vm5 }
0x1d5c   :  { %v2165_v39 = vsub.f32 1.0, %v2164_v46 }
0x1d5e   :  { %v2166_v54 = vmul.f32 %v2993_v42, %v2165_v39 }
0x1d60   :  { %v2167_v62 = vadd.f32 %v2993_v42, %v2166_v54 }
0x1d62   :  { %v2171_v53 = vsel %vm2170_vm8, %v2993_v42, %v2167_v62 }
0x1d63   :  { %v2176_v32 = vsel %vm2173_vm9, %v2175_v60, %v2171_v53 }
0x1d64   :  { %v2181_v44 = vsel %vm3244_vm7, %v2995_v4, %v2176_v32 }
0x1d65   :  { %2188 = vrot.lane.b32.xlu0 %v2181_v44, %s3053_s0  ;;  %v2183_v58 = vmul.f32 %v2181_v44, %v3817_v61 }
0x1dbc   :  { %v2187_v6 = vpop.permute.xlu1 %2186 }
0x1dbd   :  { %v2192_v57 = vmul.f32 %v2187_v6, %v2180_v25 }
0x1dbf   :  { %2196 = vrot.lane.b32.xlu0 %v2192_v57, %s3054_s3 }
0x1dd7   :  { %v2189_v45 = vpop.permute.xlu0 %2188 }
0x1dd8   :  { %v2193_v47 = vmul.f32 %v2189_v45, %v2181_v44 }
0x1dda   :  { %2198 = vrot.lane.b32.xlu2 %v2193_v47, %s3054_s3 }
0x1e31   :  { %v2197_v43 = vpop.permute.xlu0 %2196 }
0x1e32   :  { %v3839_v63 = vadd.f32 %v2197_v43, %v2182_v55 }
0x1e34   :  { %2996 = vtanh.f32 %v3839_v63  ;;  %v2199_v15 = vpop.permute.xlu2 %2198 }
0x1e35   :  { %v3843_v56 = vadd.f32 %v2199_v15, %v2183_v58 }
0x1e37   :  { %2998 = vtanh.f32 %v3843_v56 }
0x1e3a   :  { %v2997_v48 = vpop.eup %2996 }
0x1e3b   :  { %2208 = vrot.lane.b32.xlu2 %v2997_v48, %s3053_s0 }
0x1e3d   :  { %v2999_v21 = vpop.eup %2998 }
0x1e3e   :  { %2210 = vrot.lane.b32.xlu1 %v2999_v21, %s3053_s0 }
0x1e95   :  { %v2209_v34 = vpop.permute.xlu2 %2208 }
0x1e96   :  { %v2214_v13 = vmul.f32 %v2209_v34, %v2180_v25 }
0x1e98   :  { %2219 = vrot.lane.b32.xlu1 %v2214_v13, %s3054_s3 }
0x1eb0   :  { %v2211_v38 = vpop.permute.xlu1 %2210 }
0x1eb1   :  { %v2215_v14 = vmul.f32 %v2211_v38, %v2181_v44 }
0x1eb3   :  { %v2216_v61 = vmul.f32 0.0, %v2215_v14  ;;  %2244 = vrot.lane.b32.xlu0 %v2215_v14, %s3054_s3 }
0x1eb5   :  { %v3851_v23 = vadd.f32 %v2216_v61, %v3824_v27 }
0x1f0a   :  { %v2220_v24 = vpop.permute.xlu1 %2219 }
0x1f0b   :  { %2774 = vmatmul.msk.f32.vlgmr.msrb.gmra.mxu2 %vm197_vm12, %v2220_v24 }
0x1f25   :  { %v2245_v26 = vpop.permute.xlu0 %2244 }
0x1f26   :  { %2775 = vmatmul.msk.f32.vlgmr.msrb.gmra.mxu3 %vm197_vm12, %v2245_v26 }
0x1f8e   :  { %v2240_v19 = vpop.f32.mrf.mxu2 }
0x1f8f   :  { %v2241_v31 = vadd.f32 %v2240_v19, %v3689_v22 }
0x1f91   :  { %v2776_v30 = vmul.f32 -1.442695, %v2241_v31 }
0x1f93   :  { %3000 = vpow2.f32 %v2776_v30 }
0x1f99   :  { %v3001_v18 = vpop.eup %3000 }
0x1f9a   :  { %v2274_v10 = vadd.f32 1.0, %v3001_v18 }
0x1f9c   :  { %3002 = vrcp.f32 %v2274_v10  ;;  %v2287_v27 = vand.u32 2147483648, %v2274_v10  ;;  %v2285_v5 = vand.u32 2147483647, %v2274_v10  ;;  %vm2281_vm11 = vweird.f32 %v2274_v10 }
0x1f9d   :  { %3004 = vtanh.f32 %v2241_v31 }
0x1f9e   :  { %v2288_v22 = vor.u32 1.1754944e-38, %v2287_v27  ;;  %vm2286_vm14 = vcmp.eq.f32.partialorder %v2285_v5, 8.507059e+37 }
0x1fa2   :  { %v3003_v59 = vpop.eup %3002 }
0x1fa3   :  { %v2277_v49 = vmul.f32 %v3003_v59, %v2274_v10  ;;  %vm2282_vm10 = vweird.f32 %v3003_v59  ;;  %v3005_v20 = vpop.eup %3004 }
0x1fa4   :  { %vm2283_vm13 = vmor %vm2281_vm11, %vm2282_vm10 }
0x1fa5   :  { %v2278_v29 = vsub.f32 1.0, %v2277_v49 }
0x1fa7   :  { %v2279_v16 = vmul.f32 %v3003_v59, %v2278_v29 }
0x1fa9   :  { %v2265_v2 = vpop.f32.mrf.mxu3  ;;  %v2280_v35 = vadd.f32 %v3003_v59, %v2279_v16 }
0x1faa   :  { %v2266_v17 = vadd.f32 %v2265_v2, %v3674_v0 }
0x1fab   :  { %v2284_v8 = vsel %vm2283_vm13, %v3003_v59, %v2280_v35 }
0x1fac   :  { %v2777_v28 = vmul.f32 -1.442695, %v2266_v17  ;;  %v2289_v12 = vsel %vm2286_vm14, %v2288_v22, %v2284_v8 }
0x1fad   :  { %v2308_v3 = vsel %vm3244_vm7, %v3005_v20, %v2289_v12 }
0x1fae   :  { %3006 = vpow2.f32 %v2777_v28  ;;  %2314 = vrot.lane.b32.xlu0 %v2308_v3, %s3053_s0  ;;  %v2310_v44 = vmul.f32 %v2308_v3, %v3839_v63 }
0x1fb4   :  { %v3007_v36 = vpop.eup %3006 }
0x1fb5   :  { %v2275_v7 = vadd.f32 1.0, %v3007_v36 }
0x1fb7   :  { %3008 = vrcp.f32 %v2275_v7  ;;  %v2302_v0 = vand.u32 2147483648, %v2275_v7  ;;  %v2300_v42 = vand.u32 2147483647, %v2275_v7  ;;  %vm2296_vm0 = vweird.f32 %v2275_v7 }
0x1fb8   :  { %3010 = vtanh.f32 %v2266_v17 }
0x1fb9   :  { %v2303_v39 = vor.u32 1.1754944e-38, %v2302_v0  ;;  %vm2301_vm2 = vcmp.eq.f32.partialorder %v2300_v42, 8.507059e+37 }
0x1fbd   :  { %v3009_v40 = vpop.eup %3008 }
0x1fbe   :  { %v2292_v25 = vmul.f32 %v3009_v40, %v2275_v7  ;;  %vm2297_vm15 = vweird.f32 %v3009_v40  ;;  %v3011_v54 = vpop.eup %3010 }
0x1fbf   :  { %vm2298_vm1 = vmor %vm2296_vm0, %vm2297_vm15 }
0x1fc0   :  { %v2293_v11 = vsub.f32 1.0, %v2292_v25 }
0x1fc2   :  { %v2294_v41 = vmul.f32 %v3009_v40, %v2293_v11 }
0x1fc4   :  { %v2295_v46 = vadd.f32 %v3009_v40, %v2294_v41 }
0x1fc6   :  { %v2299_v51 = vsel %vm2298_vm1, %v3009_v40, %v2295_v46 }
0x1fc7   :  { %v2304_v1 = vsel %vm2301_vm2, %v2303_v39, %v2299_v51 }
0x1fc8   :  { %v2309_v62 = vsel %vm3244_vm7, %v3011_v54, %v2304_v1 }
0x1fc9   :  { %2316 = vrot.lane.b32.xlu2 %v2309_v62, %s3053_s0  ;;  %v2311_v47 = vmul.f32 %v2309_v62, %v3843_v56 }
0x2020   :  { %v2315_v60 = vpop.permute.xlu0 %2314 }
0x2021   :  { %v2320_v53 = vmul.f32 %v2315_v60, %v2308_v3 }
0x2023   :  { %v2317_v4 = vpop.permute.xlu2 %2316  ;;  %2324 = vrot.lane.b32.xlu2 %v2320_v53, %s3054_s3 }
0x2024   :  { %v2321_v32 = vmul.f32 %v2317_v4, %v2309_v62 }
0x2026   :  { %2326 = vrot.lane.b32.xlu1 %v2321_v32, %s3054_s3 }
0x207d   :  { %v2325_v6 = vpop.permute.xlu2 %2324 }
0x207e   :  { %v3866_v57 = vadd.f32 %v2325_v6, %v2310_v44 }
0x2080   :  { %3012 = vtanh.f32 %v3866_v57 }
0x2086   :  { %v3013_v45 = vpop.eup %3012 }
0x2087   :  { %2336 = vrot.lane.b32.xlu1 %v3013_v45, %s3053_s0 }
0x2098   :  { %v2327_v55 = vpop.permute.xlu1 %2326 }
0x2099   :  { %v3871_v43 = vadd.f32 %v2327_v55, %v2311_v47 }
0x209b   :  { %3014 = vtanh.f32 %v3871_v43 }
0x20a1   :  { %v3015_v58 = vpop.eup %3014 }
0x20a2   :  { %2338 = vrot.lane.b32.xlu0 %v3015_v58, %s3053_s0 }
0x20f9   :  { %v2337_v15 = vpop.permute.xlu1 %2336 }
0x20fa   :  { %v2342_v63 = vmul.f32 %v2337_v15, %v2308_v3 }
0x20fc   :  { %2347 = vrot.lane.b32.xlu0 %v2342_v63, %s3054_s3 }
0x2114   :  { %v2339_v48 = vpop.permute.xlu0 %2338 }
0x2115   :  { %v2343_v21 = vmul.f32 %v2339_v48, %v2309_v62 }
0x2117   :  { %v2344_v34 = vmul.f32 0.0, %v2343_v21  ;;  %2372 = vrot.lane.b32.xlu2 %v2343_v21, %s3054_s3 }
0x2119   :  { %v3878_v13 = vadd.f32 %v2344_v34, %v3851_v23 }
0x216e   :  { %v2348_v56 = vpop.permute.xlu0 %2347 }
0x216f   :  { %2778 = vmatmul.msk.f32.vlgmr.msrb.gmra.mxu0 %vm197_vm12, %v2348_v56 }
0x2171   :  { %v2373_v38 = vpop.permute.xlu2 %2372 }
0x2172   :  { %2779 = vmatmul.msk.f32.vlgmr.msrb.gmra.mxu1 %vm197_vm12, %v2373_v38 }
0x21ec   :  { %v2368_v14 = vpop.f32.mrf.mxu0 }
0x21ed   :  { %v2369_v61 = vadd.f32 %v2368_v14, %v3694_v9 }
0x21ef   :  { %v2780_v24 = vmul.f32 -1.442695, %v2369_v61  ;;  %v2393_v26 = vpop.f32.mrf.mxu1 }
0x21f0   :  { %v2394_v19 = vadd.f32 %v2393_v26, %v3669_v50 }
0x21f1   :  { %3016 = vpow2.f32 %v2780_v24 }
0x21f2   :  { %v2781_v31 = vmul.f32 -1.442695, %v2394_v19 }
0x21f4   :  { %3018 = vpow2.f32 %v2781_v31 }
0x21f7   :  { %v3017_v30 = vpop.eup %3016 }
0x21f8   :  { %v2402_v18 = vadd.f32 1.0, %v3017_v30 }
0x21fa   :  { %v3019_v23 = vpop.eup %3018  ;;  %3020 = vrcp.f32 %v2402_v18  ;;  %v2415_v16 = vand.u32 2147483648, %v2402_v18  ;;  %v2413_v2 = vand.u32 2147483647, %v2402_v18  ;;  %vm2409_vm4 = vweird.f32 %v2402_v18 }
0x21fb   :  { %v2403_v10 = vadd.f32 1.0, %v3019_v23 }
0x21fc   :  { %v2416_v22 = vor.u32 1.1754944e-38, %v2415_v16  ;;  %vm2414_vm8 = vcmp.eq.f32.partialorder %v2413_v2, 8.507059e+37 }
0x21fd   :  { %3022 = vrcp.f32 %v2403_v10  ;;  %v2430_v17 = vand.u32 2147483648, %v2403_v10  ;;  %v2428_v20 = vand.u32 2147483647, %v2403_v10  ;;  %vm2424_vm9 = vweird.f32 %v2403_v10 }
0x21fe   :  { %3024 = vtanh.f32 %v2369_v61 }
0x21ff   :  { %3026 = vtanh.f32 %v2394_v19  ;;  %v2431_v40 = vor.u32 1.1754944e-38, %v2430_v17  ;;  %vm2429_vm11 = vcmp.eq.f32.partialorder %v2428_v20, 8.507059e+37 }
0x2200   :  { %v3021_v59 = vpop.eup %3020 }
0x2201   :  { %v2405_v49 = vmul.f32 %v3021_v59, %v2402_v18  ;;  %vm2410_vm3 = vweird.f32 %v3021_v59 }
0x2202   :  { %vm2411_vm5 = vmor %vm2409_vm4, %vm2410_vm3 }
0x2203   :  { %v3023_v29 = vpop.eup %3022  ;;  %v2406_v27 = vsub.f32 1.0, %v2405_v49 }
0x2204   :  { %v2420_v9 = vmul.f32 %v3023_v29, %v2403_v10  ;;  %vm2425_vm6 = vweird.f32 %v3023_v29  ;;  %v3025_v12 = vpop.eup %3024 }
0x2205   :  { %v2407_v5 = vmul.f32 %v3021_v59, %v2406_v27  ;;  %vm2426_vm10 = vmor %vm2424_vm9, %vm2425_vm6  ;;  %v3027_v11 = vpop.eup %3026 }
0x2206   :  { %v2421_v50 = vsub.f32 1.0, %v2420_v9 }
0x2207   :  { %v2408_v35 = vadd.f32 %v3021_v59, %v2407_v5 }
0x2208   :  { %v2422_v8 = vmul.f32 %v3023_v29, %v2421_v50 }
0x2209   :  { %v2412_v28 = vsel %vm2411_vm5, %v3021_v59, %v2408_v35 }
0x220a   :  { %v2417_v3 = vsel %vm2414_vm8, %v2416_v22, %v2412_v28  ;;  %v2423_v36 = vadd.f32 %v3023_v29, %v2422_v8 }
0x220b   :  { %v2436_v7 = vsel %vm3244_vm7, %v3025_v12, %v2417_v3 }
0x220c   :  { %2442 = vrot.lane.b32.xlu2 %v2436_v7, %s3053_s0  ;;  %v2427_v25 = vsel %vm2426_vm10, %v3023_v29, %v2423_v36  ;;  %v2438_v54 = vmul.f32 %v2436_v7, %v3866_v57 }
0x220d   :  { %v2432_v0 = vsel %vm2429_vm11, %v2431_v40, %v2427_v25 }
0x220e   :  { %v2437_v41 = vsel %vm3244_vm7, %v3027_v11, %v2432_v0 }
0x220f   :  { %2444 = vrot.lane.b32.xlu1 %v2437_v41, %s3053_s0  ;;  %v2439_v53 = vmul.f32 %v2437_v41, %v3871_v43 }
0x2266   :  { %v2443_v42 = vpop.permute.xlu2 %2442 }
0x2267   :  { %v2448_v46 = vmul.f32 %v2443_v42, %v2436_v7 }
0x2269   :  { %2452 = vrot.lane.b32.xlu1 %v2448_v46, %s3054_s3 }
0x2281   :  { %v2445_v39 = vpop.permute.xlu1 %2444 }
0x2282   :  { %v2449_v51 = vmul.f32 %v2445_v39, %v2437_v41 }
0x2284   :  { %2454 = vrot.lane.b32.xlu0 %v2449_v51, %s3054_s3 }
0x22db   :  { %v2453_v1 = vpop.permute.xlu1 %2452 }
0x22dc   :  { %v3893_v62 = vadd.f32 %v2453_v1, %v2438_v54  ;;  %v2605_v54 = vld [vmem:[%s3965_s7 + $0x18] sm:$0xff]  ;;  %v2604_v1 = vld [vmem:[%s3965_s7 + $0x10] sm:$0xff] }
0x22dd   :  { %2652 = vmatpush.msra.mxu1 %v2605_v54 }
0x22de   :  { %3028 = vtanh.f32 %v3893_v62 }
0x22df   :  { %2653 = vmatpush.msra.mxu1 %v2604_v1 }
0x22e4   :  { %v3029_v60 = vpop.eup %3028 }
0x22e5   :  { %2464 = vrot.lane.b32.xlu0 %v3029_v60, %s3053_s0  ;;  %v2602_v60 = vld [vmem:[%s3965_s7] sm:$0xff] }
0x22f6   :  { %v2455_v4 = vpop.permute.xlu0 %2454 }
0x22f7   :  { %v3898_v32 = vadd.f32 %v2455_v4, %v2439_v53 }
0x22f9   :  { %3030 = vtanh.f32 %v3898_v32 }
0x22ff   :  { %v3031_v44 = vpop.eup %3030 }
0x2300   :  { %2466 = vrot.lane.b32.xlu2 %v3031_v44, %s3053_s0 }
0x2357   :  { %v2465_v6 = vpop.permute.xlu0 %2464 }
0x2358   :  { %v2470_v57 = vmul.f32 %v2465_v6, %v2436_v7  ;;  %v2609_v6 = vld [vmem:[%s3966_s8 + $0x18] sm:$0xff] }
0x2359   :  { %2627 = vmatpush.msra.mxu0 %v2609_v6 }
0x235a   :  { %v2467_v45 = vpop.permute.xlu2 %2466  ;;  %2475 = vrot.lane.b32.xlu2 %v2470_v57, %s3054_s3  ;;  %v2608_v57 = vld [vmem:[%s3966_s8 + $0x10] sm:$0xff] }
0x235b   :  { %v2471_v47 = vmul.f32 %v2467_v45, %v2437_v41  ;;  %v2607_v45 = vld [vmem:[%s3966_s8 + $0x8] sm:$0xff]  ;;  %2628 = vmatpush.msra.mxu0 %v2608_v57 }
0x235d   :  { %v2472_v55 = vmul.f32 0.0, %v2471_v47  ;;  %2500 = vrot.lane.b32.xlu1 %v2471_v47, %s3054_s3  ;;  %v2606_v47 = vld [vmem:[%s3966_s8] sm:$0xff]  ;;  %2629 = vmatpush.msra.mxu0 %v2607_v45 }
0x235f   :  { %v3905_v58 = vadd.f32 %v2472_v55, %v3878_v13  ;;  %2630 = vmatpush.msra.mxu0 %v2606_v47 }
0x23b4   :  { %v2476_v43 = vpop.permute.xlu2 %2475 }
0x23b5   :  { %2782 = vmatmul.msk.f32.vlgmr.msra.gmra.mxu2 %vm197_vm12, %v2476_v43  ;;  %v2791_v43 = vld [vmem:[%s3967_s9] ss:$0 sm:$0xff] }
0x23cf   :  { %v2501_v15 = vpop.permute.xlu1 %2500 }
0x23d0   :  { %2783 = vmatmul.msk.f32.vlgmr.msra.gmra.mxu3 %vm197_vm12, %v2501_v15 }
0x2438   :  { %v2496_v63 = vpop.f32.mrf.mxu2 }
0x2439   :  { %v2497_v48 = vadd.f32 %v2496_v63, %v3697_v33 }
0x243b   :  { %v2784_v21 = vmul.f32 -1.442695, %v2497_v48 }
0x243d   :  { %3032 = vpow2.f32 %v2784_v21 }
0x2443   :  { %v3033_v34 = vpop.eup %3032 }
0x2444   :  { %v2530_v56 = vadd.f32 1.0, %v3033_v34 }
0x2446   :  { %3034 = vrcp.f32 %v2530_v56  ;;  %v2543_v13 = vand.u32 2147483648, %v2530_v56  ;;  %v2541_v26 = vand.u32 2147483647, %v2530_v56  ;;  %vm2537_vm14 = vweird.f32 %v2530_v56 }
0x2447   :  { %3036 = vtanh.f32 %v2497_v48 }
0x2448   :  { %v2544_v33 = vor.u32 1.1754944e-38, %v2543_v13  ;;  %vm2542_vm0 = vcmp.eq.f32.partialorder %v2541_v26, 8.507059e+37 }
0x244c   :  { %v3035_v38 = vpop.eup %3034 }
0x244d   :  { %v2533_v14 = vmul.f32 %v3035_v38, %v2530_v56  ;;  %vm2538_vm13 = vweird.f32 %v3035_v38  ;;  %v3037_v23 = vpop.eup %3036 }
0x244e   :  { %vm2539_vm15 = vmor %vm2537_vm14, %vm2538_vm13 }
0x244f   :  { %v2534_v61 = vsub.f32 1.0, %v2533_v14 }
0x2451   :  { %v2535_v24 = vmul.f32 %v3035_v38, %v2534_v61 }
0x2453   :  { %v2521_v19 = vpop.f32.mrf.mxu3  ;;  %v2536_v31 = vadd.f32 %v3035_v38, %v2535_v24 }
0x2454   :  { %v2522_v30 = vadd.f32 %v2521_v19, %v3664_v37 }
0x2455   :  { %v2540_v18 = vsel %vm2539_vm15, %v3035_v38, %v2536_v31 }
0x2456   :  { %v2785_v10 = vmul.f32 -1.442695, %v2522_v30  ;;  %v2545_v59 = vsel %vm2542_vm0, %v2544_v33, %v2540_v18 }
0x2457   :  { %v2564_v49 = vsel %vm3244_vm7, %v3037_v23, %v2545_v59 }
0x2458   :  { %3038 = vpow2.f32 %v2785_v10  ;;  %2570 = vrot.lane.b32.xlu1 %v2564_v49, %s3053_s0  ;;  %v2566_v40 = vmul.f32 %v2564_v49, %v3893_v62  ;;  %v2603_v62 = vld [vmem:[%s3965_s7 + $0x8] sm:$0xff] }
0x2459   :  { %2654 = vmatpush.msra.mxu1 %v2603_v62 }
0x245b   :  { %2655 = vmatpush.msra.mxu1 %v2602_v60 }
0x245e   :  { %v3039_v29 = vpop.eup %3038 }
0x245f   :  { %v2531_v27 = vadd.f32 1.0, %v3039_v29 }
0x2461   :  { %3040 = vrcp.f32 %v2531_v27  ;;  %v2558_v37 = vand.u32 2147483648, %v2531_v27  ;;  %v2556_v50 = vand.u32 2147483647, %v2531_v27  ;;  %vm2552_vm2 = vweird.f32 %v2531_v27 }
0x2462   :  { %3042 = vtanh.f32 %v2522_v30 }
0x2463   :  { %v2559_v17 = vor.u32 1.1754944e-38, %v2558_v37  ;;  %vm2557_vm4 = vcmp.eq.f32.partialorder %v2556_v50, 8.507059e+37 }
0x2467   :  { %v3041_v16 = vpop.eup %3040 }
0x2468   :  { %v2548_v9 = vmul.f32 %v3041_v16, %v2531_v27  ;;  %vm2553_vm1 = vweird.f32 %v3041_v16  ;;  %v3043_v8 = vpop.eup %3042 }
0x2469   :  { %vm2554_vm3 = vmor %vm2552_vm2, %vm2553_vm1 }
0x246a   :  { %v2549_v5 = vsub.f32 1.0, %v2548_v9 }
0x246c   :  { %v2550_v2 = vmul.f32 %v3041_v16, %v2549_v5 }
0x246e   :  { %v2551_v35 = vadd.f32 %v3041_v16, %v2550_v2 }
0x2470   :  { %v2555_v22 = vsel %vm2554_vm3, %v3041_v16, %v2551_v35 }
0x2471   :  { %v2560_v20 = vsel %vm2557_vm4, %v2559_v17, %v2555_v22 }
0x2472   :  { %v2565_v28 = vsel %vm3244_vm7, %v3043_v8, %v2560_v20  ;;  %vm2665_vm7 = vcmask 31744  }
0x2473   :  { %2572 = vrot.lane.b32.xlu0 %v2565_v28, %s3053_s0  ;;  %v2567_v0 = vmul.f32 %v2565_v28, %v3898_v32 }
0x24ca   :  { %v2571_v12 = vpop.permute.xlu1 %2570 }
0x24cb   :  { %v2576_v3 = vmul.f32 %v2571_v12, %v2564_v49 }
0x24cd   :  { %2580 = vrot.lane.b32.xlu0 %v2576_v3, %s3054_s3 }
0x24e5   :  { %v2573_v36 = vpop.permute.xlu0 %2572 }
0x24e6   :  { %v2577_v7 = vmul.f32 %v2573_v36, %v2565_v28 }
0x24e8   :  { %2582 = vrot.lane.b32.xlu2 %v2577_v7, %s3054_s3 }
0x253f   :  { %v2581_v25 = vpop.permute.xlu0 %2580 }
0x2540   :  { %v2586_v11 = vadd.f32 %v2581_v25, %v2566_v40 }
0x2542   :  { %3044 = vtanh.f32 %v2586_v11  ;;  %v2583_v41 = vpop.permute.xlu2 %2582 }
0x2543   :  { %v2587_v52 = vadd.f32 %v2583_v41, %v2567_v0 }
0x2545   :  { %3046 = vtanh.f32 %v2587_v52 }
0x2548   :  { %v3045_v42 = vpop.eup %3044 }
0x2549   :  { %2592 = vrot.lane.b32.xlu2 %v3045_v42, %s3053_s0 }
0x254b   :  { %v3047_v46 = vpop.eup %3046 }
0x254c   :  { %2594 = vrot.lane.b32.xlu1 %v3047_v46, %s3053_s0 }
0x25a3   :  { %v2593_v39 = vpop.permute.xlu2 %2592 }
0x25a4   :  { %v2598_v51 = vmul.f32 %v2593_v39, %v2564_v49 }
0x25a6   :  { %2636 = vrot.lane.b32.xlu1 %v2598_v51, %s3054_s3 }
0x25be   :  { %v2595_v53 = vpop.permute.xlu1 %2594 }
0x25bf   :  { %v2599_v4 = vmul.f32 %v2595_v53, %v2565_v28 }
0x25c1   :  { %v2600_v32 = vmul.f32 0.0, %v2599_v4 }
0x25c3   :  { %v2601_v44 = vadd.f32 %v2600_v32, %v3905_v58 }
0x25c5   :  { %2611 = vrot.lane.b32.xlu0 %v2601_v44, %s3054_s3 }
0x2618   :  { %v2637_v55 = vpop.permute.xlu1 %2636 }
0x2619   :  { %2787 = vmatmul.msk.f32.vlgmr.msra.gmra.mxu1 %vm197_vm12, %v2637_v55 }
0x2637   :  { %v2612_v58 = vpop.permute.xlu0 %2611 }
0x2638   :  { %2786 = vmatmul.msk.f32.vlgmr.msra.gmra.mxu0 %vm197_vm12, %v2612_v58 }
0x2696   :  { %v2657_v15 = vpop.f32.mrf.mxu1 }
0x26b5   :  { %v2632_v63 = vpop.f32.mrf.mxu0 }
0x26b6   :  { %v2658_v48 = vadd.f32 %v2657_v15, %v2632_v63 }
0x26b8   :  { %v2664_v21 = vadd.f32 %v2791_v43, %v2658_v48 }
0x26ba   :  { %2666 = vst.msk [vmem:[%s3968_s10] sm:$0xff] %vm2665_vm7, %v2664_v21 }

</bundles_post_ra>
